<compile_context>
chip_gen: v7x
topology: tpu7x:2x2x1
jax: 0.10.0
libtpu: 0.0.40
codegen_flags: <defaults>
</compile_context>

<pallas_src>
import jax
import jax.numpy as jnp
import numpy as np
from jax import lax
from jax.experimental import pallas as pl
from jax.experimental.pallas import tpu as pltpu


def decoder_kernel(x_ref, y_ref, a1wh_ref, a1wc_ref, a1b_ref, a2wT_ref, a2b_ref,
                   a3w_ref, a3b_ref, wgy_ref, wgc_ref, bg_ref, whhT_ref,
                   wfh_ref, wfc_ref, bf_ref,
                   out_ref, thh_ref, thc_ref):
    # x_ref: (Bp, T, E) encoder outputs (batch padded to a sublane multiple)
    # y_ref: (T*Bp, Y) driving series, time-major and flattened
    # out_ref: (T*Bp, OUT) lane-compact 2-D output slab
    f32 = jnp.float32
    x = x_ref[...]
    Bp, T, E = x.shape
    D = whhT_ref.shape[0]

    # Hoist all weight loads used inside the unrolled recurrence.
    a1wh = a1wh_ref[...]                 # (D, E)  attn1 weight, hidden half, pre-T
    a1wc = a1wc_ref[...]                 # (D, E)  attn1 weight, cell half, pre-T
    a1b = a1b_ref[...]                   # (1, E)
    a3w = a3w_ref[...]                   # (1, E)
    a3b = a3b_ref[0, 0]                  # scalar (SMEM)
    wgc = wgc_ref[...]                   # (E, 4D) fused (wih@tw) ctx block, pre-T
    whhT = whhT_ref[...]                 # (D, 4D)

    # attn2(input_encoded) is identical at every decoder step -> compute once.
    x2d = x.reshape(Bp * T, E)
    z2 = (jnp.dot(x2d, a2wT_ref[...], preferred_element_type=f32)
          + a2b_ref[...]).reshape(Bp, T, E)

    # y-dependent LSTM gate contribution (tilde fused into the ih weights) plus
    # every constant gate bias, hoisted out of the serial recurrence.
    ygates = (jnp.dot(y_ref[...], wgy_ref[...], preferred_element_type=f32)
              + bg_ref[...])             # (T*Bp, 4D)

    h = jnp.zeros((Bp, D), f32)
    c = jnp.zeros((Bp, D), f32)

    for t in range(T):  # static T -> fully unrolled; h/c stay vreg-resident
        # Attention over the T encoder positions (split matmuls, no lane concat).
        z1 = (jnp.dot(h, a1wh, preferred_element_type=f32)
              + jnp.dot(c, a1wc, preferred_element_type=f32) + a1b)   # (Bp, E)
        z = jnp.tanh(z1[:, None, :] + z2)                             # (Bp, T, E)
        scores = jnp.sum(z * a3w, axis=2) + a3b                       # (Bp, T)
        m = jnp.max(scores, axis=1, keepdims=True)
        e = jnp.exp(scores - m)
        att = e * pl.reciprocal(jnp.sum(e, axis=1, keepdims=True))    # exact
        ctx = jnp.sum(att[:, :, None] * x, axis=1)                    # (Bp, E)

        if t < T - 1:   # last iteration peeled: no LSTM update at t == T-1
            gates = (ygates[t * Bp:(t + 1) * Bp, :]
                     + jnp.dot(ctx, wgc, preferred_element_type=f32)
                     + jnp.dot(h, whhT, preferred_element_type=f32))  # (Bp, 4D)
            i_g = jax.nn.sigmoid(gates[:, 0:D])
            f_g = jax.nn.sigmoid(gates[:, D:2 * D])
            g_g = jnp.tanh(gates[:, 2 * D:3 * D])
            o_g = jax.nn.sigmoid(gates[:, 3 * D:4 * D])
            c = f_g * c + i_g * g_g
            h = o_g * jnp.tanh(c)

        # total_hidden[:, t, :] = cat(hidden, context), kept as two split slabs.
        thh_ref[t * Bp:(t + 1) * Bp, :] = h
        thc_ref[t * Bp:(t + 1) * Bp, :] = ctx

    # incre branch: fc2(fc1(total_hidden)) fused into one affine map, applied
    # with split matmuls over the hidden / context slabs.
    out_ref[...] = (jnp.dot(thh_ref[...], wfh_ref[...], preferred_element_type=f32)
                    + jnp.dot(thc_ref[...], wfc_ref[...], preferred_element_type=f32)
                    + bf_ref[...])


@jax.jit
def decoder_forward(input_encoded, y_seq, p):
    B, T, E = input_encoded.shape
    D = p["whh"].shape[1]
    OUT = p["f2w"].shape[0]
    Y = y_seq.shape[-1]
    hp = jax.lax.Precision.HIGHEST

    # Pad batch to the f32 sublane count (8) so vregs / MXU rows are not empty.
    Bp = -(-B // 8) * 8
    x = jnp.zeros((Bp, T, E), jnp.float32).at[:B].set(input_encoded)
    y = jnp.zeros((Bp, T, Y), jnp.float32).at[:B].set(y_seq)
    y2d = jnp.transpose(y, (1, 0, 2)).reshape(T * Bp, Y)   # time-major, flat

    # One-time exact weight fusion / pre-transposition (outside the kernel).
    a1wh = p["a1w"][:, :D].T                 # (D, E)
    a1wc = p["a1w"][:, D:].T                 # (D, E)
    a2wT = p["a2w"].T                        # (E, E)
    wg = jnp.dot(p["wih"], p["tw"], precision=hp)          # (4D, Y+E) tilde∘lstm_ih
    wgy = wg[:, :Y].T                        # (Y, 4D)
    wgc = wg[:, Y:].T                        # (E, 4D)
    bg = (jnp.dot(p["tb"], p["wih"].T, precision=hp)
          + p["bih"] + p["bhh"])             # (1, 4D)
    whhT = p["whh"].T                        # (D, 4D)
    wf = jnp.dot(p["f2w"], p["f1w"], precision=hp)          # (OUT, D+E) fc2∘fc1
    wfh = wf[:, :D].T                        # (D, OUT)
    wfc = wf[:, D:].T                        # (E, OUT)
    bf = jnp.dot(p["f1b"], p["f2w"].T, precision=hp) + p["f2b"]   # (1, OUT)

    args = (x, y2d, a1wh, a1wc, p["a1b"], a2wT, p["a2b"], p["a3w"], p["a3b"],
            wgy, wgc, bg, whhT, wfh, wfc, bf)

    vmem = pl.BlockSpec(memory_space=pltpu.MemorySpace.VMEM)
    smem = pl.BlockSpec(memory_space=pltpu.MemorySpace.SMEM)
    in_specs = [vmem] * len(args)
    in_specs[8] = smem                       # a3b: (1,1) scalar lives in SMEM

    out2d = pl.pallas_call(
        decoder_kernel,
        out_shape=jax.ShapeDtypeStruct((T * Bp, OUT), jnp.float32),
        in_specs=in_specs,
        out_specs=vmem,
        scratch_shapes=[
            pltpu.VMEM((T * Bp, D), jnp.float32),   # total_hidden: hidden slab
            pltpu.VMEM((T * Bp, E), jnp.float32),   # total_hidden: context slab
        ],
    )(*args)

    # (T*Bp, OUT) -> (B, T, OUT), dropping the batch padding.
    return out2d.reshape(T, Bp, OUT).transpose(1, 0, 2)[:B]


def decoder_reference(x, y, p):
    """Pure-JAX reference mirroring the PyTorch forward (incre=True, drop=False)."""
    B, T, E = x.shape
    D = p["whh"].shape[1]
    h = jnp.zeros((B, D), jnp.float32)
    c = jnp.zeros((B, D), jnp.float32)
    z2 = x @ p["a2w"].T + p["a2b"]
    th = []
    for t in range(T):
        hc = jnp.concatenate([h, c], axis=1)
        z1 = hc @ p["a1w"].T + p["a1b"]
        z = jnp.tanh(z1[:, None, :] + z2)
        scores = jnp.einsum("bte,e->bt", z, p["a3w"][0]) + p["a3b"][0, 0]
        att = jax.nn.softmax(scores, axis=1)
        ctx = jnp.einsum("bt,bte->be", att, x)
        if t < T - 1:
            yc = jnp.concatenate([y[:, t, :], ctx], axis=1)
            yt = yc @ p["tw"].T + p["tb"]
            gates = yt @ p["wih"].T + p["bih"] + h @ p["whh"].T + p["bhh"]
            i_g = jax.nn.sigmoid(gates[:, :D])
            f_g = jax.nn.sigmoid(gates[:, D:2 * D])
            g_g = jnp.tanh(gates[:, 2 * D:3 * D])
            o_g = jax.nn.sigmoid(gates[:, 3 * D:4 * D])
            c = f_g * c + i_g * g_g
            h = o_g * jnp.tanh(c)
        th.append(jnp.concatenate([h, ctx], axis=1))
    th = jnp.stack(th, axis=1)
    h1 = th @ p["f1w"].T + p["f1b"]
    return h1 @ p["f2w"].T + p["f2b"]


def make_params(key, E, D, OUT, Y=3):
    ks = jax.random.split(key, 16)
    n = lambda k, s, scale=0.1: (scale * jax.random.normal(k, s)).astype(jnp.float32)
    z = lambda s: jnp.zeros(s, jnp.float32)
    return {
        # attn1: Linear(2D -> E), attn2: Linear(E -> E), attn3: Linear(E -> 1)
        "a1w": n(ks[0], (E, 2 * D)), "a1b": n(ks[1], (1, E)),
        "a2w": n(ks[2], (E, E)),     "a2b": n(ks[3], (1, E)),
        "a3w": n(ks[4], (1, E)),     "a3b": n(ks[5], (1, 1)),
        # tilde: Linear(E+3 -> 2D)
        "tw": n(ks[6], (2 * D, E + Y)), "tb": n(ks[7], (1, 2 * D)),
        # LSTM(input=2D, hidden=D): weights ~ N(0, 0.5), biases = 0 (init_weight)
        "wih": n(ks[8], (4 * D, 2 * D), 0.5), "whh": n(ks[9], (4 * D, D), 0.5),
        "bih": z((1, 4 * D)), "bhh": z((1, 4 * D)),
        # fc1: Linear(D+E -> D), fc2: Linear(D -> OUT)
        "f1w": n(ks[10], (D, D + E)), "f1b": n(ks[11], (1, D)),
        "f2w": n(ks[12], (OUT, D)),   "f2b": n(ks[13], (1, OUT)),
    }


if __name__ == "__main__":
    B, T, E, D, OUT, Y = 2, 8, 32, 32, 3, 3

    key = jax.random.PRNGKey(0)
    k_x, k_y, k_p = jax.random.split(key, 3)
    input_encoded = jax.random.normal(k_x, (B, T, E), dtype=jnp.float32)
    y_seq = jax.random.normal(k_y, (B, T, Y), dtype=jnp.float32)
    params = make_params(k_p, E, D, OUT, Y)

    out = decoder_forward(input_encoded, y_seq, params)
    out = jax.block_until_ready(out)

    ref = decoder_reference(input_encoded, y_seq, params)
    np.testing.assert_allclose(np.asarray(out), np.asarray(ref),
                               rtol=5e-4, atol=1e-4)
    assert out.shape == (B, T, OUT)
    print("KERNEL_OK")
</pallas_src>

<mosaic_0001>
module attributes {stable_mosaic.version = 11 : i64} {
  func.func @decoder_kernel(%arg0: memref<8x8x32xf32, #tpu.memory_space<vmem>>, %arg1: memref<64x3xf32, #tpu.memory_space<vmem>>, %arg2: memref<32x32xf32, #tpu.memory_space<vmem>>, %arg3: memref<32x32xf32, #tpu.memory_space<vmem>>, %arg4: memref<1x32xf32, #tpu.memory_space<vmem>>, %arg5: memref<32x32xf32, #tpu.memory_space<vmem>>, %arg6: memref<1x32xf32, #tpu.memory_space<vmem>>, %arg7: memref<1x32xf32, #tpu.memory_space<vmem>>, %arg8: memref<1x1xf32, #tpu.memory_space<smem>>, %arg9: memref<3x128xf32, #tpu.memory_space<vmem>>, %arg10: memref<32x128xf32, #tpu.memory_space<vmem>>, %arg11: memref<1x128xf32, #tpu.memory_space<vmem>>, %arg12: memref<32x128xf32, #tpu.memory_space<vmem>>, %arg13: memref<32x3xf32, #tpu.memory_space<vmem>>, %arg14: memref<32x3xf32, #tpu.memory_space<vmem>>, %arg15: memref<1x3xf32, #tpu.memory_space<vmem>>, %arg16: memref<64x3xf32, #tpu.memory_space<vmem>>, %arg17: memref<64x32xf32, #tpu.memory_space<vmem>>, %arg18: memref<64x32xf32, #tpu.memory_space<vmem>>) attributes {dimension_semantics = [], scalar_prefetch = 0 : i64, scratch_operands = 2 : i64, tpu.core_type = #tpu.core_type<tc>} {
    %c0 = arith.constant 0 : index
    %c0_0 = arith.constant 0 : index
    %c0_1 = arith.constant 0 : index
    %0 = vector.load %arg0[%c0, %c0_0, %c0_1] : memref<8x8x32xf32, #tpu.memory_space<vmem>>, vector<8x8x32xf32>
    %c0_2 = arith.constant 0 : index
    %c0_3 = arith.constant 0 : index
    %1 = vector.load %arg2[%c0_2, %c0_3] : memref<32x32xf32, #tpu.memory_space<vmem>>, vector<32x32xf32>
    %c0_4 = arith.constant 0 : index
    %c0_5 = arith.constant 0 : index
    %2 = vector.load %arg3[%c0_4, %c0_5] : memref<32x32xf32, #tpu.memory_space<vmem>>, vector<32x32xf32>
    %c0_6 = arith.constant 0 : index
    %c0_7 = arith.constant 0 : index
    %3 = vector.load %arg4[%c0_6, %c0_7] : memref<1x32xf32, #tpu.memory_space<vmem>>, vector<1x32xf32>
    %c0_8 = arith.constant 0 : index
    %c0_9 = arith.constant 0 : index
    %4 = vector.load %arg7[%c0_8, %c0_9] : memref<1x32xf32, #tpu.memory_space<vmem>>, vector<1x32xf32>
    %c0_10 = arith.constant 0 : index
    %c0_11 = arith.constant 0 : index
    %5 = memref.load %arg8[%c0_10, %c0_11] : memref<1x1xf32, #tpu.memory_space<smem>>
    %c0_12 = arith.constant 0 : index
    %c0_13 = arith.constant 0 : index
    %6 = vector.load %arg10[%c0_12, %c0_13] : memref<32x128xf32, #tpu.memory_space<vmem>>, vector<32x128xf32>
    %c0_14 = arith.constant 0 : index
    %c0_15 = arith.constant 0 : index
    %7 = vector.load %arg12[%c0_14, %c0_15] : memref<32x128xf32, #tpu.memory_space<vmem>>, vector<32x128xf32>
    %8 = vector.shape_cast %0 : vector<8x8x32xf32> to vector<64x32xf32>
    %c0_16 = arith.constant 0 : index
    %c0_17 = arith.constant 0 : index
    %9 = vector.load %arg5[%c0_16, %c0_17] : memref<32x32xf32, #tpu.memory_space<vmem>>, vector<32x32xf32>
    %cst = arith.constant dense<0.000000e+00> : vector<64x32xf32>
    %10 = tpu.matmul %8, %9, %cst {dimension_numbers = #tpu.dot_dimension_numbers<[1], [0], [0], [1], [0, 0, 1, 1], [], []>} : vector<64x32xf32>, vector<32x32xf32>, vector<64x32xf32> -> vector<64x32xf32>
    %c0_18 = arith.constant 0 : index
    %c0_19 = arith.constant 0 : index
    %11 = vector.load %arg6[%c0_18, %c0_19] : memref<1x32xf32, #tpu.memory_space<vmem>>, vector<1x32xf32>
    %12 = vector.broadcast %11 : vector<1x32xf32> to vector<64x32xf32>
    %13 = arith.addf %10, %12 : vector<64x32xf32>
    %14 = vector.shape_cast %13 : vector<64x32xf32> to vector<8x8x32xf32>
    %c0_20 = arith.constant 0 : index
    %c0_21 = arith.constant 0 : index
    %15 = vector.load %arg1[%c0_20, %c0_21] : memref<64x3xf32, #tpu.memory_space<vmem>>, vector<64x3xf32>
    %c0_22 = arith.constant 0 : index
    %c0_23 = arith.constant 0 : index
    %16 = vector.load %arg9[%c0_22, %c0_23] : memref<3x128xf32, #tpu.memory_space<vmem>>, vector<3x128xf32>
    %cst_24 = arith.constant dense<0.000000e+00> : vector<64x128xf32>
    %17 = tpu.matmul %15, %16, %cst_24 {dimension_numbers = #tpu.dot_dimension_numbers<[1], [0], [0], [1], [0, 0, 1, 1], [], []>} : vector<64x3xf32>, vector<3x128xf32>, vector<64x128xf32> -> vector<64x128xf32>
    %c0_25 = arith.constant 0 : index
    %c0_26 = arith.constant 0 : index
    %18 = vector.load %arg11[%c0_25, %c0_26] : memref<1x128xf32, #tpu.memory_space<vmem>>, vector<1x128xf32>
    %19 = vector.broadcast %18 : vector<1x128xf32> to vector<64x128xf32>
    %20 = arith.addf %17, %19 : vector<64x128xf32>
    %cst_27 = arith.constant 0.000000e+00 : f32
    %21 = vector.broadcast %cst_27 : f32 to vector<8x32xf32>
    %cst_28 = arith.constant 0.000000e+00 : f32
    %22 = vector.broadcast %cst_28 : f32 to vector<8x32xf32>
    %cst_29 = arith.constant dense<0.000000e+00> : vector<8x32xf32>
    %23 = tpu.matmul %21, %1, %cst_29 {dimension_numbers = #tpu.dot_dimension_numbers<[1], [0], [0], [1], [0, 0, 1, 1], [], []>} : vector<8x32xf32>, vector<32x32xf32>, vector<8x32xf32> -> vector<8x32xf32>
    %cst_30 = arith.constant dense<0.000000e+00> : vector<8x32xf32>
    %24 = tpu.matmul %22, %2, %cst_30 {dimension_numbers = #tpu.dot_dimension_numbers<[1], [0], [0], [1], [0, 0, 1, 1], [], []>} : vector<8x32xf32>, vector<32x32xf32>, vector<8x32xf32> -> vector<8x32xf32>
    %25 = arith.addf %23, %24 : vector<8x32xf32>
    %26 = vector.broadcast %3 : vector<1x32xf32> to vector<8x32xf32>
    %27 = arith.addf %25, %26 : vector<8x32xf32>
    %28 = vector.shape_cast %27 : vector<8x32xf32> to vector<8x1x32xf32>
    %29 = vector.broadcast %28 : vector<8x1x32xf32> to vector<8x8x32xf32>
    %30 = arith.addf %29, %14 : vector<8x8x32xf32>
    %31 = math.tanh %30 : vector<8x8x32xf32>
    %32 = vector.shape_cast %4 : vector<1x32xf32> to vector<1x1x32xf32>
    %33 = vector.broadcast %32 : vector<1x1x32xf32> to vector<8x8x32xf32>
    %34 = arith.mulf %31, %33 : vector<8x8x32xf32>
    %cst_31 = arith.constant dense<0.000000e+00> : vector<8x8xf32>
    %35 = vector.multi_reduction <add>, %34, %cst_31 [2] : vector<8x8x32xf32> to vector<8x8xf32>
    %36 = vector.broadcast %5 : f32 to vector<8x8xf32>
    %37 = arith.addf %35, %36 : vector<8x8xf32>
    %cst_32 = arith.constant dense<0xFF800000> : vector<8xf32>
    %38 = vector.multi_reduction <maximumf>, %37, %cst_32 [1] : vector<8x8xf32> to vector<8xf32>
    %39 = vector.shape_cast %38 : vector<8xf32> to vector<8x1xf32>
    %40 = vector.broadcast %39 : vector<8x1xf32> to vector<8x8xf32>
    %41 = arith.subf %37, %40 : vector<8x8xf32>
    %42 = math.exp %41 : vector<8x8xf32>
    %cst_33 = arith.constant dense<0.000000e+00> : vector<8xf32>
    %43 = vector.multi_reduction <add>, %42, %cst_33 [1] : vector<8x8xf32> to vector<8xf32>
    %44 = vector.shape_cast %43 : vector<8xf32> to vector<8x1xf32>
    %45 = tpu.reciprocal %44 : vector<8x1xf32> -> vector<8x1xf32>
    %46 = vector.broadcast %45 : vector<8x1xf32> to vector<8x8xf32>
    %47 = arith.mulf %42, %46 : vector<8x8xf32>
    %48 = vector.shape_cast %47 : vector<8x8xf32> to vector<8x8x1xf32>
    %49 = vector.broadcast %48 : vector<8x8x1xf32> to vector<8x8x32xf32>
    %50 = arith.mulf %49, %0 : vector<8x8x32xf32>
    %cst_34 = arith.constant dense<0.000000e+00> : vector<8x32xf32>
    %51 = vector.multi_reduction <add>, %50, %cst_34 [1] : vector<8x8x32xf32> to vector<8x32xf32>
    %52 = vector.extract_strided_slice %20 {offsets = [0, 0], sizes = [8, 128], strides = [1, 1]} : vector<64x128xf32> to vector<8x128xf32>
    %cst_35 = arith.constant dense<0.000000e+00> : vector<8x128xf32>
    %53 = tpu.matmul %51, %6, %cst_35 {dimension_numbers = #tpu.dot_dimension_numbers<[1], [0], [0], [1], [0, 0, 1, 1], [], []>} : vector<8x32xf32>, vector<32x128xf32>, vector<8x128xf32> -> vector<8x128xf32>
    %54 = arith.addf %52, %53 : vector<8x128xf32>
    %cst_36 = arith.constant dense<0.000000e+00> : vector<8x128xf32>
    %55 = tpu.matmul %21, %7, %cst_36 {dimension_numbers = #tpu.dot_dimension_numbers<[1], [0], [0], [1], [0, 0, 1, 1], [], []>} : vector<8x32xf32>, vector<32x128xf32>, vector<8x128xf32> -> vector<8x128xf32>
    %56 = arith.addf %54, %55 : vector<8x128xf32>
    %57 = vector.extract_strided_slice %56 {offsets = [0, 0], sizes = [8, 32], strides = [1, 1]} : vector<8x128xf32> to vector<8x32xf32>
    %58 = arith.negf %57 : vector<8x32xf32>
    %59 = math.exp %58 : vector<8x32xf32>
    %cst_37 = arith.constant 1.000000e+00 : f32
    %60 = vector.broadcast %cst_37 : f32 to vector<8x32xf32>
    %61 = arith.addf %60, %59 : vector<8x32xf32>
    %62 = arith.divf %60, %61 : vector<8x32xf32>
    %63 = vector.extract_strided_slice %56 {offsets = [0, 32], sizes = [8, 32], strides = [1, 1]} : vector<8x128xf32> to vector<8x32xf32>
    %64 = arith.negf %63 : vector<8x32xf32>
    %65 = math.exp %64 : vector<8x32xf32>
    %cst_38 = arith.constant 1.000000e+00 : f32
    %66 = vector.broadcast %cst_38 : f32 to vector<8x32xf32>
    %67 = arith.addf %66, %65 : vector<8x32xf32>
    %68 = arith.divf %66, %67 : vector<8x32xf32>
    %69 = vector.extract_strided_slice %56 {offsets = [0, 64], sizes = [8, 32], strides = [1, 1]} : vector<8x128xf32> to vector<8x32xf32>
    %70 = math.tanh %69 : vector<8x32xf32>
    %71 = vector.extract_strided_slice %56 {offsets = [0, 96], sizes = [8, 32], strides = [1, 1]} : vector<8x128xf32> to vector<8x32xf32>
    %72 = arith.negf %71 : vector<8x32xf32>
    %73 = math.exp %72 : vector<8x32xf32>
    %cst_39 = arith.constant 1.000000e+00 : f32
    %74 = vector.broadcast %cst_39 : f32 to vector<8x32xf32>
    %75 = arith.addf %74, %73 : vector<8x32xf32>
    %76 = arith.divf %74, %75 : vector<8x32xf32>
    %77 = arith.mulf %68, %22 : vector<8x32xf32>
    %78 = arith.mulf %62, %70 : vector<8x32xf32>
    %79 = arith.addf %77, %78 : vector<8x32xf32>
    %80 = math.tanh %79 : vector<8x32xf32>
    %81 = arith.mulf %76, %80 : vector<8x32xf32>
    %c0_40 = arith.constant 0 : index
    %c0_41 = arith.constant 0 : index
    %82 = vector.load %arg17[%c0_40, %c0_41] : memref<64x32xf32, #tpu.memory_space<vmem>>, vector<8x32xf32>
    tpu.vector_store %arg17[%c0_40, %c0_41], %81 {strides = array<i32>} : memref<64x32xf32, #tpu.memory_space<vmem>>, vector<8x32xf32>,
    %c0_42 = arith.constant 0 : index
    %c0_43 = arith.constant 0 : index
    %83 = vector.load %arg18[%c0_42, %c0_43] : memref<64x32xf32, #tpu.memory_space<vmem>>, vector<8x32xf32>
    tpu.vector_store %arg18[%c0_42, %c0_43], %51 {strides = array<i32>} : memref<64x32xf32, #tpu.memory_space<vmem>>, vector<8x32xf32>,
    %cst_44 = arith.constant dense<0.000000e+00> : vector<8x32xf32>
    %84 = tpu.matmul %81, %1, %cst_44 {dimension_numbers = #tpu.dot_dimension_numbers<[1], [0], [0], [1], [0, 0, 1, 1], [], []>} : vector<8x32xf32>, vector<32x32xf32>, vector<8x32xf32> -> vector<8x32xf32>
    %cst_45 = arith.constant dense<0.000000e+00> : vector<8x32xf32>
    %85 = tpu.matmul %79, %2, %cst_45 {dimension_numbers = #tpu.dot_dimension_numbers<[1], [0], [0], [1], [0, 0, 1, 1], [], []>} : vector<8x32xf32>, vector<32x32xf32>, vector<8x32xf32> -> vector<8x32xf32>
    %86 = arith.addf %84, %85 : vector<8x32xf32>
    %87 = vector.broadcast %3 : vector<1x32xf32> to vector<8x32xf32>
    %88 = arith.addf %86, %87 : vector<8x32xf32>
    %89 = vector.shape_cast %88 : vector<8x32xf32> to vector<8x1x32xf32>
    %90 = vector.broadcast %89 : vector<8x1x32xf32> to vector<8x8x32xf32>
    %91 = arith.addf %90, %14 : vector<8x8x32xf32>
    %92 = math.tanh %91 : vector<8x8x32xf32>
    %93 = vector.shape_cast %4 : vector<1x32xf32> to vector<1x1x32xf32>
    %94 = vector.broadcast %93 : vector<1x1x32xf32> to vector<8x8x32xf32>
    %95 = arith.mulf %92, %94 : vector<8x8x32xf32>
    %cst_46 = arith.constant dense<0.000000e+00> : vector<8x8xf32>
    %96 = vector.multi_reduction <add>, %95, %cst_46 [2] : vector<8x8x32xf32> to vector<8x8xf32>
    %97 = vector.broadcast %5 : f32 to vector<8x8xf32>
    %98 = arith.addf %96, %97 : vector<8x8xf32>
    %cst_47 = arith.constant dense<0xFF800000> : vector<8xf32>
    %99 = vector.multi_reduction <maximumf>, %98, %cst_47 [1] : vector<8x8xf32> to vector<8xf32>
    %100 = vector.shape_cast %99 : vector<8xf32> to vector<8x1xf32>
    %101 = vector.broadcast %100 : vector<8x1xf32> to vector<8x8xf32>
    %102 = arith.subf %98, %101 : vector<8x8xf32>
    %103 = math.exp %102 : vector<8x8xf32>
    %cst_48 = arith.constant dense<0.000000e+00> : vector<8xf32>
    %104 = vector.multi_reduction <add>, %103, %cst_48 [1] : vector<8x8xf32> to vector<8xf32>
    %105 = vector.shape_cast %104 : vector<8xf32> to vector<8x1xf32>
    %106 = tpu.reciprocal %105 : vector<8x1xf32> -> vector<8x1xf32>
    %107 = vector.broadcast %106 : vector<8x1xf32> to vector<8x8xf32>
    %108 = arith.mulf %103, %107 : vector<8x8xf32>
    %109 = vector.shape_cast %108 : vector<8x8xf32> to vector<8x8x1xf32>
    %110 = vector.broadcast %109 : vector<8x8x1xf32> to vector<8x8x32xf32>
    %111 = arith.mulf %110, %0 : vector<8x8x32xf32>
    %cst_49 = arith.constant dense<0.000000e+00> : vector<8x32xf32>
    %112 = vector.multi_reduction <add>, %111, %cst_49 [1] : vector<8x8x32xf32> to vector<8x32xf32>
    %113 = vector.extract_strided_slice %20 {offsets = [8, 0], sizes = [8, 128], strides = [1, 1]} : vector<64x128xf32> to vector<8x128xf32>
    %cst_50 = arith.constant dense<0.000000e+00> : vector<8x128xf32>
    %114 = tpu.matmul %112, %6, %cst_50 {dimension_numbers = #tpu.dot_dimension_numbers<[1], [0], [0], [1], [0, 0, 1, 1], [], []>} : vector<8x32xf32>, vector<32x128xf32>, vector<8x128xf32> -> vector<8x128xf32>
    %115 = arith.addf %113, %114 : vector<8x128xf32>
    %cst_51 = arith.constant dense<0.000000e+00> : vector<8x128xf32>
    %116 = tpu.matmul %81, %7, %cst_51 {dimension_numbers = #tpu.dot_dimension_numbers<[1], [0], [0], [1], [0, 0, 1, 1], [], []>} : vector<8x32xf32>, vector<32x128xf32>, vector<8x128xf32> -> vector<8x128xf32>
    %117 = arith.addf %115, %116 : vector<8x128xf32>
    %118 = vector.extract_strided_slice %117 {offsets = [0, 0], sizes = [8, 32], strides = [1, 1]} : vector<8x128xf32> to vector<8x32xf32>
    %119 = arith.negf %118 : vector<8x32xf32>
    %120 = math.exp %119 : vector<8x32xf32>
    %cst_52 = arith.constant 1.000000e+00 : f32
    %121 = vector.broadcast %cst_52 : f32 to vector<8x32xf32>
    %122 = arith.addf %121, %120 : vector<8x32xf32>
    %123 = arith.divf %121, %122 : vector<8x32xf32>
    %124 = vector.extract_strided_slice %117 {offsets = [0, 32], sizes = [8, 32], strides = [1, 1]} : vector<8x128xf32> to vector<8x32xf32>
    %125 = arith.negf %124 : vector<8x32xf32>
    %126 = math.exp %125 : vector<8x32xf32>
    %cst_53 = arith.constant 1.000000e+00 : f32
    %127 = vector.broadcast %cst_53 : f32 to vector<8x32xf32>
    %128 = arith.addf %127, %126 : vector<8x32xf32>
    %129 = arith.divf %127, %128 : vector<8x32xf32>
    %130 = vector.extract_strided_slice %117 {offsets = [0, 64], sizes = [8, 32], strides = [1, 1]} : vector<8x128xf32> to vector<8x32xf32>
    %131 = math.tanh %130 : vector<8x32xf32>
    %132 = vector.extract_strided_slice %117 {offsets = [0, 96], sizes = [8, 32], strides = [1, 1]} : vector<8x128xf32> to vector<8x32xf32>
    %133 = arith.negf %132 : vector<8x32xf32>
    %134 = math.exp %133 : vector<8x32xf32>
    %cst_54 = arith.constant 1.000000e+00 : f32
    %135 = vector.broadcast %cst_54 : f32 to vector<8x32xf32>
    %136 = arith.addf %135, %134 : vector<8x32xf32>
    %137 = arith.divf %135, %136 : vector<8x32xf32>
    %138 = arith.mulf %129, %79 : vector<8x32xf32>
    %139 = arith.mulf %123, %131 : vector<8x32xf32>
    %140 = arith.addf %138, %139 : vector<8x32xf32>
    %141 = math.tanh %140 : vector<8x32xf32>
    %142 = arith.mulf %137, %141 : vector<8x32xf32>
    %c8 = arith.constant 8 : index
    %c0_55 = arith.constant 0 : index
    %143 = vector.load %arg17[%c8, %c0_55] : memref<64x32xf32, #tpu.memory_space<vmem>>, vector<8x32xf32>
    tpu.vector_store %arg17[%c8, %c0_55], %142 {strides = array<i32>} : memref<64x32xf32, #tpu.memory_space<vmem>>, vector<8x32xf32>,
    %c8_56 = arith.constant 8 : index
    %c0_57 = arith.constant 0 : index
    %144 = vector.load %arg18[%c8_56, %c0_57] : memref<64x32xf32, #tpu.memory_space<vmem>>, vector<8x32xf32>
    tpu.vector_store %arg18[%c8_56, %c0_57], %112 {strides = array<i32>} : memref<64x32xf32, #tpu.memory_space<vmem>>, vector<8x32xf32>,
    %cst_58 = arith.constant dense<0.000000e+00> : vector<8x32xf32>
    %145 = tpu.matmul %142, %1, %cst_58 {dimension_numbers = #tpu.dot_dimension_numbers<[1], [0], [0], [1], [0, 0, 1, 1], [], []>} : vector<8x32xf32>, vector<32x32xf32>, vector<8x32xf32> -> vector<8x32xf32>
    %cst_59 = arith.constant dense<0.000000e+00> : vector<8x32xf32>
    %146 = tpu.matmul %140, %2, %cst_59 {dimension_numbers = #tpu.dot_dimension_numbers<[1], [0], [0], [1], [0, 0, 1, 1], [], []>} : vector<8x32xf32>, vector<32x32xf32>, vector<8x32xf32> -> vector<8x32xf32>
    %147 = arith.addf %145, %146 : vector<8x32xf32>
    %148 = vector.broadcast %3 : vector<1x32xf32> to vector<8x32xf32>
    %149 = arith.addf %147, %148 : vector<8x32xf32>
    %150 = vector.shape_cast %149 : vector<8x32xf32> to vector<8x1x32xf32>
    %151 = vector.broadcast %150 : vector<8x1x32xf32> to vector<8x8x32xf32>
    %152 = arith.addf %151, %14 : vector<8x8x32xf32>
    %153 = math.tanh %152 : vector<8x8x32xf32>
    %154 = vector.shape_cast %4 : vector<1x32xf32> to vector<1x1x32xf32>
    %155 = vector.broadcast %154 : vector<1x1x32xf32> to vector<8x8x32xf32>
    %156 = arith.mulf %153, %155 : vector<8x8x32xf32>
    %cst_60 = arith.constant dense<0.000000e+00> : vector<8x8xf32>
    %157 = vector.multi_reduction <add>, %156, %cst_60 [2] : vector<8x8x32xf32> to vector<8x8xf32>
    %158 = vector.broadcast %5 : f32 to vector<8x8xf32>
    %159 = arith.addf %157, %158 : vector<8x8xf32>
    %cst_61 = arith.constant dense<0xFF800000> : vector<8xf32>
    %160 = vector.multi_reduction <maximumf>, %159, %cst_61 [1] : vector<8x8xf32> to vector<8xf32>
    %161 = vector.shape_cast %160 : vector<8xf32> to vector<8x1xf32>
    %162 = vector.broadcast %161 : vector<8x1xf32> to vector<8x8xf32>
    %163 = arith.subf %159, %162 : vector<8x8xf32>
    %164 = math.exp %163 : vector<8x8xf32>
    %cst_62 = arith.constant dense<0.000000e+00> : vector<8xf32>
    %165 = vector.multi_reduction <add>, %164, %cst_62 [1] : vector<8x8xf32> to vector<8xf32>
    %166 = vector.shape_cast %165 : vector<8xf32> to vector<8x1xf32>
    %167 = tpu.reciprocal %166 : vector<8x1xf32> -> vector<8x1xf32>
    %168 = vector.broadcast %167 : vector<8x1xf32> to vector<8x8xf32>
    %169 = arith.mulf %164, %168 : vector<8x8xf32>
    %170 = vector.shape_cast %169 : vector<8x8xf32> to vector<8x8x1xf32>
    %171 = vector.broadcast %170 : vector<8x8x1xf32> to vector<8x8x32xf32>
    %172 = arith.mulf %171, %0 : vector<8x8x32xf32>
    %cst_63 = arith.constant dense<0.000000e+00> : vector<8x32xf32>
    %173 = vector.multi_reduction <add>, %172, %cst_63 [1] : vector<8x8x32xf32> to vector<8x32xf32>
    %174 = vector.extract_strided_slice %20 {offsets = [16, 0], sizes = [8, 128], strides = [1, 1]} : vector<64x128xf32> to vector<8x128xf32>
    %cst_64 = arith.constant dense<0.000000e+00> : vector<8x128xf32>
    %175 = tpu.matmul %173, %6, %cst_64 {dimension_numbers = #tpu.dot_dimension_numbers<[1], [0], [0], [1], [0, 0, 1, 1], [], []>} : vector<8x32xf32>, vector<32x128xf32>, vector<8x128xf32> -> vector<8x128xf32>
    %176 = arith.addf %174, %175 : vector<8x128xf32>
    %cst_65 = arith.constant dense<0.000000e+00> : vector<8x128xf32>
    %177 = tpu.matmul %142, %7, %cst_65 {dimension_numbers = #tpu.dot_dimension_numbers<[1], [0], [0], [1], [0, 0, 1, 1], [], []>} : vector<8x32xf32>, vector<32x128xf32>, vector<8x128xf32> -> vector<8x128xf32>
    %178 = arith.addf %176, %177 : vector<8x128xf32>
    %179 = vector.extract_strided_slice %178 {offsets = [0, 0], sizes = [8, 32], strides = [1, 1]} : vector<8x128xf32> to vector<8x32xf32>
    %180 = arith.negf %179 : vector<8x32xf32>
    %181 = math.exp %180 : vector<8x32xf32>
    %cst_66 = arith.constant 1.000000e+00 : f32
    %182 = vector.broadcast %cst_66 : f32 to vector<8x32xf32>
    %183 = arith.addf %182, %181 : vector<8x32xf32>
    %184 = arith.divf %182, %183 : vector<8x32xf32>
    %185 = vector.extract_strided_slice %178 {offsets = [0, 32], sizes = [8, 32], strides = [1, 1]} : vector<8x128xf32> to vector<8x32xf32>
    %186 = arith.negf %185 : vector<8x32xf32>
    %187 = math.exp %186 : vector<8x32xf32>
    %cst_67 = arith.constant 1.000000e+00 : f32
    %188 = vector.broadcast %cst_67 : f32 to vector<8x32xf32>
    %189 = arith.addf %188, %187 : vector<8x32xf32>
    %190 = arith.divf %188, %189 : vector<8x32xf32>
    %191 = vector.extract_strided_slice %178 {offsets = [0, 64], sizes = [8, 32], strides = [1, 1]} : vector<8x128xf32> to vector<8x32xf32>
    %192 = math.tanh %191 : vector<8x32xf32>
    %193 = vector.extract_strided_slice %178 {offsets = [0, 96], sizes = [8, 32], strides = [1, 1]} : vector<8x128xf32> to vector<8x32xf32>
    %194 = arith.negf %193 : vector<8x32xf32>
    %195 = math.exp %194 : vector<8x32xf32>
    %cst_68 = arith.constant 1.000000e+00 : f32
    %196 = vector.broadcast %cst_68 : f32 to vector<8x32xf32>
    %197 = arith.addf %196, %195 : vector<8x32xf32>
    %198 = arith.divf %196, %197 : vector<8x32xf32>
    %199 = arith.mulf %190, %140 : vector<8x32xf32>
    %200 = arith.mulf %184, %192 : vector<8x32xf32>
    %201 = arith.addf %199, %200 : vector<8x32xf32>
    %202 = math.tanh %201 : vector<8x32xf32>
    %203 = arith.mulf %198, %202 : vector<8x32xf32>
    %c16 = arith.constant 16 : index
    %c0_69 = arith.constant 0 : index
    %204 = vector.load %arg17[%c16, %c0_69] : memref<64x32xf32, #tpu.memory_space<vmem>>, vector<8x32xf32>
    tpu.vector_store %arg17[%c16, %c0_69], %203 {strides = array<i32>} : memref<64x32xf32, #tpu.memory_space<vmem>>, vector<8x32xf32>,
    %c16_70 = arith.constant 16 : index
    %c0_71 = arith.constant 0 : index
    %205 = vector.load %arg18[%c16_70, %c0_71] : memref<64x32xf32, #tpu.memory_space<vmem>>, vector<8x32xf32>
    tpu.vector_store %arg18[%c16_70, %c0_71], %173 {strides = array<i32>} : memref<64x32xf32, #tpu.memory_space<vmem>>, vector<8x32xf32>,
    %cst_72 = arith.constant dense<0.000000e+00> : vector<8x32xf32>
    %206 = tpu.matmul %203, %1, %cst_72 {dimension_numbers = #tpu.dot_dimension_numbers<[1], [0], [0], [1], [0, 0, 1, 1], [], []>} : vector<8x32xf32>, vector<32x32xf32>, vector<8x32xf32> -> vector<8x32xf32>
    %cst_73 = arith.constant dense<0.000000e+00> : vector<8x32xf32>
    %207 = tpu.matmul %201, %2, %cst_73 {dimension_numbers = #tpu.dot_dimension_numbers<[1], [0], [0], [1], [0, 0, 1, 1], [], []>} : vector<8x32xf32>, vector<32x32xf32>, vector<8x32xf32> -> vector<8x32xf32>
    %208 = arith.addf %206, %207 : vector<8x32xf32>
    %209 = vector.broadcast %3 : vector<1x32xf32> to vector<8x32xf32>
    %210 = arith.addf %208, %209 : vector<8x32xf32>
    %211 = vector.shape_cast %210 : vector<8x32xf32> to vector<8x1x32xf32>
    %212 = vector.broadcast %211 : vector<8x1x32xf32> to vector<8x8x32xf32>
    %213 = arith.addf %212, %14 : vector<8x8x32xf32>
    %214 = math.tanh %213 : vector<8x8x32xf32>
    %215 = vector.shape_cast %4 : vector<1x32xf32> to vector<1x1x32xf32>
    %216 = vector.broadcast %215 : vector<1x1x32xf32> to vector<8x8x32xf32>
    %217 = arith.mulf %214, %216 : vector<8x8x32xf32>
    %cst_74 = arith.constant dense<0.000000e+00> : vector<8x8xf32>
    %218 = vector.multi_reduction <add>, %217, %cst_74 [2] : vector<8x8x32xf32> to vector<8x8xf32>
    %219 = vector.broadcast %5 : f32 to vector<8x8xf32>
    %220 = arith.addf %218, %219 : vector<8x8xf32>
    %cst_75 = arith.constant dense<0xFF800000> : vector<8xf32>
    %221 = vector.multi_reduction <maximumf>, %220, %cst_75 [1] : vector<8x8xf32> to vector<8xf32>
    %222 = vector.shape_cast %221 : vector<8xf32> to vector<8x1xf32>
    %223 = vector.broadcast %222 : vector<8x1xf32> to vector<8x8xf32>
    %224 = arith.subf %220, %223 : vector<8x8xf32>
    %225 = math.exp %224 : vector<8x8xf32>
    %cst_76 = arith.constant dense<0.000000e+00> : vector<8xf32>
    %226 = vector.multi_reduction <add>, %225, %cst_76 [1] : vector<8x8xf32> to vector<8xf32>
    %227 = vector.shape_cast %226 : vector<8xf32> to vector<8x1xf32>
    %228 = tpu.reciprocal %227 : vector<8x1xf32> -> vector<8x1xf32>
    %229 = vector.broadcast %228 : vector<8x1xf32> to vector<8x8xf32>
    %230 = arith.mulf %225, %229 : vector<8x8xf32>
    %231 = vector.shape_cast %230 : vector<8x8xf32> to vector<8x8x1xf32>
    %232 = vector.broadcast %231 : vector<8x8x1xf32> to vector<8x8x32xf32>
    %233 = arith.mulf %232, %0 : vector<8x8x32xf32>
    %cst_77 = arith.constant dense<0.000000e+00> : vector<8x32xf32>
    %234 = vector.multi_reduction <add>, %233, %cst_77 [1] : vector<8x8x32xf32> to vector<8x32xf32>
    %235 = vector.extract_strided_slice %20 {offsets = [24, 0], sizes = [8, 128], strides = [1, 1]} : vector<64x128xf32> to vector<8x128xf32>
    %cst_78 = arith.constant dense<0.000000e+00> : vector<8x128xf32>
    %236 = tpu.matmul %234, %6, %cst_78 {dimension_numbers = #tpu.dot_dimension_numbers<[1], [0], [0], [1], [0, 0, 1, 1], [], []>} : vector<8x32xf32>, vector<32x128xf32>, vector<8x128xf32> -> vector<8x128xf32>
    %237 = arith.addf %235, %236 : vector<8x128xf32>
    %cst_79 = arith.constant dense<0.000000e+00> : vector<8x128xf32>
    %238 = tpu.matmul %203, %7, %cst_79 {dimension_numbers = #tpu.dot_dimension_numbers<[1], [0], [0], [1], [0, 0, 1, 1], [], []>} : vector<8x32xf32>, vector<32x128xf32>, vector<8x128xf32> -> vector<8x128xf32>
    %239 = arith.addf %237, %238 : vector<8x128xf32>
    %240 = vector.extract_strided_slice %239 {offsets = [0, 0], sizes = [8, 32], strides = [1, 1]} : vector<8x128xf32> to vector<8x32xf32>
    %241 = arith.negf %240 : vector<8x32xf32>
    %242 = math.exp %241 : vector<8x32xf32>
    %cst_80 = arith.constant 1.000000e+00 : f32
    %243 = vector.broadcast %cst_80 : f32 to vector<8x32xf32>
    %244 = arith.addf %243, %242 : vector<8x32xf32>
    %245 = arith.divf %243, %244 : vector<8x32xf32>
    %246 = vector.extract_strided_slice %239 {offsets = [0, 32], sizes = [8, 32], strides = [1, 1]} : vector<8x128xf32> to vector<8x32xf32>
    %247 = arith.negf %246 : vector<8x32xf32>
    %248 = math.exp %247 : vector<8x32xf32>
    %cst_81 = arith.constant 1.000000e+00 : f32
    %249 = vector.broadcast %cst_81 : f32 to vector<8x32xf32>
    %250 = arith.addf %249, %248 : vector<8x32xf32>
    %251 = arith.divf %249, %250 : vector<8x32xf32>
    %252 = vector.extract_strided_slice %239 {offsets = [0, 64], sizes = [8, 32], strides = [1, 1]} : vector<8x128xf32> to vector<8x32xf32>
    %253 = math.tanh %252 : vector<8x32xf32>
    %254 = vector.extract_strided_slice %239 {offsets = [0, 96], sizes = [8, 32], strides = [1, 1]} : vector<8x128xf32> to vector<8x32xf32>
    %255 = arith.negf %254 : vector<8x32xf32>
    %256 = math.exp %255 : vector<8x32xf32>
    %cst_82 = arith.constant 1.000000e+00 : f32
    %257 = vector.broadcast %cst_82 : f32 to vector<8x32xf32>
    %258 = arith.addf %257, %256 : vector<8x32xf32>
    %259 = arith.divf %257, %258 : vector<8x32xf32>
    %260 = arith.mulf %251, %201 : vector<8x32xf32>
    %261 = arith.mulf %245, %253 : vector<8x32xf32>
    %262 = arith.addf %260, %261 : vector<8x32xf32>
    %263 = math.tanh %262 : vector<8x32xf32>
    %264 = arith.mulf %259, %263 : vector<8x32xf32>
    %c24 = arith.constant 24 : index
    %c0_83 = arith.constant 0 : index
    %265 = vector.load %arg17[%c24, %c0_83] : memref<64x32xf32, #tpu.memory_space<vmem>>, vector<8x32xf32>
    tpu.vector_store %arg17[%c24, %c0_83], %264 {strides = array<i32>} : memref<64x32xf32, #tpu.memory_space<vmem>>, vector<8x32xf32>,
    %c24_84 = arith.constant 24 : index
    %c0_85 = arith.constant 0 : index
    %266 = vector.load %arg18[%c24_84, %c0_85] : memref<64x32xf32, #tpu.memory_space<vmem>>, vector<8x32xf32>
    tpu.vector_store %arg18[%c24_84, %c0_85], %234 {strides = array<i32>} : memref<64x32xf32, #tpu.memory_space<vmem>>, vector<8x32xf32>,
    %cst_86 = arith.constant dense<0.000000e+00> : vector<8x32xf32>
    %267 = tpu.matmul %264, %1, %cst_86 {dimension_numbers = #tpu.dot_dimension_numbers<[1], [0], [0], [1], [0, 0, 1, 1], [], []>} : vector<8x32xf32>, vector<32x32xf32>, vector<8x32xf32> -> vector<8x32xf32>
    %cst_87 = arith.constant dense<0.000000e+00> : vector<8x32xf32>
    %268 = tpu.matmul %262, %2, %cst_87 {dimension_numbers = #tpu.dot_dimension_numbers<[1], [0], [0], [1], [0, 0, 1, 1], [], []>} : vector<8x32xf32>, vector<32x32xf32>, vector<8x32xf32> -> vector<8x32xf32>
    %269 = arith.addf %267, %268 : vector<8x32xf32>
    %270 = vector.broadcast %3 : vector<1x32xf32> to vector<8x32xf32>
    %271 = arith.addf %269, %270 : vector<8x32xf32>
    %272 = vector.shape_cast %271 : vector<8x32xf32> to vector<8x1x32xf32>
    %273 = vector.broadcast %272 : vector<8x1x32xf32> to vector<8x8x32xf32>
    %274 = arith.addf %273, %14 : vector<8x8x32xf32>
    %275 = math.tanh %274 : vector<8x8x32xf32>
    %276 = vector.shape_cast %4 : vector<1x32xf32> to vector<1x1x32xf32>
    %277 = vector.broadcast %276 : vector<1x1x32xf32> to vector<8x8x32xf32>
    %278 = arith.mulf %275, %277 : vector<8x8x32xf32>
    %cst_88 = arith.constant dense<0.000000e+00> : vector<8x8xf32>
    %279 = vector.multi_reduction <add>, %278, %cst_88 [2] : vector<8x8x32xf32> to vector<8x8xf32>
    %280 = vector.broadcast %5 : f32 to vector<8x8xf32>
    %281 = arith.addf %279, %280 : vector<8x8xf32>
    %cst_89 = arith.constant dense<0xFF800000> : vector<8xf32>
    %282 = vector.multi_reduction <maximumf>, %281, %cst_89 [1] : vector<8x8xf32> to vector<8xf32>
    %283 = vector.shape_cast %282 : vector<8xf32> to vector<8x1xf32>
    %284 = vector.broadcast %283 : vector<8x1xf32> to vector<8x8xf32>
    %285 = arith.subf %281, %284 : vector<8x8xf32>
    %286 = math.exp %285 : vector<8x8xf32>
    %cst_90 = arith.constant dense<0.000000e+00> : vector<8xf32>
    %287 = vector.multi_reduction <add>, %286, %cst_90 [1] : vector<8x8xf32> to vector<8xf32>
    %288 = vector.shape_cast %287 : vector<8xf32> to vector<8x1xf32>
    %289 = tpu.reciprocal %288 : vector<8x1xf32> -> vector<8x1xf32>
    %290 = vector.broadcast %289 : vector<8x1xf32> to vector<8x8xf32>
    %291 = arith.mulf %286, %290 : vector<8x8xf32>
    %292 = vector.shape_cast %291 : vector<8x8xf32> to vector<8x8x1xf32>
    %293 = vector.broadcast %292 : vector<8x8x1xf32> to vector<8x8x32xf32>
    %294 = arith.mulf %293, %0 : vector<8x8x32xf32>
    %cst_91 = arith.constant dense<0.000000e+00> : vector<8x32xf32>
    %295 = vector.multi_reduction <add>, %294, %cst_91 [1] : vector<8x8x32xf32> to vector<8x32xf32>
    %296 = vector.extract_strided_slice %20 {offsets = [32, 0], sizes = [8, 128], strides = [1, 1]} : vector<64x128xf32> to vector<8x128xf32>
    %cst_92 = arith.constant dense<0.000000e+00> : vector<8x128xf32>
    %297 = tpu.matmul %295, %6, %cst_92 {dimension_numbers = #tpu.dot_dimension_numbers<[1], [0], [0], [1], [0, 0, 1, 1], [], []>} : vector<8x32xf32>, vector<32x128xf32>, vector<8x128xf32> -> vector<8x128xf32>
    %298 = arith.addf %296, %297 : vector<8x128xf32>
    %cst_93 = arith.constant dense<0.000000e+00> : vector<8x128xf32>
    %299 = tpu.matmul %264, %7, %cst_93 {dimension_numbers = #tpu.dot_dimension_numbers<[1], [0], [0], [1], [0, 0, 1, 1], [], []>} : vector<8x32xf32>, vector<32x128xf32>, vector<8x128xf32> -> vector<8x128xf32>
    %300 = arith.addf %298, %299 : vector<8x128xf32>
    %301 = vector.extract_strided_slice %300 {offsets = [0, 0], sizes = [8, 32], strides = [1, 1]} : vector<8x128xf32> to vector<8x32xf32>
    %302 = arith.negf %301 : vector<8x32xf32>
    %303 = math.exp %302 : vector<8x32xf32>
    %cst_94 = arith.constant 1.000000e+00 : f32
    %304 = vector.broadcast %cst_94 : f32 to vector<8x32xf32>
    %305 = arith.addf %304, %303 : vector<8x32xf32>
    %306 = arith.divf %304, %305 : vector<8x32xf32>
    %307 = vector.extract_strided_slice %300 {offsets = [0, 32], sizes = [8, 32], strides = [1, 1]} : vector<8x128xf32> to vector<8x32xf32>
    %308 = arith.negf %307 : vector<8x32xf32>
    %309 = math.exp %308 : vector<8x32xf32>
    %cst_95 = arith.constant 1.000000e+00 : f32
    %310 = vector.broadcast %cst_95 : f32 to vector<8x32xf32>
    %311 = arith.addf %310, %309 : vector<8x32xf32>
    %312 = arith.divf %310, %311 : vector<8x32xf32>
    %313 = vector.extract_strided_slice %300 {offsets = [0, 64], sizes = [8, 32], strides = [1, 1]} : vector<8x128xf32> to vector<8x32xf32>
    %314 = math.tanh %313 : vector<8x32xf32>
    %315 = vector.extract_strided_slice %300 {offsets = [0, 96], sizes = [8, 32], strides = [1, 1]} : vector<8x128xf32> to vector<8x32xf32>
    %316 = arith.negf %315 : vector<8x32xf32>
    %317 = math.exp %316 : vector<8x32xf32>
    %cst_96 = arith.constant 1.000000e+00 : f32
    %318 = vector.broadcast %cst_96 : f32 to vector<8x32xf32>
    %319 = arith.addf %318, %317 : vector<8x32xf32>
    %320 = arith.divf %318, %319 : vector<8x32xf32>
    %321 = arith.mulf %312, %262 : vector<8x32xf32>
    %322 = arith.mulf %306, %314 : vector<8x32xf32>
    %323 = arith.addf %321, %322 : vector<8x32xf32>
    %324 = math.tanh %323 : vector<8x32xf32>
    %325 = arith.mulf %320, %324 : vector<8x32xf32>
    %c32 = arith.constant 32 : index
    %c0_97 = arith.constant 0 : index
    %326 = vector.load %arg17[%c32, %c0_97] : memref<64x32xf32, #tpu.memory_space<vmem>>, vector<8x32xf32>
    tpu.vector_store %arg17[%c32, %c0_97], %325 {strides = array<i32>} : memref<64x32xf32, #tpu.memory_space<vmem>>, vector<8x32xf32>,
    %c32_98 = arith.constant 32 : index
    %c0_99 = arith.constant 0 : index
    %327 = vector.load %arg18[%c32_98, %c0_99] : memref<64x32xf32, #tpu.memory_space<vmem>>, vector<8x32xf32>
    tpu.vector_store %arg18[%c32_98, %c0_99], %295 {strides = array<i32>} : memref<64x32xf32, #tpu.memory_space<vmem>>, vector<8x32xf32>,
    %cst_100 = arith.constant dense<0.000000e+00> : vector<8x32xf32>
    %328 = tpu.matmul %325, %1, %cst_100 {dimension_numbers = #tpu.dot_dimension_numbers<[1], [0], [0], [1], [0, 0, 1, 1], [], []>} : vector<8x32xf32>, vector<32x32xf32>, vector<8x32xf32> -> vector<8x32xf32>
    %cst_101 = arith.constant dense<0.000000e+00> : vector<8x32xf32>
    %329 = tpu.matmul %323, %2, %cst_101 {dimension_numbers = #tpu.dot_dimension_numbers<[1], [0], [0], [1], [0, 0, 1, 1], [], []>} : vector<8x32xf32>, vector<32x32xf32>, vector<8x32xf32> -> vector<8x32xf32>
    %330 = arith.addf %328, %329 : vector<8x32xf32>
    %331 = vector.broadcast %3 : vector<1x32xf32> to vector<8x32xf32>
    %332 = arith.addf %330, %331 : vector<8x32xf32>
    %333 = vector.shape_cast %332 : vector<8x32xf32> to vector<8x1x32xf32>
    %334 = vector.broadcast %333 : vector<8x1x32xf32> to vector<8x8x32xf32>
    %335 = arith.addf %334, %14 : vector<8x8x32xf32>
    %336 = math.tanh %335 : vector<8x8x32xf32>
    %337 = vector.shape_cast %4 : vector<1x32xf32> to vector<1x1x32xf32>
    %338 = vector.broadcast %337 : vector<1x1x32xf32> to vector<8x8x32xf32>
    %339 = arith.mulf %336, %338 : vector<8x8x32xf32>
    %cst_102 = arith.constant dense<0.000000e+00> : vector<8x8xf32>
    %340 = vector.multi_reduction <add>, %339, %cst_102 [2] : vector<8x8x32xf32> to vector<8x8xf32>
    %341 = vector.broadcast %5 : f32 to vector<8x8xf32>
    %342 = arith.addf %340, %341 : vector<8x8xf32>
    %cst_103 = arith.constant dense<0xFF800000> : vector<8xf32>
    %343 = vector.multi_reduction <maximumf>, %342, %cst_103 [1] : vector<8x8xf32> to vector<8xf32>
    %344 = vector.shape_cast %343 : vector<8xf32> to vector<8x1xf32>
    %345 = vector.broadcast %344 : vector<8x1xf32> to vector<8x8xf32>
    %346 = arith.subf %342, %345 : vector<8x8xf32>
    %347 = math.exp %346 : vector<8x8xf32>
    %cst_104 = arith.constant dense<0.000000e+00> : vector<8xf32>
    %348 = vector.multi_reduction <add>, %347, %cst_104 [1] : vector<8x8xf32> to vector<8xf32>
    %349 = vector.shape_cast %348 : vector<8xf32> to vector<8x1xf32>
    %350 = tpu.reciprocal %349 : vector<8x1xf32> -> vector<8x1xf32>
    %351 = vector.broadcast %350 : vector<8x1xf32> to vector<8x8xf32>
    %352 = arith.mulf %347, %351 : vector<8x8xf32>
    %353 = vector.shape_cast %352 : vector<8x8xf32> to vector<8x8x1xf32>
    %354 = vector.broadcast %353 : vector<8x8x1xf32> to vector<8x8x32xf32>
    %355 = arith.mulf %354, %0 : vector<8x8x32xf32>
    %cst_105 = arith.constant dense<0.000000e+00> : vector<8x32xf32>
    %356 = vector.multi_reduction <add>, %355, %cst_105 [1] : vector<8x8x32xf32> to vector<8x32xf32>
    %357 = vector.extract_strided_slice %20 {offsets = [40, 0], sizes = [8, 128], strides = [1, 1]} : vector<64x128xf32> to vector<8x128xf32>
    %cst_106 = arith.constant dense<0.000000e+00> : vector<8x128xf32>
    %358 = tpu.matmul %356, %6, %cst_106 {dimension_numbers = #tpu.dot_dimension_numbers<[1], [0], [0], [1], [0, 0, 1, 1], [], []>} : vector<8x32xf32>, vector<32x128xf32>, vector<8x128xf32> -> vector<8x128xf32>
    %359 = arith.addf %357, %358 : vector<8x128xf32>
    %cst_107 = arith.constant dense<0.000000e+00> : vector<8x128xf32>
    %360 = tpu.matmul %325, %7, %cst_107 {dimension_numbers = #tpu.dot_dimension_numbers<[1], [0], [0], [1], [0, 0, 1, 1], [], []>} : vector<8x32xf32>, vector<32x128xf32>, vector<8x128xf32> -> vector<8x128xf32>
    %361 = arith.addf %359, %360 : vector<8x128xf32>
    %362 = vector.extract_strided_slice %361 {offsets = [0, 0], sizes = [8, 32], strides = [1, 1]} : vector<8x128xf32> to vector<8x32xf32>
    %363 = arith.negf %362 : vector<8x32xf32>
    %364 = math.exp %363 : vector<8x32xf32>
    %cst_108 = arith.constant 1.000000e+00 : f32
    %365 = vector.broadcast %cst_108 : f32 to vector<8x32xf32>
    %366 = arith.addf %365, %364 : vector<8x32xf32>
    %367 = arith.divf %365, %366 : vector<8x32xf32>
    %368 = vector.extract_strided_slice %361 {offsets = [0, 32], sizes = [8, 32], strides = [1, 1]} : vector<8x128xf32> to vector<8x32xf32>
    %369 = arith.negf %368 : vector<8x32xf32>
    %370 = math.exp %369 : vector<8x32xf32>
    %cst_109 = arith.constant 1.000000e+00 : f32
    %371 = vector.broadcast %cst_109 : f32 to vector<8x32xf32>
    %372 = arith.addf %371, %370 : vector<8x32xf32>
    %373 = arith.divf %371, %372 : vector<8x32xf32>
    %374 = vector.extract_strided_slice %361 {offsets = [0, 64], sizes = [8, 32], strides = [1, 1]} : vector<8x128xf32> to vector<8x32xf32>
    %375 = math.tanh %374 : vector<8x32xf32>
    %376 = vector.extract_strided_slice %361 {offsets = [0, 96], sizes = [8, 32], strides = [1, 1]} : vector<8x128xf32> to vector<8x32xf32>
    %377 = arith.negf %376 : vector<8x32xf32>
    %378 = math.exp %377 : vector<8x32xf32>
    %cst_110 = arith.constant 1.000000e+00 : f32
    %379 = vector.broadcast %cst_110 : f32 to vector<8x32xf32>
    %380 = arith.addf %379, %378 : vector<8x32xf32>
    %381 = arith.divf %379, %380 : vector<8x32xf32>
    %382 = arith.mulf %373, %323 : vector<8x32xf32>
    %383 = arith.mulf %367, %375 : vector<8x32xf32>
    %384 = arith.addf %382, %383 : vector<8x32xf32>
    %385 = math.tanh %384 : vector<8x32xf32>
    %386 = arith.mulf %381, %385 : vector<8x32xf32>
    %c40 = arith.constant 40 : index
    %c0_111 = arith.constant 0 : index
    %387 = vector.load %arg17[%c40, %c0_111] : memref<64x32xf32, #tpu.memory_space<vmem>>, vector<8x32xf32>
    tpu.vector_store %arg17[%c40, %c0_111], %386 {strides = array<i32>} : memref<64x32xf32, #tpu.memory_space<vmem>>, vector<8x32xf32>,
    %c40_112 = arith.constant 40 : index
    %c0_113 = arith.constant 0 : index
    %388 = vector.load %arg18[%c40_112, %c0_113] : memref<64x32xf32, #tpu.memory_space<vmem>>, vector<8x32xf32>
    tpu.vector_store %arg18[%c40_112, %c0_113], %356 {strides = array<i32>} : memref<64x32xf32, #tpu.memory_space<vmem>>, vector<8x32xf32>,
    %cst_114 = arith.constant dense<0.000000e+00> : vector<8x32xf32>
    %389 = tpu.matmul %386, %1, %cst_114 {dimension_numbers = #tpu.dot_dimension_numbers<[1], [0], [0], [1], [0, 0, 1, 1], [], []>} : vector<8x32xf32>, vector<32x32xf32>, vector<8x32xf32> -> vector<8x32xf32>
    %cst_115 = arith.constant dense<0.000000e+00> : vector<8x32xf32>
    %390 = tpu.matmul %384, %2, %cst_115 {dimension_numbers = #tpu.dot_dimension_numbers<[1], [0], [0], [1], [0, 0, 1, 1], [], []>} : vector<8x32xf32>, vector<32x32xf32>, vector<8x32xf32> -> vector<8x32xf32>
    %391 = arith.addf %389, %390 : vector<8x32xf32>
    %392 = vector.broadcast %3 : vector<1x32xf32> to vector<8x32xf32>
    %393 = arith.addf %391, %392 : vector<8x32xf32>
    %394 = vector.shape_cast %393 : vector<8x32xf32> to vector<8x1x32xf32>
    %395 = vector.broadcast %394 : vector<8x1x32xf32> to vector<8x8x32xf32>
    %396 = arith.addf %395, %14 : vector<8x8x32xf32>
    %397 = math.tanh %396 : vector<8x8x32xf32>
    %398 = vector.shape_cast %4 : vector<1x32xf32> to vector<1x1x32xf32>
    %399 = vector.broadcast %398 : vector<1x1x32xf32> to vector<8x8x32xf32>
    %400 = arith.mulf %397, %399 : vector<8x8x32xf32>
    %cst_116 = arith.constant dense<0.000000e+00> : vector<8x8xf32>
    %401 = vector.multi_reduction <add>, %400, %cst_116 [2] : vector<8x8x32xf32> to vector<8x8xf32>
    %402 = vector.broadcast %5 : f32 to vector<8x8xf32>
    %403 = arith.addf %401, %402 : vector<8x8xf32>
    %cst_117 = arith.constant dense<0xFF800000> : vector<8xf32>
    %404 = vector.multi_reduction <maximumf>, %403, %cst_117 [1] : vector<8x8xf32> to vector<8xf32>
    %405 = vector.shape_cast %404 : vector<8xf32> to vector<8x1xf32>
    %406 = vector.broadcast %405 : vector<8x1xf32> to vector<8x8xf32>
    %407 = arith.subf %403, %406 : vector<8x8xf32>
    %408 = math.exp %407 : vector<8x8xf32>
    %cst_118 = arith.constant dense<0.000000e+00> : vector<8xf32>
    %409 = vector.multi_reduction <add>, %408, %cst_118 [1] : vector<8x8xf32> to vector<8xf32>
    %410 = vector.shape_cast %409 : vector<8xf32> to vector<8x1xf32>
    %411 = tpu.reciprocal %410 : vector<8x1xf32> -> vector<8x1xf32>
    %412 = vector.broadcast %411 : vector<8x1xf32> to vector<8x8xf32>
    %413 = arith.mulf %408, %412 : vector<8x8xf32>
    %414 = vector.shape_cast %413 : vector<8x8xf32> to vector<8x8x1xf32>
    %415 = vector.broadcast %414 : vector<8x8x1xf32> to vector<8x8x32xf32>
    %416 = arith.mulf %415, %0 : vector<8x8x32xf32>
    %cst_119 = arith.constant dense<0.000000e+00> : vector<8x32xf32>
    %417 = vector.multi_reduction <add>, %416, %cst_119 [1] : vector<8x8x32xf32> to vector<8x32xf32>
    %418 = vector.extract_strided_slice %20 {offsets = [48, 0], sizes = [8, 128], strides = [1, 1]} : vector<64x128xf32> to vector<8x128xf32>
    %cst_120 = arith.constant dense<0.000000e+00> : vector<8x128xf32>
    %419 = tpu.matmul %417, %6, %cst_120 {dimension_numbers = #tpu.dot_dimension_numbers<[1], [0], [0], [1], [0, 0, 1, 1], [], []>} : vector<8x32xf32>, vector<32x128xf32>, vector<8x128xf32> -> vector<8x128xf32>
    %420 = arith.addf %418, %419 : vector<8x128xf32>
    %cst_121 = arith.constant dense<0.000000e+00> : vector<8x128xf32>
    %421 = tpu.matmul %386, %7, %cst_121 {dimension_numbers = #tpu.dot_dimension_numbers<[1], [0], [0], [1], [0, 0, 1, 1], [], []>} : vector<8x32xf32>, vector<32x128xf32>, vector<8x128xf32> -> vector<8x128xf32>
    %422 = arith.addf %420, %421 : vector<8x128xf32>
    %423 = vector.extract_strided_slice %422 {offsets = [0, 0], sizes = [8, 32], strides = [1, 1]} : vector<8x128xf32> to vector<8x32xf32>
    %424 = arith.negf %423 : vector<8x32xf32>
    %425 = math.exp %424 : vector<8x32xf32>
    %cst_122 = arith.constant 1.000000e+00 : f32
    %426 = vector.broadcast %cst_122 : f32 to vector<8x32xf32>
    %427 = arith.addf %426, %425 : vector<8x32xf32>
    %428 = arith.divf %426, %427 : vector<8x32xf32>
    %429 = vector.extract_strided_slice %422 {offsets = [0, 32], sizes = [8, 32], strides = [1, 1]} : vector<8x128xf32> to vector<8x32xf32>
    %430 = arith.negf %429 : vector<8x32xf32>
    %431 = math.exp %430 : vector<8x32xf32>
    %cst_123 = arith.constant 1.000000e+00 : f32
    %432 = vector.broadcast %cst_123 : f32 to vector<8x32xf32>
    %433 = arith.addf %432, %431 : vector<8x32xf32>
    %434 = arith.divf %432, %433 : vector<8x32xf32>
    %435 = vector.extract_strided_slice %422 {offsets = [0, 64], sizes = [8, 32], strides = [1, 1]} : vector<8x128xf32> to vector<8x32xf32>
    %436 = math.tanh %435 : vector<8x32xf32>
    %437 = vector.extract_strided_slice %422 {offsets = [0, 96], sizes = [8, 32], strides = [1, 1]} : vector<8x128xf32> to vector<8x32xf32>
    %438 = arith.negf %437 : vector<8x32xf32>
    %439 = math.exp %438 : vector<8x32xf32>
    %cst_124 = arith.constant 1.000000e+00 : f32
    %440 = vector.broadcast %cst_124 : f32 to vector<8x32xf32>
    %441 = arith.addf %440, %439 : vector<8x32xf32>
    %442 = arith.divf %440, %441 : vector<8x32xf32>
    %443 = arith.mulf %434, %384 : vector<8x32xf32>
    %444 = arith.mulf %428, %436 : vector<8x32xf32>
    %445 = arith.addf %443, %444 : vector<8x32xf32>
    %446 = math.tanh %445 : vector<8x32xf32>
    %447 = arith.mulf %442, %446 : vector<8x32xf32>
    %c48 = arith.constant 48 : index
    %c0_125 = arith.constant 0 : index
    %448 = vector.load %arg17[%c48, %c0_125] : memref<64x32xf32, #tpu.memory_space<vmem>>, vector<8x32xf32>
    tpu.vector_store %arg17[%c48, %c0_125], %447 {strides = array<i32>} : memref<64x32xf32, #tpu.memory_space<vmem>>, vector<8x32xf32>,
    %c48_126 = arith.constant 48 : index
    %c0_127 = arith.constant 0 : index
    %449 = vector.load %arg18[%c48_126, %c0_127] : memref<64x32xf32, #tpu.memory_space<vmem>>, vector<8x32xf32>
    tpu.vector_store %arg18[%c48_126, %c0_127], %417 {strides = array<i32>} : memref<64x32xf32, #tpu.memory_space<vmem>>, vector<8x32xf32>,
    %cst_128 = arith.constant dense<0.000000e+00> : vector<8x32xf32>
    %450 = tpu.matmul %447, %1, %cst_128 {dimension_numbers = #tpu.dot_dimension_numbers<[1], [0], [0], [1], [0, 0, 1, 1], [], []>} : vector<8x32xf32>, vector<32x32xf32>, vector<8x32xf32> -> vector<8x32xf32>
    %cst_129 = arith.constant dense<0.000000e+00> : vector<8x32xf32>
    %451 = tpu.matmul %445, %2, %cst_129 {dimension_numbers = #tpu.dot_dimension_numbers<[1], [0], [0], [1], [0, 0, 1, 1], [], []>} : vector<8x32xf32>, vector<32x32xf32>, vector<8x32xf32> -> vector<8x32xf32>
    %452 = arith.addf %450, %451 : vector<8x32xf32>
    %453 = vector.broadcast %3 : vector<1x32xf32> to vector<8x32xf32>
    %454 = arith.addf %452, %453 : vector<8x32xf32>
    %455 = vector.shape_cast %454 : vector<8x32xf32> to vector<8x1x32xf32>
    %456 = vector.broadcast %455 : vector<8x1x32xf32> to vector<8x8x32xf32>
    %457 = arith.addf %456, %14 : vector<8x8x32xf32>
    %458 = math.tanh %457 : vector<8x8x32xf32>
    %459 = vector.shape_cast %4 : vector<1x32xf32> to vector<1x1x32xf32>
    %460 = vector.broadcast %459 : vector<1x1x32xf32> to vector<8x8x32xf32>
    %461 = arith.mulf %458, %460 : vector<8x8x32xf32>
    %cst_130 = arith.constant dense<0.000000e+00> : vector<8x8xf32>
    %462 = vector.multi_reduction <add>, %461, %cst_130 [2] : vector<8x8x32xf32> to vector<8x8xf32>
    %463 = vector.broadcast %5 : f32 to vector<8x8xf32>
    %464 = arith.addf %462, %463 : vector<8x8xf32>
    %cst_131 = arith.constant dense<0xFF800000> : vector<8xf32>
    %465 = vector.multi_reduction <maximumf>, %464, %cst_131 [1] : vector<8x8xf32> to vector<8xf32>
    %466 = vector.shape_cast %465 : vector<8xf32> to vector<8x1xf32>
    %467 = vector.broadcast %466 : vector<8x1xf32> to vector<8x8xf32>
    %468 = arith.subf %464, %467 : vector<8x8xf32>
    %469 = math.exp %468 : vector<8x8xf32>
    %cst_132 = arith.constant dense<0.000000e+00> : vector<8xf32>
    %470 = vector.multi_reduction <add>, %469, %cst_132 [1] : vector<8x8xf32> to vector<8xf32>
    %471 = vector.shape_cast %470 : vector<8xf32> to vector<8x1xf32>
    %472 = tpu.reciprocal %471 : vector<8x1xf32> -> vector<8x1xf32>
    %473 = vector.broadcast %472 : vector<8x1xf32> to vector<8x8xf32>
    %474 = arith.mulf %469, %473 : vector<8x8xf32>
    %475 = vector.shape_cast %474 : vector<8x8xf32> to vector<8x8x1xf32>
    %476 = vector.broadcast %475 : vector<8x8x1xf32> to vector<8x8x32xf32>
    %477 = arith.mulf %476, %0 : vector<8x8x32xf32>
    %cst_133 = arith.constant dense<0.000000e+00> : vector<8x32xf32>
    %478 = vector.multi_reduction <add>, %477, %cst_133 [1] : vector<8x8x32xf32> to vector<8x32xf32>
    %c56 = arith.constant 56 : index
    %c0_134 = arith.constant 0 : index
    %479 = vector.load %arg17[%c56, %c0_134] : memref<64x32xf32, #tpu.memory_space<vmem>>, vector<8x32xf32>
    tpu.vector_store %arg17[%c56, %c0_134], %447 {strides = array<i32>} : memref<64x32xf32, #tpu.memory_space<vmem>>, vector<8x32xf32>,
    %c56_135 = arith.constant 56 : index
    %c0_136 = arith.constant 0 : index
    %480 = vector.load %arg18[%c56_135, %c0_136] : memref<64x32xf32, #tpu.memory_space<vmem>>, vector<8x32xf32>
    tpu.vector_store %arg18[%c56_135, %c0_136], %478 {strides = array<i32>} : memref<64x32xf32, #tpu.memory_space<vmem>>, vector<8x32xf32>,
    %c0_137 = arith.constant 0 : index
    %c0_138 = arith.constant 0 : index
    %481 = vector.load %arg17[%c0_137, %c0_138] : memref<64x32xf32, #tpu.memory_space<vmem>>, vector<64x32xf32>
    %c0_139 = arith.constant 0 : index
    %c0_140 = arith.constant 0 : index
    %482 = vector.load %arg13[%c0_139, %c0_140] : memref<32x3xf32, #tpu.memory_space<vmem>>, vector<32x3xf32>
    %cst_141 = arith.constant dense<0.000000e+00> : vector<64x3xf32>
    %483 = tpu.matmul %481, %482, %cst_141 {dimension_numbers = #tpu.dot_dimension_numbers<[1], [0], [0], [1], [0, 0, 1, 1], [], []>} : vector<64x32xf32>, vector<32x3xf32>, vector<64x3xf32> -> vector<64x3xf32>
    %c0_142 = arith.constant 0 : index
    %c0_143 = arith.constant 0 : index
    %484 = vector.load %arg18[%c0_142, %c0_143] : memref<64x32xf32, #tpu.memory_space<vmem>>, vector<64x32xf32>
    %c0_144 = arith.constant 0 : index
    %c0_145 = arith.constant 0 : index
    %485 = vector.load %arg14[%c0_144, %c0_145] : memref<32x3xf32, #tpu.memory_space<vmem>>, vector<32x3xf32>
    %cst_146 = arith.constant dense<0.000000e+00> : vector<64x3xf32>
    %486 = tpu.matmul %484, %485, %cst_146 {dimension_numbers = #tpu.dot_dimension_numbers<[1], [0], [0], [1], [0, 0, 1, 1], [], []>} : vector<64x32xf32>, vector<32x3xf32>, vector<64x3xf32> -> vector<64x3xf32>
    %487 = arith.addf %483, %486 : vector<64x3xf32>
    %c0_147 = arith.constant 0 : index
    %c0_148 = arith.constant 0 : index
    %488 = vector.load %arg15[%c0_147, %c0_148] : memref<1x3xf32, #tpu.memory_space<vmem>>, vector<1x3xf32>
    %489 = vector.broadcast %488 : vector<1x3xf32> to vector<64x3xf32>
    %490 = arith.addf %487, %489 : vector<64x3xf32>
    %c0_149 = arith.constant 0 : index
    %c0_150 = arith.constant 0 : index
    %491 = vector.load %arg16[%c0_149, %c0_150] : memref<64x3xf32, #tpu.memory_space<vmem>>, vector<64x3xf32>
    tpu.vector_store %arg16[%c0_149, %c0_150], %490 {strides = array<i32>} : memref<64x3xf32, #tpu.memory_space<vmem>>, vector<64x3xf32>,
    return
  }
}

</mosaic_0001>

<bundles_post_ra>
// kernel: decoder_forward.1
= control target key start
LH: loop header
LB: loop body
LE: loop exit
PB: predicated region body
PF: predicated region fallthrough
CT: control target
= control target key end

     0   :  { %vm263_vm0 = vcmask 1042432   ;;  %vm92_vm1 = vcmask 261120   ;;  %vm238_vm2 = vcmask 23552   ;;  %v10309_v16 = vmov 0.0|0.0   ;;  %s10289_s5 = inlined_call_operand.vmem [shape: f32[32,32], index: 5, kind: input, shape index: {}]   ;;  %s10290_s9 = inlined_call_operand.vmem [shape: f32[3,128], index: 9, kind: input, shape index: {}]   ;;  %s10291_s0 = inlined_call_operand.vmem [shape: f32[8,8,32], index: 0, kind: input, shape index: {}]   ;;  %s10292_s1 = inlined_call_operand.vmem [shape: f32[64,3], index: 1, kind: input, shape index: {}]   ;;  %s10293_s3 = inlined_call_operand.vmem [shape: f32[32,32], index: 3, kind: input, shape index: {}]   ;;  %s10294_s2 = inlined_call_operand.vmem [shape: f32[32,32], index: 2, kind: input, shape index: {}]   ;;  %s10295_s11 = inlined_call_operand.vmem [shape: f32[1,128], index: 11, kind: input, shape index: {}]   ;;  %s10296_s4 = inlined_call_operand.vmem [shape: f32[1,32], index: 4, kind: input, shape index: {}]   ;;  %s10297_s6 = inlined_call_operand.vmem [shape: f32[1,32], index: 6, kind: input, shape index: {}]   ;;  %s10298_s7 = inlined_call_operand.vmem [shape: f32[1,32], index: 7, kind: input, shape index: {}]   ;;  %s10299_s8 = inlined_call_operand.<no memory space> [shape: f32[1,1], index: 8, kind: input, shape index: {}]   ;;  %s10300_s10 = inlined_call_operand.vmem [shape: f32[32,128], index: 10, kind: input, shape index: {}]   ;;  %s10301_s12 = inlined_call_operand.vmem [shape: f32[32,128], index: 12, kind: input, shape index: {}]   ;;  %s10302_s13 = inlined_call_operand.vmem [shape: f32[32,3], index: 13, kind: input, shape index: {}]   ;;  %s10303_s14 = inlined_call_operand.vmem [shape: f32[32,3], index: 14, kind: input, shape index: {}]   ;;  %s10304_s15 = inlined_call_operand.vmem [shape: f32[1,3], index: 15, kind: input, shape index: {}]   ;;  %s10305_s16 = inlined_call_operand.vmem [shape: f32[64,3], index: 16, kind: output, shape index: {}]  }
   0x1   :  { %10336 = sst [smem:[#allocation19_spill]] %s10289_s5  ;;  %v230_v5 = vld [vmem:[%s10290_s9] sm:$0x7]  ;;  %v223_v9 = vld [vmem:[%s10292_s1 + $0x8] sm:$0xff]  ;;  %v224_v13 = vld [vmem:[%s10292_s1 + $0x10] sm:$0xff]  ;;  %vm8423_vm3 = vmmov 0   ;;  %v526_v60 = vlaneseq }
   0x2   :  { %s10337_s23 = sld [smem:[#allocation19_spill]]  ;;  %v8533_v6 = vld [vmem:[%s10291_s0] sm:$0xff]  ;;  %7446 = vmatprep.subr.msk.mxu1 %vm263_vm0, %v230_v5  ;;  %v67_v11 = vld [vmem:[%s10293_s3 + $0x8] sm:$0xff]  ;;  %v225_v17 = vld [vmem:[%s10292_s1 + $0x18] sm:$0xff]  ;;  %v10307_v35 = vmov 0.0   ;;  %vm716_vm4 = vcmask 1041409  }
   0x3   :  { %7434 = vmatprep.mubr.msk.f32.mxu0 %vm92_vm1, %v8533_v6  ;;  %v222_v8 = vld [vmem:[%s10292_s1] sm:$0xff]  ;;  %7447 = vmatpush3.msk.msra.mxu1 %vm263_vm0, %v230_v5  ;;  %v63_v15 = vld [vmem:[%s10294_s2 + $0x8] sm:$0xff]  ;;  %v68_v19 = vld [vmem:[%s10293_s3 + $0x10] sm:$0xff]  ;;  %v8425_v58 = vmov 1966171168   ;;  %vm718_vm5 = vcmask 1042434  }
   0x4   :  { %v66_v10 = vld [vmem:[%s10293_s3] sm:$0xff]  ;;  %7448 = vmatprep.mubr.msk.f32.mxu1 %vm238_vm2, %v222_v8  ;;  %7838 = vmatprep.subr.bf16.mxu1 %v10309_v16  ;;  %v69_v20 = vld [vmem:[%s10293_s3 + $0x18] sm:$0xff]  ;;  %v8582_v21 = vld [vmem:[%s10291_s0 + $0x8] sm:$0xff]  ;;  %v524_v59 = vunpack.c.l.s4 %v8425_v58  ;;  %vm720_vm6 = vcmask 1043459   ;;  %vm722_vm7 = vcmask 1044484   ;;  %vm724_vm8 = vcmask 1045509  }
   0x5   :  { %v8552_v12 = vpack.c.bf16 %v67_v11, %v66_v10  ;;  %7449 = vmatmul.mubr.msk.f32.vlgmr.msra.gmra.mrb[0].mxu1 %vm238_vm2, %v223_v9  ;;  %v62_v14 = vld [vmem:[%s10294_s2] sm:$0xff]  ;;  %v8587_v23 = vpack.c.bf16 %v69_v20, %v68_v19  ;;  %v8593_v24 = vld [vmem:[%s10291_s0 + $0x10] sm:$0xff]  ;;  %v65_v26 = vld [vmem:[%s10294_s2 + $0x18] sm:$0xff]  ;;  %vm726_vm9 = vcmask 1046534   ;;  %vm728_vm10 = vcmask 1047559   ;;  %s8429_s5 = smov 96  }
   0x6   :  { %7451 = vmatprep.mubr.msk.f32.mxu1 %vm238_vm2, %v224_v13  ;;  %v226_v18 = vld [vmem:[%s10292_s1 + $0x20] sm:$0xff]  ;;  %v8584_v22 = vpack.c.bf16 %v63_v15, %v62_v14  ;;  %v64_v25 = vld [vmem:[%s10294_s2 + $0x10] sm:$0xff]  ;;  %v227_v27 = vld [vmem:[%s10292_s1 + $0x28] sm:$0xff]  ;;  %vm731_vm11 = vcmask 64512  }
   0x7   :  { %7840 = vmatpush3.bf16.msra.mxu1 %v8552_v12  ;;  %v228_v28 = vld [vmem:[%s10292_s1 + $0x30] sm:$0xff]  ;;  %v8618_v29 = vld [vmem:[%s10291_s0 + $0x18] sm:$0xff]  ;;  %v8620_v30 = vpack.c.bf16 %v65_v26, %v64_v25  ;;  %v8625_v31 = vld [vmem:[%s10291_s0 + $0x20] sm:$0xff] }
   0x8   :  { %v81_v0 = vld [vmem:[%s10337_s23] sm:$0xff]  ;;  %v82_v1 = vld [vmem:[%s10337_s23 + $0x8] sm:$0xff]  ;;  %v83_v2 = vld [vmem:[%s10337_s23 + $0x10] sm:$0xff]  ;;  %7841 = vmatprep.subr.bf16.mxu1 %v10309_v16 }
   0x9   :  { %v7830_v3 = vpack.c.bf16 %v82_v1, %v81_v0  ;;  %v84_v4 = vld [vmem:[%s10337_s23 + $0x18] sm:$0xff]  ;;  %7452 = vmatmul.mubr.msk.f32.gmra.mrb[2].mxu1 %vm238_vm2, %v225_v17  ;;  %v8641_v33 = vld [vmem:[%s10291_s0 + $0x28] sm:$0xff]  ;;  %v8647_v34 = vld [vmem:[%s10291_s0 + $0x30] sm:$0xff]  ;;  %v525_v1 = vunpack.c.0.s8 %v524_v59 }
   0xa   :  { %v7834_v7 = vpack.c.bf16 %v84_v4, %v83_v2  ;;  %7454 = vmatprep.mubr.msk.f32.mxu1 %vm238_vm2, %v226_v18  ;;  %v229_v32 = vld [vmem:[%s10292_s1 + $0x38] sm:$0xff]  ;;  %v8675_v37 = vld [vmem:[%s10295_s11] ss:$0 sm:$0xff]  ;;  %v8698_v2 = vshrl.u32 %v526_v60, 7 }
   0xb   :  { %7831 = vmatprep.subr.bf16.mxu0 %v7830_v3  ;;  %7843 = vmatpush3.bf16.msra.mxu1 %v8587_v23  ;;  %v8660_v36 = vld [vmem:[%s10291_s0 + $0x38] sm:$0xff]  ;;  %v7159_v10 = vld [vmem:[%s10297_s6] ss:$0 sm:$0xff] }
   0xc   :  { %7833 = vmatpush3.bf16.msra.mxu0 %v7830_v3  ;;  %7850 = vmatprep.subr.bf16.mxu1 %v10309_v16  ;;  %v8703_v3 = vld [vmem:[%s10296_s4] ss:$0 sm:$0xff]  ;;  %v8714_v14 = vsub.s32 0, %v8698_v2 }
   0xd   :  { %7835 = vmatprep.subr.bf16.mxu0 %v7834_v7  ;;  %7455 = vmatmul.mubr.msk.f32.gmra.mrb[4].mxu1 %vm238_vm2, %v227_v27 }
   0xe   :  { %7457 = vmatprep.mubr.msk.f32.mxu1 %vm238_vm2, %v228_v28 }
  0x10   :  { %7837 = vmatpush3.bf16.msra.mxu0 %v7834_v7  ;;  %v8706_v7 = vsub.s32 %v525_v1, %v8698_v2 }
  0x11   :  { %7844 = vmatprep.subr.bf16.mxu0 %v10309_v16  ;;  %7458 = vmatmul.mubr.msk.f32.gmra.mrb[6].mxu1 %vm238_vm2, %v229_v32 }
  0x12   :  { %7468 = vmatprep.mubr.msk.f32.mxu1 %vm8423_vm3, %v10307_v35 }
  0x13   :  { %7435 = vmatmul.mubr.msk.f32.vlgmr.msra.gmra.mrb[0].mxu0 %vm92_vm1, %v8582_v21 }
  0x14   :  { %7846 = vmatpush3.bf16.msra.mxu0 %v8584_v22  ;;  %7437 = vmatprep.mubr.msk.f32.mxu0 %vm92_vm1, %v8593_v24 }
  0x15   :  { %7847 = vmatprep.subr.bf16.mxu0 %v10309_v16  ;;  %7469 = vmatmul.mubr.f32.vlgmr.msra.gmra.mrb[8].mxu1 %v10307_v35 }
  0x16   :  { %7490 = vmatprep.mubr.msk.f32.mxu1 %vm8423_vm3, %v10307_v35 }
  0x17   :  { %7438 = vmatmul.mubr.msk.f32.gmra.mrb[2].mxu0 %vm92_vm1, %v8618_v29 }
  0x18   :  { %7440 = vmatprep.mubr.msk.f32.mxu0 %vm92_vm1, %v8625_v31  ;;  %7849 = vmatpush3.bf16.msra.mxu0 %v8620_v30 }
  0x19   :  { %7856 = vmatprep.subr.bf16.mxu0 %v10309_v16 }
  0x1b   :  { %7441 = vmatmul.mubr.msk.f32.gmra.mrb[4].mxu0 %vm92_vm1, %v8641_v33 }
  0x1c   :  { %7443 = vmatprep.mubr.msk.f32.mxu0 %vm92_vm1, %v8647_v34 }
  0x1f   :  { %7444 = vmatmul.mubr.msk.f32.gmra.mrb[6].mxu0 %vm92_vm1, %v8660_v36 }
  0x20   :  { %7479 = vmatprep.mubr.msk.f32.mxu0 %vm8423_vm3, %v10307_v35 }
  0x23   :  { %7480 = vmatmul.mubr.f32.vlgmr.msra.gmra.mrb[8].mxu0 %v10307_v35 }
  0x24   :  { %7501 = vmatprep.mubr.msk.f32.mxu0 %vm8423_vm3, %v10307_v35 }
  0xd8   :  { %v7450_v38 = vpop.f32.mrb[0].mxu1 }
  0xd9   :  { %v8678_v39 = vadd.f32 %v7450_v38, %v8675_v37  ;;  %v8680_v40 = vpop.f32.mrb[1].mxu1 }
  0xdb   :  { %10338 = vst [vmem:[#allocation5_spill] sm:$0xff] %v8678_v39 }
  0xdc   :  { %v7453_v41 = vpop.f32.mrb[2].mxu1 }
  0xdd   :  { %v8683_v42 = vadd.f32 %v7453_v41, %v8675_v37  ;;  %v343_v43 = vpop.f32.mrb[3].mxu1 }
  0xde   :  { %v8686_v45 = vadd.f32 %v8675_v37, %v343_v43 }
  0xdf   :  { %10339 = vst [vmem:[#allocation6_spill] sm:$0xff] %v8683_v42 }
  0xe0   :  { %10340 = vst [vmem:[#allocation7_spill] sm:$0xff] %v8686_v45  ;;  %v7456_v47 = vpop.f32.mrb[4].mxu1 }
  0xe1   :  { %v8689_v48 = vadd.f32 %v7456_v47, %v8675_v37  ;;  %v353_v49 = vpop.f32.mrb[5].mxu1 }
  0xe2   :  { %v8692_v51 = vadd.f32 %v8675_v37, %v353_v49 }
  0xe3   :  { %10341 = vst [vmem:[#allocation8_spill] sm:$0xff] %v8689_v48 }
  0xe4   :  { %10342 = vst [vmem:[#allocation9_spill] sm:$0xff] %v8692_v51  ;;  %v7459_v53 = vpop.f32.mrb[6].mxu1 }
  0xe5   :  { %v363_v54 = vpop.f32.mrb[7].mxu1 }
  0xe6   :  { %v7436_v44 = vpop.f32.mrb[0].mxu0  ;;  %v8695_v56 = vadd.f32 %v8675_v37, %v363_v54 }
  0xe7   :  { %v183_v46 = vpop.f32.mrb[1].mxu0  ;;  %v8718_v19 = vadd.f32 %v7436_v44, %v7159_v10 }
  0xe8   :  { %10343 = vst [vmem:[#allocation10_spill] sm:$0xff] %v8695_v56  ;;  %v440_v61 = vpop.f32.mrb[8].mxu1  ;;  %v8722_v28 = vadd.f32 %v7159_v10, %v183_v46 }
  0xe9   :  { %v7470_v62 = vpop.f32.mrb[9].mxu1 }
  0xea   :  { %v7439_v50 = vpop.f32.mrb[2].mxu0 }
  0xeb   :  { %v193_v52 = vpop.f32.mrb[3].mxu0  ;;  %v8724_v32 = vadd.f32 %v7439_v50, %v7159_v10 }
  0xec   :  { %v8726_v38 = vadd.f32 %v7159_v10, %v193_v52 }
  0xee   :  { %v7442_v55 = vpop.f32.mrb[4].mxu0 }
  0xef   :  { %v203_v57 = vpop.f32.mrb[5].mxu0 }
  0xf0   :  { %v8731_v53 = vadd.f32 %v7159_v10, %v203_v57 }
  0xf2   :  { %v7445_v63 = vpop.f32.mrb[6].mxu0 }
  0xf3   :  { %v213_v0 = vpop.f32.mrb[7].mxu0 }
  0xf6   :  { %v510_v4 = vpop.f32.mrb[8].mxu0 }
  0xf7   :  { %v511_v5 = vadd.f32 %v510_v4, %v440_v61  ;;  %v7481_v8 = vpop.f32.mrb[9].mxu0  ;;  %v8742_v4 = vadd.f32 %v7442_v55, %v7159_v10  ;;  %v8755_v55 = vld [vmem:[%s10298_s7] ss:$0 sm:$0xff] }
  0xf8   :  { %v8745_v8 = vadd.f32 %v7159_v10, %v213_v0 }
  0xf9   :  { %v520_v9 = vadd.f32 %v8703_v3, %v511_v5 }
  0xfb   :  { %v522_v11 = vcombine.high %v520_v9, %v520_v9  ;;  %v529_v13 = vrot.slane %v520_v9, %v8706_v7 }
  0xfd   :  { %v536_v15 = vrot.slane %v522_v11, %v8706_v7  ;;  %v537_v17 = vcombine.high %v529_v13, %v529_v13  ;;  %v545_v18 = vrot.slane %v529_v13, %v8706_v7 }
  0xff   :  { %v538_v20 = vcombine.high %v536_v15, %v536_v15  ;;  %v552_v25 = vrot.slane %v536_v15, %v8706_v7  ;;  %v559_v26 = vrot.slane %v537_v17, %v8706_v7  ;;  %v567_v27 = vcombine.high %v545_v18, %v545_v18 }
 0x100   :  { %v574_v41 = vrot.slane %v545_v18, %v8714_v14  ;;  %v8750_v15 = vadd.f32 %v7445_v63, %v7159_v10 }
 0x101   :  { %v566_v43 = vrot.slane %v538_v20, %v8706_v7  ;;  %v568_v47 = vcombine.high %v552_v25, %v552_v25  ;;  %v569_v49 = vcombine.high %v559_v26, %v559_v26  ;;  %v578_v44 = vrot.slane %v559_v26, %v8714_v14 }
 0x102   :  { %v582_v54 = vrot.slane %v567_v27, %v8714_v14  ;;  %v590_v58 = vrot.slane %v552_v25, %v8714_v14  ;;  %v611_v46 = vadd.f32 %v574_v41, %v8722_v28 }
 0x103   :  { %v570_v50 = vcombine.high %v566_v43, %v566_v43  ;;  %v586_v52 = vrot.slane %v569_v49, %v8714_v14  ;;  %v594_v59 = vrot.slane %v566_v43, %v8714_v14  ;;  %v598_v61 = vrot.slane %v568_v47, %v8714_v14 }
 0x104   :  { %v612_v62 = vadd.f32 %v578_v44, %v8718_v19  ;;  %v613_v1 = vadd.f32 %v582_v54, %v8726_v38  ;;  %v615_v57 = vadd.f32 %v590_v58, %v8731_v53  ;;  %8056 = vtanh.f32 %v611_v46 }
 0x105   :  { %v614_v5 = vadd.f32 %v586_v52, %v8724_v32  ;;  %v616_v9 = vadd.f32 %v594_v59, %v8742_v4  ;;  %v602_v11 = vrot.slane %v570_v50, %v8714_v14  ;;  %v617_v13 = vadd.f32 %v598_v61, %v8745_v8 }
 0x106   :  { %8058 = vtanh.f32 %v612_v62 }
 0x107   :  { %8060 = vtanh.f32 %v615_v57  ;;  %v618_v0 = vadd.f32 %v602_v11, %v8750_v15  ;;  %v8778_v11 = vstv %s10299_s8 }
 0x108   :  { %8062 = vtanh.f32 %v613_v1 }
 0x109   :  { %8064 = vtanh.f32 %v614_v5 }
 0x10a   :  { %8066 = vtanh.f32 %v616_v9  ;;  %v683_v9 = vand.u32 127, %v526_v60 }
 0x10b   :  { %8068 = vtanh.f32 %v617_v13 }
 0x10c   :  { %8070 = vtanh.f32 %v618_v0  ;;  %v8781_v0 = vsub.s32 %v683_v9, %v8698_v2 }
 0x10e   :  { %v8057_v17 = vpop.eup %8056 }
 0x10f   :  { %v633_v18 = vmul.f32 %v8057_v17, %v8755_v55 }
 0x110   :  { %v8059_v20 = vpop.eup %8058 }
 0x111   :  { %v8061_v25 = vpop.eup %8060  ;;  %v641_v26 = vsel %vm92_vm1, %v633_v18, 0.0  ;;  %v634_v63 = vmul.f32 %v8059_v20, %v8755_v55 }
 0x112   :  { %v8063_v10 = vpop.eup %8062  ;;  %642 = vadd.xlane.f32.xlu0 %v641_v26  ;;  %v637_v54 = vmul.f32 %v8061_v25, %v8755_v55 }
 0x113   :  { %v8065_v27 = vpop.eup %8064  ;;  %v635_v41 = vmul.f32 %v8063_v10, %v8755_v55  ;;  %v644_v49 = vsel %vm92_vm1, %v634_v63, 0.0 }
 0x114   :  { %v8067_v43 = vpop.eup %8066  ;;  %v636_v44 = vmul.f32 %v8065_v27, %v8755_v55  ;;  %v653_v50 = vsel %vm92_vm1, %v637_v54, 0.0 }
 0x115   :  { %v647_v47 = vsel %vm92_vm1, %v635_v41, 0.0  ;;  %v8069_v58 = vpop.eup %8068  ;;  %v638_v52 = vmul.f32 %v8067_v43, %v8755_v55 }
 0x116   :  { %648 = vadd.xlane.f32.xlu1 %v647_v47  ;;  %645 = vadd.xlane.f32.xlu0 %v644_v49  ;;  %v650_v46 = vsel %vm92_vm1, %v636_v44, 0.0  ;;  %v639_v59 = vmul.f32 %v8069_v58, %v8755_v55  ;;  %v8071_v61 = vpop.eup %8070 }
 0x117   :  { %v656_v62 = vsel %vm92_vm1, %v638_v52, 0.0  ;;  %v640_v57 = vmul.f32 %v8071_v61, %v8755_v55 }
 0x118   :  { %v659_v1 = vsel %vm92_vm1, %v639_v59, 0.0 }
 0x119   :  { %v662_v5 = vsel %vm92_vm1, %v640_v57, 0.0 }
 0x11a   :  { %651 = vadd.xlane.f32.xlu1 %v650_v46  ;;  %654 = vadd.xlane.f32.xlu0 %v653_v50 }
 0x11e   :  { %657 = vadd.xlane.f32.xlu1 %v656_v62  ;;  %660 = vadd.xlane.f32.xlu0 %v659_v1 }
 0x122   :  { %663 = vadd.xlane.f32.xlu1 %v662_v5 }
 0x19f   :  { %v643_v13 = vpop.xlane.xlu0 %642 }
 0x1a0   :  { %v666_v17 = vadd.f32 %v8778_v11, %v643_v13 }
 0x1a2   :  { %v687_v60 = vrot.slane %v666_v17, %v8781_v0 }
 0x1a3   :  { %v649_v18 = vpop.xlane.xlu1 %648  ;;  %v646_v20 = vpop.xlane.xlu0 %645 }
 0x1a4   :  { %v668_v25 = vadd.f32 %v8778_v11, %v649_v18  ;;  %v667_v26 = vadd.f32 %v8778_v11, %v646_v20 }
 0x1a6   :  { %v691_v63 = vrot.slane %v667_v26, %v8781_v0  ;;  %v695_v10 = vrot.slane %v668_v25, %v8781_v0 }
 0x1a7   :  { %v652_v27 = vpop.xlane.xlu1 %651  ;;  %v655_v41 = vpop.xlane.xlu0 %654 }
 0x1a8   :  { %v717_v43 = vsel %vm716_vm4, %v691_v63, %v687_v60  ;;  %v669_v47 = vadd.f32 %v8778_v11, %v652_v27  ;;  %v670_v49 = vadd.f32 %v8778_v11, %v655_v41  ;;  %v8808_v27 = vsub.s32 1, %v8698_v2 }
 0x1a9   :  { %v719_v44 = vsel %vm718_vm5, %v695_v10, %v717_v43  ;;  %v8426_v10 = vmov 0   ;;  %v8811_v41 = vsub.s32 2, %v8698_v2  ;;  %v8814_v43 = vsub.s32 3, %v8698_v2 }
 0x1aa   :  { %v699_v54 = vrot.slane %v669_v47, %v8781_v0  ;;  %v703_v58 = vrot.slane %v670_v49, %v8781_v0  ;;  %8055 = vset.pattern.permute.xlu0 %v8426_v10  ;;  %8054 = vset.pattern.permute.xlu1 %v8426_v10 }
 0x1ab   :  { %v658_v46 = vpop.xlane.xlu1 %657  ;;  %v661_v50 = vpop.xlane.xlu0 %660 }
 0x1ac   :  { %v721_v52 = vsel %vm720_vm6, %v699_v54, %v719_v44  ;;  %v671_v59 = vadd.f32 %v8778_v11, %v658_v46  ;;  %v672_v61 = vadd.f32 %v8778_v11, %v661_v50 }
 0x1ad   :  { %v723_v62 = vsel %vm722_vm7, %v703_v58, %v721_v52 }
 0x1ae   :  { %v707_v1 = vrot.slane %v671_v59, %v8781_v0  ;;  %v711_v57 = vrot.slane %v672_v61, %v8781_v0 }
 0x1af   :  { %v664_v5 = vpop.xlane.xlu1 %663 }
 0x1b0   :  { %v673_v9 = vadd.f32 %v8778_v11, %v664_v5  ;;  %v725_v13 = vsel %vm724_vm8, %v707_v1, %v723_v62  ;;  %v8820_v62 = vsub.s32 4, %v8698_v2 }
 0x1b1   :  { %v727_v18 = vsel %vm726_vm9, %v711_v57, %v725_v13 }
 0x1b2   :  { %v715_v20 = vrot.slane %v673_v9, %v8781_v0 }
 0x1b4   :  { %v729_v60 = vsel %vm728_vm10, %v715_v20, %v727_v18  ;;  %v8824_v18 = vsub.s32 5, %v8698_v2 }
 0x1b5   :  { %v732_v63 = vsel %vm731_vm11, %v729_v60, -inf }
 0x1b6   :  { %733 = vmax.xlane.f32.xlu0 %v732_v63 }
 0x243   :  { %v734_v44 = vpop.xlane.xlu0 %733 }
 0x244   :  { %v739_v54 = vrot.slane %v734_v44, %v8714_v14  ;;  %v743_v58 = vrot.slane %v734_v44, %v8808_v27  ;;  %v747_v46 = vrot.slane %v734_v44, %v8811_v41  ;;  %v751_v1 = vrot.slane %v734_v44, %v8814_v43 }
 0x245   :  { %v755_v20 = vrot.slane %v734_v44, %v8820_v62 }
 0x246   :  { %v777_v50 = vsub.f32 %v667_v26, %v743_v58  ;;  %v776_v52 = vsub.f32 %v666_v17, %v739_v54  ;;  %v778_v57 = vsub.f32 %v668_v25, %v747_v46  ;;  %v779_v63 = vsub.f32 %v669_v47, %v751_v1 }
 0x247   :  { %v8828_v26 = vsub.s32 6, %v8698_v2  ;;  %v759_v17 = vrot.slane %v734_v44, %v8824_v18  ;;  %v780_v54 = vsub.f32 %v670_v49, %v755_v20  ;;  %v8832_v25 = vsub.s32 7, %v8698_v2 }
 0x248   :  { %v786_v5 = vmul.f32 1.442695, %v777_v50  ;;  %v784_v13 = vmul.f32 1.442695, %v776_v52  ;;  %v788_v60 = vmul.f32 1.442695, %v778_v57 }
 0x249   :  { %v790_v10 = vmul.f32 1.442695, %v779_v63  ;;  %10344 = vst [vmem:[#allocation11_spill] sm:$0xff] %v8832_v25  ;;  %v763_v58 = vrot.slane %v734_v44, %v8828_v26  ;;  %v792_v46 = vmul.f32 1.442695, %v780_v54  ;;  %v781_v50 = vsub.f32 %v671_v59, %v759_v17 }
 0x24a   :  { %8072 = vpow2.f32 %v786_v5  ;;  %v767_v47 = vrot.slane %v734_v44, %v8832_v25 }
 0x24b   :  { %8074 = vpow2.f32 %v784_v13  ;;  %v794_v1 = vmul.f32 1.442695, %v781_v50  ;;  %v782_v57 = vsub.f32 %v672_v61, %v763_v58 }
 0x24c   :  { %8076 = vpow2.f32 %v788_v60  ;;  %v783_v2 = vsub.f32 %v673_v9, %v767_v47 }
 0x24d   :  { %8078 = vpow2.f32 %v790_v10  ;;  %v796_v49 = vmul.f32 1.442695, %v782_v57 }
 0x24e   :  { %8080 = vpow2.f32 %v792_v46  ;;  %v798_v60 = vmul.f32 1.442695, %v783_v2 }
 0x24f   :  { %8082 = vpow2.f32 %v794_v1 }
 0x250   :  { %8084 = vpow2.f32 %v796_v49 }
 0x251   :  { %8086 = vpow2.f32 %v798_v60 }
 0x254   :  { %v8073_v52 = vpop.eup %8072 }
 0x255   :  { %v8075_v5 = vpop.eup %8074  ;;  %812 = vperm.xlu0 %8055, %v8073_v52  }
 0x256   :  { %809 = vperm.xlu1 %8054, %v8075_v5   ;;  %v8077_v13 = vpop.eup %8076 }
 0x257   :  { %v8079_v20 = vpop.eup %8078 }
 0x258   :  { %v8081_v63 = vpop.eup %8080 }
 0x259   :  { %v8083_v59 = vpop.eup %8082 }
 0x25a   :  { %815 = vperm.xlu1 %8054, %v8077_v13   ;;  %v8085_v17 = vpop.eup %8084 }
 0x25b   :  { %v8087_v44 = vpop.eup %8086 }
 0x25e   :  { %818 = vperm.xlu1 %8054, %v8079_v20  }
 0x262   :  { %821 = vperm.xlu1 %8054, %v8081_v63  }
 0x266   :  { %824 = vperm.xlu1 %8054, %v8083_v59  }
 0x26a   :  { %827 = vperm.xlu1 %8054, %v8085_v17  }
 0x26e   :  { %830 = vperm.xlu1 %8054, %v8087_v44  }
 0x2d4   :  { %v813_v46 = vpop.permute.xlu0 %812 }
 0x2d5   :  { %v810_v10 = vpop.permute.xlu1 %809  ;;  %v839_v9 = vrot.slane %v813_v46, %v8781_v0 }
 0x2d6   :  { %v835_v47 = vrot.slane %v810_v10, %v8781_v0 }
 0x2d8   :  { %v864_v60 = vsel %vm716_vm4, %v839_v9, %v835_v47 }
 0x2d9   :  { %v816_v61 = vpop.permute.xlu1 %815 }
 0x2da   :  { %v843_v1 = vrot.slane %v816_v61, %v8781_v0 }
 0x2dc   :  { %v865_v16 = vsel %vm718_vm5, %v843_v1, %v864_v60 }
 0x2dd   :  { %v819_v54 = vpop.permute.xlu1 %818 }
 0x2de   :  { %v847_v57 = vrot.slane %v819_v54, %v8781_v0 }
 0x2e0   :  { %v866_v48 = vsel %vm720_vm6, %v847_v57, %v865_v16 }
 0x2e1   :  { %v822_v58 = vpop.permute.xlu1 %821 }
 0x2e2   :  { %v851_v49 = vrot.slane %v822_v58, %v8781_v0 }
 0x2e4   :  { %v867_v46 = vsel %vm722_vm7, %v851_v49, %v866_v48 }
 0x2e5   :  { %v825_v50 = vpop.permute.xlu1 %824 }
 0x2e6   :  { %v855_v35 = vrot.slane %v825_v50, %v8781_v0 }
 0x2e8   :  { %v868_v54 = vsel %vm724_vm8, %v855_v35, %v867_v46 }
 0x2e9   :  { %v828_v2 = vpop.permute.xlu1 %827 }
 0x2ea   :  { %v859_v56 = vrot.slane %v828_v2, %v8781_v0 }
 0x2ec   :  { %v869_v58 = vsel %vm726_vm9, %v859_v56, %v868_v54 }
 0x2ed   :  { %v831_v10 = vpop.permute.xlu1 %830 }
 0x2ee   :  { %v863_v61 = vrot.slane %v831_v10, %v8781_v0 }
 0x2f0   :  { %v870_v51 = vsel %vm728_vm10, %v863_v61, %v869_v58 }
 0x2f1   :  { %v872_v9 = vsel %vm731_vm11, %v870_v51, 0.0 }
 0x2f2   :  { %873 = vadd.xlane.f32.xlu1 %v872_v9  ;;  %v76_v9 = vld [vmem:[%s10300_s10 + $0x18] sm:$0xff] }
 0x37f   :  { %v874_v50 = vpop.xlane.xlu1 %873 }
 0x380   :  { %8088 = vrcp.f32 %v874_v50  ;;  %v79_v50 = vld [vmem:[%s10301_s12 + $0x10] sm:$0xff] }
 0x38a   :  { %v8089_v47 = vpop.eup %8088 }
 0x38b   :  { %v880_v1 = vrot.slane %v8089_v47, %v8714_v14  ;;  %v884_v48 = vrot.slane %v8089_v47, %v8808_v27  ;;  %v888_v49 = vrot.slane %v8089_v47, %v8811_v41  ;;  %v892_v56 = vrot.slane %v8089_v47, %v8814_v43 }
 0x38c   :  { %v896_v51 = vrot.slane %v8089_v47, %v8820_v62  ;;  %v900_v46 = vrot.slane %v8089_v47, %v8824_v18  ;;  %v904_v10 = vrot.slane %v8089_v47, %v8828_v26  ;;  %v908_v61 = vrot.slane %v8089_v47, %v8832_v25  ;;  %v80_v47 = vld [vmem:[%s10301_s12 + $0x18] sm:$0xff] }
 0x38d   :  { %v917_v16 = vmul.f32 %v8075_v5, %v880_v1  ;;  %v918_v57 = vmul.f32 %v8073_v52, %v884_v48  ;;  %v919_v35 = vmul.f32 %v8077_v13, %v888_v49  ;;  %v920_v2 = vmul.f32 %v8079_v20, %v892_v56  ;;  %v73_v20 = vld [vmem:[%s10300_s10] sm:$0xff] }
 0x38e   :  { %v921_v60 = vmul.f32 %v8081_v63, %v896_v51  ;;  %v922_v5 = vmul.f32 %v8083_v59, %v900_v46  ;;  %v923_v52 = vmul.f32 %v8085_v17, %v904_v10  ;;  %v924_v13 = vmul.f32 %v8087_v44, %v908_v61  ;;  %v74_v63 = vld [vmem:[%s10300_s10 + $0x8] sm:$0xff]  ;;  %v77_v59 = vld [vmem:[%s10301_s12] sm:$0xff]  ;;  %v75_v44 = vld [vmem:[%s10300_s10 + $0x10] sm:$0xff]  ;;  %s8427_s10 = smov 64  }
 0x38f   :  { %927 = vperm.xlu0 %8055, %v917_v16   ;;  %v8866_v54 = vpack.c.bf16 %v74_v63, %v73_v20  ;;  %v78_v17 = vld [vmem:[%s10301_s12 + $0x8] sm:$0xff]  ;;  %v8889_v1 = vpack.c.bf16 %v76_v9, %v75_v44  ;;  %v10345_v16 = vmov 0.0|0.0   ;;  %v8893_v48 = vpack.c.bf16 %v80_v47, %v79_v50  ;;  %s8428_s12 = smov 32  }
 0x390   :  { %v8877_v58 = vpack.c.bf16 %v78_v17, %v77_v59 }
 0x391   :  { %7852 = vmatpush3.bf16.msra.mxu1 %v8866_v54 }
 0x392   :  { %7858 = vmatpush3.bf16.msra.mxu0 %v8877_v58  ;;  %7853 = vmatprep.subr.bf16.mxu1 %v10345_v16 }
 0x393   :  { %932 = vperm.xlu0 %8055, %v918_v57   ;;  %7859 = vmatprep.subr.bf16.mxu0 %v10345_v16  ;;  %v10346_v57 = vmov 0.0  }
 0x395   :  { %7855 = vmatpush3.bf16.msra.mxu1 %v8889_v1 }
 0x396   :  { %7861 = vmatpush3.bf16.msra.mxu0 %v8893_v48  ;;  %7862 = vmatprep.subr.bf16.mxu1 %v10345_v16 }
 0x397   :  { %937 = vperm.xlu0 %8055, %v919_v35   ;;  %7868 = vmatprep.subr.bf16.mxu0 %v10345_v16 }
 0x399   :  { %7502 = vmatmul.mubr.f32.vlgmr.msra.gmra.mrb[10].mxu0 %v10346_v57 }
 0x39a   :  { %7870 = vmatpush3.bf16.msra.mxu0 %v8584_v22  ;;  %7523 = vmatprep.mubr.msk.f32.mxu0 %vm8423_vm3, %v10346_v57 }
 0x39b   :  { %942 = vperm.xlu0 %8055, %v920_v2   ;;  %7871 = vmatprep.subr.bf16.mxu0 %v10345_v16 }
 0x39e   :  { %7873 = vmatpush3.bf16.msra.mxu0 %v8620_v30 }
 0x39f   :  { %947 = vperm.xlu0 %8055, %v921_v60   ;;  %7880 = vmatprep.subr.bf16.mxu0 %v10345_v16 }
 0x3a3   :  { %952 = vperm.xlu0 %8055, %v922_v5  }
 0x3a7   :  { %957 = vperm.xlu0 %8055, %v923_v52  }
 0x3ab   :  { %962 = vperm.xlu0 %8055, %v924_v13  }
 0x40e   :  { %v928_v49 = vpop.permute.xlu0 %927 }
 0x40f   :  { %v965_v51 = vmul.f32 %v928_v49, %v8533_v6 }
 0x411   :  { %v973_v52 = vsel %vm92_vm1, %v965_v51, 0.0 }
 0x412   :  { %v933_v35 = vpop.permute.xlu0 %932  ;;  %v974_v59 = vrot.slane %v973_v52, 4 }
 0x413   :  { %v966_v56 = vmul.f32 %v933_v35, %v8582_v21 }
 0x414   :  { %v975_v50 = vadd.f32 %v974_v59, %v973_v52 }
 0x415   :  { %v980_v46 = vsel %vm92_vm1, %v966_v56, 0.0 }
 0x416   :  { %v938_v2 = vpop.permute.xlu0 %937  ;;  %v981_v13 = vrot.slane %v980_v46, 4 }
 0x417   :  { %v967_v60 = vmul.f32 %v938_v2, %v8593_v24 }
 0x418   :  { %v982_v44 = vadd.f32 %v981_v13, %v980_v46 }
 0x419   :  { %v987_v5 = vsel %vm92_vm1, %v967_v60, 0.0 }
 0x41a   :  { %v943_v10 = vpop.permute.xlu0 %942  ;;  %v988_v20 = vrot.slane %v987_v5, 4 }
 0x41b   :  { %v968_v61 = vmul.f32 %v943_v10, %v8618_v29  ;;  %v983_v29 = vrot.slane %v982_v44, 2  ;;  %v976_v10 = vrot.slane %v975_v50, 2 }
 0x41c   :  { %v989_v24 = vadd.f32 %v988_v20, %v987_v5 }
 0x41d   :  { %v994_v63 = vsel %vm92_vm1, %v968_v61, 0.0  ;;  %v984_v5 = vadd.f32 %v983_v29, %v982_v44 }
 0x41e   :  { %v995_v21 = vrot.slane %v994_v63, 4  ;;  %v948_v17 = vpop.permute.xlu0 %947  ;;  %v990_v51 = vrot.slane %v989_v24, 2 }
 0x41f   :  { %v969_v6 = vmul.f32 %v948_v17, %v8625_v31 }
 0x420   :  { %v996_v47 = vadd.f32 %v995_v21, %v994_v63  ;;  %v991_v52 = vadd.f32 %v990_v51, %v989_v24  ;;  %v977_v63 = vadd.f32 %v976_v10, %v975_v50 }
 0x421   :  { %v1001_v9 = vsel %vm92_vm1, %v969_v6, 0.0 }
 0x422   :  { %v1002_v49 = vrot.slane %v1001_v9, 4  ;;  %v953_v35 = vpop.permute.xlu0 %952  ;;  %v997_v61 = vrot.slane %v996_v47, 2  ;;  %v992_v39 = vrot.slane %v991_v52, 1 }
 0x423   :  { %v970_v56 = vmul.f32 %v953_v35, %v8641_v33 }
 0x424   :  { %v1003_v2 = vadd.f32 %v1002_v49, %v1001_v9  ;;  %v998_v59 = vadd.f32 %v997_v61, %v996_v47  ;;  %v985_v49 = vrot.slane %v984_v5, 1 }
 0x425   :  { %v1008_v60 = vsel %vm92_vm1, %v970_v56, 0.0 }
 0x426   :  { %v1009_v42 = vrot.slane %v1008_v60, 4  ;;  %v958_v45 = vpop.permute.xlu0 %957  ;;  %v1004_v31 = vrot.slane %v1003_v2, 2  ;;  %v986_v29 = vadd.f32 %v985_v49, %v984_v5 }
 0x427   :  { %v971_v46 = vmul.f32 %v958_v45, %v8647_v34  ;;  %v978_v34 = vrot.slane %v977_v63, 1  ;;  %v999_v45 = vrot.slane %v998_v59, 1 }
 0x428   :  { %v1010_v13 = vadd.f32 %v1009_v42, %v1008_v60  ;;  %v1005_v6 = vadd.f32 %v1004_v31, %v1003_v2  ;;  %v993_v60 = vadd.f32 %v992_v39, %v991_v52 }
 0x429   :  { %v1015_v20 = vsel %vm92_vm1, %v971_v46, 0.0  ;;  %v979_v10 = vadd.f32 %v978_v34, %v977_v63  ;;  %v1000_v2 = vadd.f32 %v999_v45, %v998_v59 }
 0x42a   :  { %v1011_v33 = vrot.slane %v1010_v13, 2  ;;  %v1016_v21 = vrot.slane %v1015_v20, 4  ;;  %v963_v17 = vpop.permute.xlu0 %962  ;;  %v1006_v24 = vrot.slane %v1005_v6, 1 }
 0x42b   :  { %v972_v9 = vmul.f32 %v963_v17, %v8660_v36  ;;  %v1037_v46 = vsel %vm716_vm4, %v986_v29, %v979_v10 }
 0x42c   :  { %v1012_v35 = vadd.f32 %v1011_v33, %v1010_v13  ;;  %v1017_v56 = vadd.f32 %v1016_v21, %v1015_v20  ;;  %v1007_v31 = vadd.f32 %v1006_v24, %v1005_v6  ;;  %v1038_v33 = vsel %vm718_vm5, %v993_v60, %v1037_v46 }
 0x42d   :  { %v1022_v25 = vsel %vm92_vm1, %v972_v9, 0.0  ;;  %v1039_v17 = vsel %vm720_vm6, %v1000_v2, %v1038_v33  ;;  %v334_v6 = vadd.f32 %v8675_v37, %v8680_v40 }
 0x42e   :  { %v1018_v42 = vrot.slane %v1017_v56, 2  ;;  %v1023_v44 = vrot.slane %v1022_v25, 4  ;;  %v1013_v50 = vrot.slane %v1012_v35, 1  ;;  %v1040_v5 = vsel %vm722_vm7, %v1007_v31, %v1039_v17 }
 0x430   :  { %v1019_v47 = vadd.f32 %v1018_v42, %v1017_v56  ;;  %v1024_v51 = vadd.f32 %v1023_v44, %v1022_v25  ;;  %v1014_v13 = vadd.f32 %v1013_v50, %v1012_v35 }
 0x432   :  { %v1020_v61 = vrot.slane %v1019_v47, 1  ;;  %v1025_v36 = vrot.slane %v1024_v51, 2  ;;  %v1041_v39 = vsel %vm724_vm8, %v1014_v13, %v1040_v5 }
 0x434   :  { %v1026_v20 = vadd.f32 %v1025_v36, %v1024_v51  ;;  %v1021_v21 = vadd.f32 %v1020_v61, %v1019_v47 }
 0x436   :  { %v1027_v9 = vrot.slane %v1026_v20, 1  ;;  %v1042_v25 = vsel %vm726_vm9, %v1021_v21, %v1041_v39 }
 0x438   :  { %v1028_v49 = vadd.f32 %v1027_v9, %v1026_v20 }
 0x43a   :  { %v1043_v52 = vsel %vm728_vm10, %v1028_v49, %v1042_v25 }
 0x43b   :  { %7491 = vmatmul.mubr.msk.f32.vlgmr.msra.gmra.mrb[10].mxu1 %vm92_vm1, %v1043_v52  ;;  %1218 = vst.msk [vmem:[#allocation3] sm:$0xff] %vm92_vm1, %v1043_v52 }
 0x43c   :  { %7864 = vmatpush3.bf16.msra.mxu1 %v8552_v12  ;;  %7512 = vmatprep.mubr.msk.f32.mxu1 %vm8423_vm3, %v10346_v57 }
 0x43d   :  { %7865 = vmatprep.subr.bf16.mxu1 %v10345_v16 }
 0x440   :  { %7867 = vmatpush3.bf16.msra.mxu1 %v8587_v23 }
 0x441   :  { %7874 = vmatprep.subr.bf16.mxu1 %v10345_v16 }
 0x46c   :  { %v1183_v63 = vpop.f32.mrb[10].mxu0 }
 0x46d   :  { %v7503_v59 = vpop.f32.mrb[11].mxu0 }
 0x50e   :  { %v1112_v35 = vpop.f32.mrb[10].mxu1 }
 0x50f   :  { %v1116_v56 = vadd.f32 %v1112_v35, %v334_v6  ;;  %v7492_v34 = vpop.f32.mrb[11].mxu1 }
 0x511   :  { %v1187_v45 = vadd.f32 %v1183_v63, %v1116_v56 }
 0x513   :  { %8090 = vtanh.f32 %v1187_v45  ;;  %v7181_v44 = vmul.f32 -1.442695, %v1187_v45 }
 0x515   :  { %8092 = vpow2.f32 %v7181_v44 }
 0x51d   :  { %v8091_v42 = vpop.eup %8090 }
 0x51e   :  { %1197 = vrot.lane.b32.xlu1 %v8091_v42, %s8427_s10 }
 0x51f   :  { %v8093_v24 = vpop.eup %8092 }
 0x520   :  { %v1191_v29 = vadd.f32 1.0, %v8093_v24 }
 0x522   :  { %8094 = vrcp.f32 %v1191_v29 }
 0x52c   :  { %v8095_v50 = vpop.eup %8094 }
 0x52d   :  { %v1195_v37 = vmul.f32 0.0, %v8095_v50 }
 0x590   :  { %v1198_v47 = vpop.permute.xlu1 %1197 }
 0x591   :  { %v1200_v51 = vmul.f32 %v8095_v50, %v1198_v47 }
 0x593   :  { %1202 = vrot.lane.b32.xlu0 %v1200_v51, %s8428_s12 }
 0x605   :  { %v1203_v40 = vpop.permute.xlu0 %1202 }
 0x606   :  { %v8942_v60 = vadd.f32 %v1203_v40, %v1195_v37 }
 0x608   :  { %8096 = vtanh.f32 %v8942_v60 }
 0x612   :  { %v8097_v10 = vpop.eup %8096 }
 0x613   :  { %1208 = vrot.lane.b32.xlu0 %v8097_v10, %s8427_s10 }
 0x685   :  { %v1209_v2 = vpop.permute.xlu0 %1208 }
 0x686   :  { %v1211_v61 = vmul.f32 %v8095_v50, %v1209_v2 }
 0x688   :  { %1213 = vrot.lane.b32.xlu0 %v1211_v61, %s8428_s12 }
 0x68c   :  { %1220 = vrot.lane.b32.xlu0 %v8942_v60, %s8429_s5 }
 0x6fa   :  { %v1214_v36 = vpop.permute.xlu0 %1213 }
 0x6fb   :  { %1216 = vst.msk [vmem:[#allocation2] sm:$0xff] %vm92_vm1, %v1214_v36  ;;  %7524 = vmatmul.mubr.msk.f32.vlgmr.msra.gmra.mrb[12].mxu0 %vm92_vm1, %v1214_v36 }
 0x6fc   :  { %7882 = vmatpush3.bf16.msra.mxu0 %v8877_v58  ;;  %7545 = vmatprep.mubr.msk.f32.mxu0 %vm8423_vm3, %v10346_v57 }
 0x6fd   :  { %7883 = vmatprep.subr.bf16.mxu0 %v10345_v16 }
 0x6fe   :  { %v1221_v31 = vpop.permute.xlu0 %1220 }
 0x6ff   :  { %7513 = vmatmul.mubr.msk.f32.vlgmr.msra.gmra.mrb[12].mxu1 %vm92_vm1, %v1221_v31 }
 0x700   :  { %7885 = vmatpush3.bf16.msra.mxu0 %v8893_v48  ;;  %7876 = vmatpush3.bf16.msra.mxu1 %v8866_v54 }
 0x701   :  { %7877 = vmatprep.subr.bf16.mxu1 %v10345_v16  ;;  %7534 = vmatprep.mubr.msk.f32.mxu1 %vm8423_vm3, %v10346_v57 }
 0x702   :  { %7892 = vmatprep.subr.bf16.mxu0 %v10345_v16 }
 0x703   :  { %7546 = vmatmul.mubr.msk.f32.vlgmr.msra.gmra.mrb[14].mxu0 %vm92_vm1, %v1214_v36 }
 0x704   :  { %7879 = vmatpush3.bf16.msra.mxu1 %v8889_v1  ;;  %7894 = vmatpush3.bf16.msra.mxu0 %v8584_v22 }
 0x705   :  { %7895 = vmatprep.subr.bf16.mxu0 %v10345_v16  ;;  %7886 = vmatprep.subr.bf16.mxu1 %v10345_v16 }
 0x706   :  { %7567 = vmatprep.mubr.msk.f32.mxu0 %vm8423_vm3, %v10346_v57 }
 0x708   :  { %7897 = vmatpush3.bf16.msra.mxu0 %v8620_v30 }
 0x709   :  { %7904 = vmatprep.subr.bf16.mxu0 %v10345_v16 }
 0x7ce   :  { %v1362_v46 = vpop.f32.mrb[12].mxu0 }
 0x7cf   :  { %v7525_v13 = vpop.f32.mrb[13].mxu0 }
 0x7d2   :  { %v1290_v20 = vpop.f32.mrb[12].mxu1 }
 0x7d3   :  { %v1363_v33 = vadd.f32 %v1362_v46, %v1290_v20  ;;  %v7514_v21 = vpop.f32.mrb[13].mxu1 }
 0x7d5   :  { %v1366_v17 = vadd.f32 %v8703_v3, %v1363_v33 }
 0x7d6   :  { %v8972_v9 = vpop.f32.mrb[14].mxu0 }
 0x7d7   :  { %v1368_v5 = vcombine.high %v1366_v17, %v1366_v17  ;;  %v1375_v49 = vrot.slane %v1366_v17, %v8706_v7  ;;  %v7547_v39 = vpop.f32.mrb[15].mxu0 }
 0x7d9   :  { %v1382_v25 = vrot.slane %v1368_v5, %v8706_v7  ;;  %v1383_v52 = vcombine.high %v1375_v49, %v1375_v49  ;;  %v1391_v63 = vrot.slane %v1375_v49, %v8706_v7 }
 0x7db   :  { %v1384_v59 = vcombine.high %v1382_v25, %v1382_v25  ;;  %v1398_v6 = vrot.slane %v1382_v25, %v8706_v7  ;;  %v1405_v35 = vrot.slane %v1383_v52, %v8706_v7  ;;  %v1413_v56 = vcombine.high %v1391_v63, %v1391_v63 }
 0x7dc   :  { %v1420_v34 = vrot.slane %v1391_v63, %v8714_v14 }
 0x7dd   :  { %v1412_v3 = vrot.slane %v1384_v59, %v8706_v7  ;;  %v1415_v45 = vcombine.high %v1405_v35, %v1405_v35  ;;  %v1424_v42 = vrot.slane %v1405_v35, %v8714_v14  ;;  %v1414_v44 = vcombine.high %v1398_v6, %v1398_v6 }
 0x7de   :  { %v1428_v24 = vrot.slane %v1413_v56, %v8714_v14  ;;  %v1436_v29 = vrot.slane %v1398_v6, %v8714_v14  ;;  %v1457_v50 = vadd.f32 %v1420_v34, %v8722_v28 }
 0x7df   :  { %v1416_v47 = vcombine.high %v1412_v3, %v1412_v3  ;;  %v1432_v51 = vrot.slane %v1415_v45, %v8714_v14  ;;  %v1440_v37 = vrot.slane %v1412_v3, %v8714_v14  ;;  %v1458_v40 = vadd.f32 %v1424_v42, %v8718_v19 }
 0x7e0   :  { %v1459_v10 = vadd.f32 %v1428_v24, %v8726_v38  ;;  %v1461_v2 = vadd.f32 %v1436_v29, %v8731_v53  ;;  %8098 = vtanh.f32 %v1457_v50  ;;  %v1444_v31 = vrot.slane %v1414_v44, %v8714_v14 }
 0x7e1   :  { %v1448_v61 = vrot.slane %v1416_v47, %v8714_v14  ;;  %v1460_v36 = vadd.f32 %v1432_v51, %v8724_v32  ;;  %8100 = vtanh.f32 %v1458_v40  ;;  %v1462_v46 = vadd.f32 %v1440_v37, %v8742_v4 }
 0x7e2   :  { %8102 = vtanh.f32 %v1459_v10  ;;  %v1463_v20 = vadd.f32 %v1444_v31, %v8745_v8 }
 0x7e3   :  { %8104 = vtanh.f32 %v1461_v2  ;;  %v1464_v13 = vadd.f32 %v1448_v61, %v8750_v15 }
 0x7e4   :  { %8106 = vtanh.f32 %v1460_v36 }
 0x7e5   :  { %8108 = vtanh.f32 %v1462_v46 }
 0x7e6   :  { %8110 = vtanh.f32 %v1464_v13 }
 0x7e7   :  { %8112 = vtanh.f32 %v1463_v20 }
 0x7ea   :  { %v8099_v33 = vpop.eup %8098 }
 0x7eb   :  { %v1473_v21 = vmul.f32 %v8099_v33, %v8755_v55  ;;  %v8101_v17 = vpop.eup %8100 }
 0x7ec   :  { %v8103_v5 = vpop.eup %8102  ;;  %v1474_v39 = vmul.f32 %v8101_v17, %v8755_v55 }
 0x7ed   :  { %v1481_v49 = vsel %vm92_vm1, %v1473_v21, 0.0  ;;  %v8105_v25 = vpop.eup %8104  ;;  %v1475_v59 = vmul.f32 %v8103_v5, %v8755_v55 }
 0x7ee   :  { %1482 = vadd.xlane.f32.xlu1 %v1481_v49  ;;  %v8107_v52 = vpop.eup %8106  ;;  %v1484_v63 = vsel %vm92_vm1, %v1474_v39, 0.0  ;;  %v1477_v42 = vmul.f32 %v8105_v25, %v8755_v55 }
 0x7ef   :  { %v8109_v6 = vpop.eup %8108  ;;  %1485 = vadd.xlane.f32.xlu0 %v1484_v63  ;;  %v1476_v35 = vmul.f32 %v8107_v52, %v8755_v55  ;;  %v1487_v45 = vsel %vm92_vm1, %v1475_v59, 0.0 }
 0x7f0   :  { %v1478_v34 = vmul.f32 %v8109_v6, %v8755_v55  ;;  %v8111_v3 = vpop.eup %8110  ;;  %v1493_v50 = vsel %vm92_vm1, %v1477_v42, 0.0 }
 0x7f1   :  { %v1490_v56 = vsel %vm92_vm1, %v1476_v35, 0.0  ;;  %v8113_v44 = vpop.eup %8112  ;;  %v1480_v29 = vmul.f32 %v8111_v3, %v8755_v55 }
 0x7f2   :  { %1491 = vadd.xlane.f32.xlu1 %v1490_v56  ;;  %v1496_v24 = vsel %vm92_vm1, %v1478_v34, 0.0  ;;  %v1479_v47 = vmul.f32 %v8113_v44, %v8755_v55 }
 0x7f3   :  { %1488 = vadd.xlane.f32.xlu0 %v1487_v45  ;;  %v1502_v51 = vsel %vm92_vm1, %v1480_v29, 0.0 }
 0x7f4   :  { %v1499_v37 = vsel %vm92_vm1, %v1479_v47, 0.0 }
 0x7f6   :  { %1497 = vadd.xlane.f32.xlu1 %v1496_v24 }
 0x7f7   :  { %1494 = vadd.xlane.f32.xlu0 %v1493_v50 }
 0x7fa   :  { %1503 = vadd.xlane.f32.xlu1 %v1502_v51 }
 0x7fb   :  { %1500 = vadd.xlane.f32.xlu0 %v1499_v37 }
 0x87b   :  { %v1483_v40 = vpop.xlane.xlu1 %1482 }
 0x87c   :  { %v1486_v10 = vpop.xlane.xlu0 %1485  ;;  %v1505_v61 = vadd.f32 %v1483_v40, %v8778_v11 }
 0x87d   :  { %v1506_v2 = vadd.f32 %v1486_v10, %v8778_v11 }
 0x87e   :  { %v1524_v55 = vrot.slane %v1505_v61, %v8781_v0 }
 0x87f   :  { %v1492_v36 = vpop.xlane.xlu1 %1491  ;;  %v1528_v31 = vrot.slane %v1506_v2, %v8781_v0 }
 0x880   :  { %v1489_v46 = vpop.xlane.xlu0 %1488  ;;  %v1508_v20 = vadd.f32 %v1492_v36, %v8778_v11 }
 0x881   :  { %v1507_v13 = vadd.f32 %v1489_v46, %v8778_v11  ;;  %v1553_v17 = vsel %vm716_vm4, %v1528_v31, %v1524_v55 }
 0x882   :  { %v1536_v25 = vrot.slane %v1508_v20, %v8781_v0 }
 0x883   :  { %v1532_v33 = vrot.slane %v1507_v13, %v8781_v0  ;;  %v1498_v21 = vpop.xlane.xlu1 %1497 }
 0x884   :  { %v1495_v5 = vpop.xlane.xlu0 %1494  ;;  %v1510_v52 = vadd.f32 %v1498_v21, %v8778_v11 }
 0x885   :  { %v1554_v49 = vsel %vm718_vm5, %v1532_v33, %v1553_v17  ;;  %v1509_v39 = vadd.f32 %v1495_v5, %v8778_v11 }
 0x886   :  { %v1555_v56 = vsel %vm720_vm6, %v1536_v25, %v1554_v49  ;;  %v1544_v45 = vrot.slane %v1510_v52, %v8781_v0 }
 0x887   :  { %v1540_v63 = vrot.slane %v1509_v39, %v8781_v0  ;;  %v1504_v59 = vpop.xlane.xlu1 %1503 }
 0x888   :  { %v1512_v6 = vadd.f32 %v1504_v59, %v8778_v11  ;;  %v1501_v35 = vpop.xlane.xlu0 %1500 }
 0x889   :  { %v1511_v34 = vadd.f32 %v1501_v35, %v8778_v11  ;;  %v1556_v3 = vsel %vm722_vm7, %v1540_v63, %v1555_v56 }
 0x88a   :  { %v1552_v44 = vrot.slane %v1512_v6, %v8781_v0  ;;  %v1557_v24 = vsel %vm724_vm8, %v1544_v45, %v1556_v3  ;;  %v10347_v45 = vld [vmem:[#allocation11_spill] sm:$0xff] }
 0x88b   :  { %v1548_v42 = vrot.slane %v1511_v34, %v8781_v0 }
 0x88d   :  { %v1558_v29 = vsel %vm726_vm9, %v1548_v42, %v1557_v24 }
 0x88e   :  { %v1559_v50 = vsel %vm728_vm10, %v1552_v44, %v1558_v29 }
 0x88f   :  { %v1561_v47 = vsel %vm731_vm11, %v1559_v50, -inf }
 0x890   :  { %1562 = vmax.xlane.f32.xlu0 %v1561_v47 }
 0x91d   :  { %v1563_v51 = vpop.xlane.xlu0 %1562 }
 0x91e   :  { %v1568_v37 = vrot.slane %v1563_v51, %v8714_v14  ;;  %v1572_v40 = vrot.slane %v1563_v51, %v8808_v27  ;;  %v1576_v10 = vrot.slane %v1563_v51, %v8811_v41  ;;  %v1584_v36 = vrot.slane %v1563_v51, %v8820_v62 }
 0x91f   :  { %v1592_v31 = vrot.slane %v1563_v51, %v8828_v26  ;;  %v1580_v33 = vrot.slane %v1563_v51, %v8814_v43  ;;  %v1588_v59 = vrot.slane %v1563_v51, %v8824_v18  ;;  %v1596_v42 = vrot.slane %v1563_v51, %v10347_v45 }
 0x920   :  { %v1606_v46 = vsub.f32 %v1506_v2, %v1572_v40  ;;  %v1605_v55 = vsub.f32 %v1505_v61, %v1568_v37  ;;  %v1609_v21 = vsub.f32 %v1509_v39, %v1584_v36  ;;  %v1607_v17 = vsub.f32 %v1507_v13, %v1576_v10 }
 0x921   :  { %v1611_v63 = vsub.f32 %v1511_v34, %v1592_v31  ;;  %v1608_v56 = vsub.f32 %v1508_v20, %v1580_v33  ;;  %v1610_v61 = vsub.f32 %v1510_v52, %v1588_v59  ;;  %v1612_v39 = vsub.f32 %v1512_v6, %v1596_v42 }
 0x922   :  { %v1615_v5 = vmul.f32 1.442695, %v1606_v46  ;;  %v1613_v49 = vmul.f32 1.442695, %v1605_v55  ;;  %v1621_v25 = vmul.f32 1.442695, %v1609_v21 }
 0x923   :  { %v1617_v35 = vmul.f32 1.442695, %v1607_v17  ;;  %v1625_v3 = vmul.f32 1.442695, %v1611_v63  ;;  %v1619_v2 = vmul.f32 1.442695, %v1608_v56 }
 0x924   :  { %8114 = vpow2.f32 %v1615_v5  ;;  %v1623_v13 = vmul.f32 1.442695, %v1610_v61  ;;  %v1627_v34 = vmul.f32 1.442695, %v1612_v39 }
 0x925   :  { %8116 = vpow2.f32 %v1613_v49 }
 0x926   :  { %8118 = vpow2.f32 %v1621_v25 }
 0x927   :  { %8120 = vpow2.f32 %v1617_v35 }
 0x928   :  { %8122 = vpow2.f32 %v1625_v3 }
 0x929   :  { %8124 = vpow2.f32 %v1619_v2 }
 0x92a   :  { %8126 = vpow2.f32 %v1623_v13 }
 0x92b   :  { %8128 = vpow2.f32 %v1627_v34 }
 0x92e   :  { %v8115_v44 = vpop.eup %8114 }
 0x92f   :  { %v8117_v24 = vpop.eup %8116  ;;  %1641 = vperm.xlu0 %8055, %v8115_v44  }
 0x930   :  { %1638 = vperm.xlu1 %8054, %v8117_v24   ;;  %v8119_v29 = vpop.eup %8118 }
 0x931   :  { %v8121_v50 = vpop.eup %8120 }
 0x932   :  { %v8123_v20 = vpop.eup %8122 }
 0x933   :  { %1650 = vperm.xlu0 %8055, %v8119_v29   ;;  %v8125_v47 = vpop.eup %8124 }
 0x934   :  { %1644 = vperm.xlu1 %8054, %v8121_v50   ;;  %v8127_v52 = vpop.eup %8126 }
 0x935   :  { %v8129_v51 = vpop.eup %8128 }
 0x937   :  { %1656 = vperm.xlu0 %8055, %v8123_v20  }
 0x938   :  { %1647 = vperm.xlu1 %8054, %v8125_v47  }
 0x93c   :  { %1653 = vperm.xlu1 %8054, %v8127_v52  }
 0x940   :  { %1659 = vperm.xlu1 %8054, %v8129_v51  }
 0x9ae   :  { %v1642_v37 = vpop.permute.xlu0 %1641 }
 0x9af   :  { %v1639_v6 = vpop.permute.xlu1 %1638  ;;  %v1668_v10 = vrot.slane %v1642_v37, %v8781_v0 }
 0x9b0   :  { %v1664_v36 = vrot.slane %v1639_v6, %v8781_v0 }
 0x9b2   :  { %v1651_v46 = vpop.permute.xlu0 %1650  ;;  %v1693_v33 = vsel %vm716_vm4, %v1668_v10, %v1664_v36 }
 0x9b3   :  { %v1645_v40 = vpop.permute.xlu1 %1644  ;;  %v1680_v49 = vrot.slane %v1651_v46, %v8781_v0 }
 0x9b4   :  { %v1672_v31 = vrot.slane %v1645_v40, %v8781_v0 }
 0x9b6   :  { %v1694_v17 = vsel %vm718_vm5, %v1672_v31, %v1693_v33  ;;  %v1657_v63 = vpop.permute.xlu0 %1656 }
 0x9b7   :  { %v1648_v55 = vpop.permute.xlu1 %1647  ;;  %v1688_v3 = vrot.slane %v1657_v63, %v8781_v0 }
 0x9b8   :  { %v1676_v21 = vrot.slane %v1648_v55, %v8781_v0 }
 0x9ba   :  { %v1695_v5 = vsel %vm720_vm6, %v1676_v21, %v1694_v17 }
 0x9bb   :  { %v1654_v25 = vpop.permute.xlu1 %1653  ;;  %v1696_v35 = vsel %vm722_vm7, %v1680_v49, %v1695_v5 }
 0x9bc   :  { %v1684_v59 = vrot.slane %v1654_v25, %v8781_v0 }
 0x9be   :  { %v1697_v56 = vsel %vm724_vm8, %v1684_v59, %v1696_v35 }
 0x9bf   :  { %v1660_v42 = vpop.permute.xlu1 %1659  ;;  %v1698_v61 = vsel %vm726_vm9, %v1688_v3, %v1697_v56 }
 0x9c0   :  { %v1692_v2 = vrot.slane %v1660_v42, %v8781_v0 }
 0x9c2   :  { %v1699_v13 = vsel %vm728_vm10, %v1692_v2, %v1698_v61 }
 0x9c3   :  { %v1701_v39 = vsel %vm731_vm11, %v1699_v13, 0.0  ;;  %v9092_v13 = vld [vmem:[%s10291_s0 + $0x18] sm:$0xff] }
 0x9c4   :  { %1702 = vadd.xlane.f32.xlu0 %v1701_v39  ;;  %10350 = vst [vmem:[#allocation14_spill] sm:$0xff] %v9092_v13 }
 0xa51   :  { %v1703_v34 = vpop.xlane.xlu0 %1702 }
 0xa52   :  { %8130 = vrcp.f32 %v1703_v34 }
 0xa5c   :  { %v8131_v6 = vpop.eup %8130 }
 0xa5d   :  { %v1709_v37 = vrot.slane %v8131_v6, %v8714_v14  ;;  %v1713_v10 = vrot.slane %v8131_v6, %v8808_v27  ;;  %v1717_v31 = vrot.slane %v8131_v6, %v8811_v41  ;;  %v1721_v55 = vrot.slane %v8131_v6, %v8814_v43 }
 0xa5e   :  { %v1725_v21 = vrot.slane %v8131_v6, %v8820_v62  ;;  %v1729_v5 = vrot.slane %v8131_v6, %v8824_v18  ;;  %v1733_v49 = vrot.slane %v8131_v6, %v8828_v26  ;;  %v1737_v25 = vrot.slane %v8131_v6, %v10347_v45 }
 0xa5f   :  { %v1746_v40 = vmul.f32 %v8117_v24, %v1709_v37  ;;  %v1747_v36 = vmul.f32 %v8115_v44, %v1713_v10  ;;  %v1748_v46 = vmul.f32 %v8121_v50, %v1717_v31  ;;  %v1749_v33 = vmul.f32 %v8125_v47, %v1721_v55  ;;  %v9071_v47 = vld [vmem:[%s10291_s0 + $0x8] sm:$0xff]  ;;  %v9099_v31 = vld [vmem:[%s10291_s0 + $0x20] sm:$0xff] }
 0xa60   :  { %v1750_v17 = vmul.f32 %v8119_v29, %v1725_v21  ;;  %v1751_v24 = vmul.f32 %v8127_v52, %v1729_v5  ;;  %v1752_v44 = vmul.f32 %v8123_v20, %v1733_v49  ;;  %v1753_v50 = vmul.f32 %v8129_v51, %v1737_v25  ;;  %v9077_v52 = vld [vmem:[%s10291_s0] sm:$0xff]  ;;  %v9083_v51 = vld [vmem:[%s10291_s0 + $0x10] sm:$0xff]  ;;  %10351 = vst [vmem:[#allocation15_spill] sm:$0xff] %v9099_v31 }
 0xa61   :  { %1756 = vperm.xlu1 %8054, %v1746_v40   ;;  %10348 = vst [vmem:[#allocation12_spill] sm:$0xff] %v9077_v52  ;;  %10349 = vst [vmem:[#allocation13_spill] sm:$0xff] %v9083_v51 }
 0xa65   :  { %1761 = vperm.xlu1 %8054, %v1747_v36  }
 0xa69   :  { %1766 = vperm.xlu1 %8054, %v1748_v46  }
 0xa6d   :  { %1771 = vperm.xlu1 %8054, %v1749_v33  }
 0xa71   :  { %1776 = vperm.xlu1 %8054, %v1750_v17  }
 0xa75   :  { %1781 = vperm.xlu1 %8054, %v1751_v24  }
 0xa79   :  { %1786 = vperm.xlu1 %8054, %v1752_v44   ;;  %v9106_v44 = vld [vmem:[%s10291_s0 + $0x28] sm:$0xff] }
 0xa7a   :  { %10352 = vst [vmem:[#allocation16_spill] sm:$0xff] %v9106_v44 }
 0xa7d   :  { %1791 = vperm.xlu1 %8054, %v1753_v50  }
 0xae0   :  { %v1757_v63 = vpop.permute.xlu1 %1756 }
 0xae1   :  { %v1794_v20 = vmul.f32 %v9077_v52, %v1757_v63 }
 0xae3   :  { %v1802_v61 = vsel %vm92_vm1, %v1794_v20, 0.0 }
 0xae4   :  { %v1762_v59 = vpop.permute.xlu1 %1761  ;;  %v1803_v40 = vrot.slane %v1802_v61, 4 }
 0xae5   :  { %v1795_v29 = vmul.f32 %v9071_v47, %v1762_v59 }
 0xae6   :  { %v1804_v17 = vadd.f32 %v1803_v40, %v1802_v61 }
 0xae7   :  { %v1809_v3 = vsel %vm92_vm1, %v1795_v29, 0.0 }
 0xae8   :  { %v1767_v35 = vpop.permute.xlu1 %1766  ;;  %v1810_v34 = vrot.slane %v1809_v3, 4 }
 0xae9   :  { %v1796_v56 = vmul.f32 %v9083_v51, %v1767_v35  ;;  %v1805_v35 = vrot.slane %v1804_v17, 2 }
 0xaea   :  { %v1811_v55 = vadd.f32 %v1810_v34, %v1809_v3 }
 0xaeb   :  { %v1816_v42 = vsel %vm92_vm1, %v1796_v56, 0.0  ;;  %v1806_v40 = vadd.f32 %v1805_v35, %v1804_v17 }
 0xaec   :  { %v1772_v2 = vpop.permute.xlu1 %1771  ;;  %v1817_v6 = vrot.slane %v1816_v42, 4  ;;  %v1812_v50 = vrot.slane %v1811_v55, 2 }
 0xaed   :  { %v1797_v39 = vmul.f32 %v9092_v13, %v1772_v2  ;;  %v9113_v2 = vld [vmem:[%s10291_s0 + $0x30] sm:$0xff] }
 0xaee   :  { %v1818_v33 = vadd.f32 %v1817_v6, %v1816_v42  ;;  %10353 = vst [vmem:[#allocation17_spill] sm:$0xff] %v9113_v2 }
 0xaef   :  { %v1823_v37 = vsel %vm92_vm1, %v1797_v39, 0.0  ;;  %v1813_v39 = vadd.f32 %v1812_v50, %v1811_v55 }
 0xaf0   :  { %v1824_v10 = vrot.slane %v1823_v37, 4  ;;  %v1777_v36 = vpop.permute.xlu1 %1776  ;;  %v1819_v59 = vrot.slane %v1818_v33, 2 }
 0xaf1   :  { %v1798_v46 = vmul.f32 %v9099_v31, %v1777_v36 }
 0xaf2   :  { %v1825_v5 = vadd.f32 %v1824_v10, %v1823_v37  ;;  %v1820_v6 = vadd.f32 %v1819_v59, %v1818_v33  ;;  %v1807_v59 = vrot.slane %v1806_v40, 1 }
 0xaf3   :  { %v1830_v21 = vsel %vm92_vm1, %v1798_v46, 0.0 }
 0xaf4   :  { %v1831_v24 = vrot.slane %v1830_v21, 4  ;;  %v1782_v49 = vpop.permute.xlu1 %1781  ;;  %v1826_v20 = vrot.slane %v1825_v5, 2  ;;  %v1821_v50 = vrot.slane %v1820_v6, 1 }
 0xaf5   :  { %v1799_v25 = vmul.f32 %v9106_v44, %v1782_v49  ;;  %v9120_v49 = vld [vmem:[%s10291_s0 + $0x38] sm:$0xff]  ;;  %v1814_v44 = vrot.slane %v1813_v39, 1 }
 0xaf6   :  { %v1832_v63 = vadd.f32 %v1831_v24, %v1830_v21  ;;  %v1827_v10 = vadd.f32 %v1826_v20, %v1825_v5  ;;  %10354 = vst [vmem:[#allocation18_spill] sm:$0xff] %v9120_v49 }
 0xaf7   :  { %v1837_v29 = vsel %vm92_vm1, %v1799_v25, 0.0  ;;  %v1815_v20 = vadd.f32 %v1814_v44, %v1813_v39 }
 0xaf8   :  { %v1838_v56 = vrot.slane %v1837_v29, 4  ;;  %v1787_v3 = vpop.permute.xlu1 %1786  ;;  %v1833_v42 = vrot.slane %v1832_v63, 2  ;;  %v1828_v17 = vrot.slane %v1827_v10, 1 }
 0xaf9   :  { %v1800_v61 = vmul.f32 %v9113_v2, %v1787_v3  ;;  %v1808_v2 = vadd.f32 %v1807_v59, %v1806_v40 }
 0xafa   :  { %v1839_v34 = vadd.f32 %v1838_v56, %v1837_v29  ;;  %v1834_v24 = vadd.f32 %v1833_v42, %v1832_v63  ;;  %v1829_v31 = vadd.f32 %v1828_v17, %v1827_v10 }
 0xafb   :  { %v1844_v37 = vsel %vm92_vm1, %v1800_v61, 0.0  ;;  %v1822_v61 = vadd.f32 %v1821_v50, %v1820_v6 }
 0xafc   :  { %v1840_v36 = vrot.slane %v1839_v34, 2  ;;  %v1845_v46 = vrot.slane %v1844_v37, 4  ;;  %v1792_v21 = vpop.permute.xlu1 %1791  ;;  %v1835_v35 = vrot.slane %v1834_v24, 1 }
 0xafd   :  { %v1801_v25 = vmul.f32 %v9120_v49, %v1792_v21 }
 0xafe   :  { %v1841_v3 = vadd.f32 %v1840_v36, %v1839_v34  ;;  %v1846_v55 = vadd.f32 %v1845_v46, %v1844_v37  ;;  %v1836_v49 = vadd.f32 %v1835_v35, %v1834_v24  ;;  %v1866_v34 = vsel %vm716_vm4, %v1815_v20, %v1808_v2 }
 0xaff   :  { %v1851_v33 = vsel %vm92_vm1, %v1801_v25, 0.0  ;;  %v1867_v46 = vsel %vm718_vm5, %v1822_v61, %v1866_v34 }
 0xb00   :  { %v1847_v5 = vrot.slane %v1846_v55, 2  ;;  %v1852_v29 = vrot.slane %v1851_v33, 4  ;;  %v1842_v63 = vrot.slane %v1841_v3, 1  ;;  %v1868_v51 = vsel %vm720_vm6, %v1829_v31, %v1867_v46 }
 0xb01   :  { %v1869_v44 = vsel %vm722_vm7, %v1836_v49, %v1868_v51  ;;  %v10355_v51 = vld [vmem:[#allocation5_spill] sm:$0xff] }
 0xb02   :  { %v1848_v56 = vadd.f32 %v1847_v5, %v1846_v55  ;;  %v1853_v42 = vadd.f32 %v1852_v29, %v1851_v33  ;;  %v1843_v37 = vadd.f32 %v1842_v63, %v1841_v3 }
 0xb04   :  { %v1849_v13 = vrot.slane %v1848_v56, 1  ;;  %v1854_v21 = vrot.slane %v1853_v42, 2  ;;  %v1870_v6 = vsel %vm724_vm8, %v1843_v37, %v1869_v44  ;;  %v9176_v37 = vld [vmem:[%s10296_s4] ss:$0 sm:$0xff] }
 0xb06   :  { %v1855_v36 = vadd.f32 %v1854_v21, %v1853_v42  ;;  %v1850_v25 = vadd.f32 %v1849_v13, %v1848_v56 }
 0xb08   :  { %v1856_v52 = vrot.slane %v1855_v36, 1  ;;  %v1871_v40 = vsel %vm726_vm9, %v1850_v25, %v1870_v6 }
 0xb0a   :  { %v1857_v39 = vadd.f32 %v1856_v52, %v1855_v36 }
 0xb0c   :  { %v1872_v10 = vsel %vm728_vm10, %v1857_v39, %v1871_v40 }
 0xb0d   :  { %7535 = vmatmul.mubr.msk.f32.vlgmr.msra.gmra.mrb[14].mxu1 %vm92_vm1, %v1872_v10  ;;  %2047 = vst.msk [vmem:[#allocation3 + $0x8] sm:$0xff] %vm92_vm1, %v1872_v10 }
 0xb0e   :  { %7888 = vmatpush3.bf16.msra.mxu1 %v8552_v12  ;;  %7556 = vmatprep.mubr.msk.f32.mxu1 %vm8423_vm3, %v10346_v57 }
 0xb0f   :  { %7889 = vmatprep.subr.bf16.mxu1 %v10345_v16 }
 0xb12   :  { %7891 = vmatpush3.bf16.msra.mxu1 %v8587_v23 }
 0xb13   :  { %7898 = vmatprep.subr.bf16.mxu1 %v10345_v16 }
 0xbe0   :  { %v1941_v52 = vpop.f32.mrb[14].mxu1 }
 0xbe1   :  { %v1945_v13 = vadd.f32 %v1941_v52, %v10355_v51  ;;  %v7536_v31 = vpop.f32.mrb[15].mxu1 }
 0xbe3   :  { %v2016_v2 = vadd.f32 %v8972_v9, %v1945_v13 }
 0xbe5   :  { %8132 = vtanh.f32 %v2016_v2  ;;  %v7186_v49 = vmul.f32 -1.442695, %v2016_v2 }
 0xbe7   :  { %8134 = vpow2.f32 %v7186_v49 }
 0xbef   :  { %v8133_v24 = vpop.eup %8132 }
 0xbf0   :  { %2026 = vrot.lane.b32.xlu0 %v8133_v24, %s8427_s10 }
 0xbf1   :  { %v8135_v3 = vpop.eup %8134 }
 0xbf2   :  { %v2020_v55 = vadd.f32 1.0, %v8135_v3 }
 0xbf4   :  { %8136 = vrcp.f32 %v2020_v55 }
 0xbfe   :  { %v8137_v50 = vpop.eup %8136 }
 0xbff   :  { %v2024_v17 = vmul.f32 %v8137_v50, %v8942_v60 }
 0xc62   :  { %v2027_v33 = vpop.permute.xlu0 %2026 }
 0xc63   :  { %v2029_v59 = vmul.f32 %v8137_v50, %v2027_v33 }
 0xc65   :  { %2031 = vrot.lane.b32.xlu1 %v2029_v59, %s8428_s12 }
 0xcd7   :  { %v2032_v5 = vpop.permute.xlu1 %2031 }
 0xcd8   :  { %v9144_v29 = vadd.f32 %v2032_v5, %v2024_v17 }
 0xcda   :  { %8138 = vtanh.f32 %v9144_v29 }
 0xce4   :  { %v8139_v9 = vpop.eup %8138 }
 0xce5   :  { %2037 = vrot.lane.b32.xlu1 %v8139_v9, %s8427_s10 }
 0xd57   :  { %v2038_v35 = vpop.permute.xlu1 %2037 }
 0xd58   :  { %v2040_v20 = vmul.f32 %v8137_v50, %v2038_v35 }
 0xd5a   :  { %2042 = vrot.lane.b32.xlu1 %v2040_v20, %s8428_s12 }
 0xd5e   :  { %2049 = vrot.lane.b32.xlu1 %v9144_v29, %s8429_s5 }
 0xdcc   :  { %v2043_v63 = vpop.permute.xlu1 %2042 }
 0xdcd   :  { %2045 = vst.msk [vmem:[#allocation2 + $0x8] sm:$0xff] %vm92_vm1, %v2043_v63  ;;  %7568 = vmatmul.mubr.msk.f32.vlgmr.msra.gmra.mrb[16].mxu0 %vm92_vm1, %v2043_v63 }
 0xdce   :  { %7906 = vmatpush3.bf16.msra.mxu0 %v8877_v58  ;;  %7589 = vmatprep.mubr.msk.f32.mxu0 %vm8423_vm3, %v10346_v57 }
 0xdcf   :  { %7907 = vmatprep.subr.bf16.mxu0 %v10345_v16 }
 0xdd0   :  { %v2050_v60 = vpop.permute.xlu1 %2049 }
 0xdd1   :  { %7557 = vmatmul.mubr.msk.f32.vlgmr.msra.gmra.mrb[16].mxu1 %vm92_vm1, %v2050_v60 }
 0xdd2   :  { %7909 = vmatpush3.bf16.msra.mxu0 %v8893_v48  ;;  %7900 = vmatpush3.bf16.msra.mxu1 %v8866_v54 }
 0xdd3   :  { %7901 = vmatprep.subr.bf16.mxu1 %v10345_v16  ;;  %7578 = vmatprep.mubr.msk.f32.mxu1 %vm8423_vm3, %v10346_v57 }
 0xdd4   :  { %7916 = vmatprep.subr.bf16.mxu0 %v10345_v16 }
 0xdd5   :  { %7590 = vmatmul.mubr.msk.f32.vlgmr.msra.gmra.mrb[18].mxu0 %vm92_vm1, %v2043_v63 }
 0xdd6   :  { %7903 = vmatpush3.bf16.msra.mxu1 %v8889_v1  ;;  %7918 = vmatpush3.bf16.msra.mxu0 %v8584_v22 }
 0xdd7   :  { %7919 = vmatprep.subr.bf16.mxu0 %v10345_v16  ;;  %7910 = vmatprep.subr.bf16.mxu1 %v10345_v16 }
 0xdd8   :  { %7611 = vmatprep.mubr.msk.f32.mxu0 %vm8423_vm3, %v10346_v57 }
 0xdda   :  { %7921 = vmatpush3.bf16.msra.mxu0 %v8620_v30 }
 0xddb   :  { %7928 = vmatprep.subr.bf16.mxu0 %v10345_v16 }
 0xea0   :  { %v2191_v56 = vpop.f32.mrb[16].mxu0 }
 0xea1   :  { %v7569_v42 = vpop.f32.mrb[17].mxu0 }
 0xea4   :  { %v2119_v61 = vpop.f32.mrb[16].mxu1 }
 0xea5   :  { %v2192_v21 = vadd.f32 %v2191_v56, %v2119_v61  ;;  %v7558_v34 = vpop.f32.mrb[17].mxu1 }
 0xea7   :  { %v2195_v36 = vadd.f32 %v9176_v37, %v2192_v21 }
 0xea8   :  { %v9179_v46 = vpop.f32.mrb[18].mxu0 }
 0xea9   :  { %v2197_v25 = vcombine.high %v2195_v36, %v2195_v36  ;;  %v2204_v44 = vrot.slane %v2195_v36, %v8706_v7  ;;  %v7591_v39 = vpop.f32.mrb[19].mxu0 }
 0xeab   :  { %v2211_v6 = vrot.slane %v2197_v25, %v8706_v7  ;;  %v2212_v40 = vcombine.high %v2204_v44, %v2204_v44  ;;  %v2220_v10 = vrot.slane %v2204_v44, %v8706_v7  ;;  %v9206_v25 = vld [vmem:[%s10298_s7] ss:$0 sm:$0xff] }
 0xead   :  { %v2213_v52 = vcombine.high %v2211_v6, %v2211_v6  ;;  %v2227_v51 = vrot.slane %v2211_v6, %v8706_v7  ;;  %v2234_v13 = vrot.slane %v2212_v40, %v8706_v7  ;;  %v2242_v31 = vcombine.high %v2220_v10, %v2220_v10 }
 0xeae   :  { %v2249_v2 = vrot.slane %v2220_v10, %v8714_v14 }
 0xeaf   :  { %v2241_v24 = vrot.slane %v2213_v52, %v8706_v7  ;;  %v2244_v49 = vcombine.high %v2234_v13, %v2234_v13  ;;  %v2253_v3 = vrot.slane %v2234_v13, %v8714_v14  ;;  %v2243_v55 = vcombine.high %v2227_v51, %v2227_v51 }
 0xeb0   :  { %v2257_v50 = vrot.slane %v2242_v31, %v8714_v14  ;;  %v2265_v33 = vrot.slane %v2227_v51, %v8714_v14  ;;  %v2286_v59 = vadd.f32 %v2249_v2, %v8722_v28 }
 0xeb1   :  { %v2245_v17 = vcombine.high %v2241_v24, %v2241_v24  ;;  %v2261_v5 = vrot.slane %v2244_v49, %v8714_v14  ;;  %v2269_v9 = vrot.slane %v2241_v24, %v8714_v14  ;;  %v2287_v35 = vadd.f32 %v2253_v3, %v8718_v19 }
 0xeb2   :  { %v2288_v20 = vadd.f32 %v2257_v50, %v8726_v38  ;;  %v2290_v63 = vadd.f32 %v2265_v33, %v8731_v53  ;;  %8140 = vtanh.f32 %v2286_v59  ;;  %v2273_v42 = vrot.slane %v2243_v55, %v8714_v14 }
 0xeb3   :  { %v2277_v60 = vrot.slane %v2245_v17, %v8714_v14  ;;  %v2289_v56 = vadd.f32 %v2261_v5, %v8724_v32  ;;  %8142 = vtanh.f32 %v2287_v35  ;;  %v2291_v61 = vadd.f32 %v2269_v9, %v8742_v4 }
 0xeb4   :  { %8144 = vtanh.f32 %v2288_v20  ;;  %v2292_v34 = vadd.f32 %v2273_v42, %v8745_v8 }
 0xeb5   :  { %8146 = vtanh.f32 %v2290_v63  ;;  %v2293_v21 = vadd.f32 %v2277_v60, %v8750_v15 }
 0xeb6   :  { %8148 = vtanh.f32 %v2289_v56 }
 0xeb7   :  { %8150 = vtanh.f32 %v2291_v61 }
 0xeb8   :  { %8152 = vtanh.f32 %v2293_v21 }
 0xeb9   :  { %8154 = vtanh.f32 %v2292_v34 }
 0xebc   :  { %v8141_v36 = vpop.eup %8140 }
 0xebd   :  { %v2302_v44 = vmul.f32 %v9206_v25, %v8141_v36  ;;  %v8143_v39 = vpop.eup %8142 }
 0xebe   :  { %v8145_v6 = vpop.eup %8144  ;;  %v2303_v10 = vmul.f32 %v9206_v25, %v8143_v39 }
 0xebf   :  { %v2310_v40 = vsel %vm92_vm1, %v2302_v44, 0.0  ;;  %v8147_v52 = vpop.eup %8146  ;;  %v2304_v31 = vmul.f32 %v9206_v25, %v8145_v6 }
 0xec0   :  { %2311 = vadd.xlane.f32.xlu1 %v2310_v40  ;;  %v8149_v51 = vpop.eup %8148  ;;  %v2313_v13 = vsel %vm92_vm1, %v2303_v10, 0.0  ;;  %v2306_v33 = vmul.f32 %v9206_v25, %v8147_v52 }
 0xec1   :  { %v8151_v2 = vpop.eup %8150  ;;  %2314 = vadd.xlane.f32.xlu0 %v2313_v13  ;;  %v2305_v24 = vmul.f32 %v9206_v25, %v8149_v51  ;;  %v2316_v50 = vsel %vm92_vm1, %v2304_v31, 0.0 }
 0xec2   :  { %v2307_v3 = vmul.f32 %v9206_v25, %v8151_v2  ;;  %v8153_v55 = vpop.eup %8152  ;;  %v2322_v9 = vsel %vm92_vm1, %v2306_v33, 0.0 }
 0xec3   :  { %v2319_v49 = vsel %vm92_vm1, %v2305_v24, 0.0  ;;  %v8155_v59 = vpop.eup %8154  ;;  %v2309_v5 = vmul.f32 %v9206_v25, %v8153_v55 }
 0xec4   :  { %2320 = vadd.xlane.f32.xlu1 %v2319_v49  ;;  %v2325_v17 = vsel %vm92_vm1, %v2307_v3, 0.0  ;;  %v2308_v35 = vmul.f32 %v9206_v25, %v8155_v59 }
 0xec5   :  { %2317 = vadd.xlane.f32.xlu0 %v2316_v50  ;;  %v2331_v20 = vsel %vm92_vm1, %v2309_v5, 0.0 }
 0xec6   :  { %v2328_v63 = vsel %vm92_vm1, %v2308_v35, 0.0 }
 0xec8   :  { %2326 = vadd.xlane.f32.xlu1 %v2325_v17 }
 0xec9   :  { %2323 = vadd.xlane.f32.xlu0 %v2322_v9 }
 0xecc   :  { %2332 = vadd.xlane.f32.xlu1 %v2331_v20 }
 0xecd   :  { %2329 = vadd.xlane.f32.xlu0 %v2328_v63 }
 0xf4d   :  { %v2312_v60 = vpop.xlane.xlu1 %2311 }
 0xf4e   :  { %v2315_v56 = vpop.xlane.xlu0 %2314  ;;  %v2334_v61 = vadd.f32 %v2312_v60, %v8778_v11 }
 0xf4f   :  { %v2335_v42 = vadd.f32 %v2315_v56, %v8778_v11 }
 0xf50   :  { %v2353_v39 = vrot.slane %v2334_v61, %v8781_v0 }
 0xf51   :  { %v2321_v21 = vpop.xlane.xlu1 %2320  ;;  %v2357_v34 = vrot.slane %v2335_v42, %v8781_v0 }
 0xf52   :  { %v2318_v36 = vpop.xlane.xlu0 %2317  ;;  %v2337_v6 = vadd.f32 %v2321_v21, %v8778_v11 }
 0xf53   :  { %v2336_v44 = vadd.f32 %v2318_v36, %v8778_v11  ;;  %v2382_v52 = vsel %vm716_vm4, %v2357_v34, %v2353_v39 }
 0xf54   :  { %v2365_v2 = vrot.slane %v2337_v6, %v8781_v0 }
 0xf55   :  { %v2361_v40 = vrot.slane %v2336_v44, %v8781_v0  ;;  %v2327_v10 = vpop.xlane.xlu1 %2326 }
 0xf56   :  { %v2324_v51 = vpop.xlane.xlu0 %2323  ;;  %v2339_v24 = vadd.f32 %v2327_v10, %v8778_v11 }
 0xf57   :  { %v2383_v13 = vsel %vm718_vm5, %v2361_v40, %v2382_v52  ;;  %v2338_v31 = vadd.f32 %v2324_v51, %v8778_v11 }
 0xf58   :  { %v2384_v33 = vsel %vm720_vm6, %v2365_v2, %v2383_v13  ;;  %v2373_v5 = vrot.slane %v2339_v24, %v8781_v0 }
 0xf59   :  { %v2369_v49 = vrot.slane %v2338_v31, %v8781_v0  ;;  %v2333_v3 = vpop.xlane.xlu1 %2332 }
 0xf5a   :  { %v2341_v55 = vadd.f32 %v2333_v3, %v8778_v11  ;;  %v2330_v50 = vpop.xlane.xlu0 %2329 }
 0xf5b   :  { %v2340_v59 = vadd.f32 %v2330_v50, %v8778_v11  ;;  %v2385_v17 = vsel %vm722_vm7, %v2369_v49, %v2384_v33 }
 0xf5c   :  { %v2381_v35 = vrot.slane %v2341_v55, %v8781_v0  ;;  %v2386_v20 = vsel %vm724_vm8, %v2373_v5, %v2385_v17 }
 0xf5d   :  { %v2377_v9 = vrot.slane %v2340_v59, %v8781_v0 }
 0xf5f   :  { %v2387_v63 = vsel %vm726_vm9, %v2377_v9, %v2386_v20 }
 0xf60   :  { %v2388_v60 = vsel %vm728_vm10, %v2381_v35, %v2387_v63 }
 0xf61   :  { %v2390_v56 = vsel %vm731_vm11, %v2388_v60, -inf }
 0xf62   :  { %2391 = vmax.xlane.f32.xlu0 %v2390_v56 }
 0xfef   :  { %v2392_v21 = vpop.xlane.xlu0 %2391 }
 0xff0   :  { %v2397_v34 = vrot.slane %v2392_v21, %v8714_v14  ;;  %v2401_v36 = vrot.slane %v2392_v21, %v8808_v27  ;;  %v2405_v39 = vrot.slane %v2392_v21, %v8811_v41  ;;  %v2413_v40 = vrot.slane %v2392_v21, %v8820_v62 }
 0xff1   :  { %v2421_v10 = vrot.slane %v2392_v21, %v8828_v26  ;;  %v2409_v13 = vrot.slane %v2392_v21, %v8814_v43  ;;  %v2417_v5 = vrot.slane %v2392_v21, %v8824_v18  ;;  %v2425_v63 = vrot.slane %v2392_v21, %v10347_v45 }
 0xff2   :  { %v2435_v52 = vsub.f32 %v2335_v42, %v2401_v36  ;;  %v2434_v51 = vsub.f32 %v2334_v61, %v2397_v34  ;;  %v2438_v2 = vsub.f32 %v2338_v31, %v2413_v40  ;;  %v2436_v49 = vsub.f32 %v2336_v44, %v2405_v39 }
 0xff3   :  { %v2440_v17 = vsub.f32 %v2340_v59, %v2421_v10  ;;  %v2437_v35 = vsub.f32 %v2337_v6, %v2409_v13  ;;  %v2439_v61 = vsub.f32 %v2339_v24, %v2417_v5  ;;  %v2441_v31 = vsub.f32 %v2341_v55, %v2425_v63 }
 0xff4   :  { %v2444_v3 = vmul.f32 1.442695, %v2435_v52  ;;  %v2442_v50 = vmul.f32 1.442695, %v2434_v51  ;;  %v2450_v33 = vmul.f32 1.442695, %v2438_v2 }
 0xff5   :  { %v2446_v9 = vmul.f32 1.442695, %v2436_v49  ;;  %v2454_v20 = vmul.f32 1.442695, %v2440_v17  ;;  %v2448_v42 = vmul.f32 1.442695, %v2437_v35 }
 0xff6   :  { %8156 = vpow2.f32 %v2444_v3  ;;  %v2452_v44 = vmul.f32 1.442695, %v2439_v61  ;;  %v2456_v59 = vmul.f32 1.442695, %v2441_v31 }
 0xff7   :  { %8158 = vpow2.f32 %v2442_v50 }
 0xff8   :  { %8160 = vpow2.f32 %v2450_v33 }
 0xff9   :  { %8162 = vpow2.f32 %v2446_v9 }
 0xffa   :  { %8164 = vpow2.f32 %v2454_v20 }
 0xffb   :  { %8166 = vpow2.f32 %v2448_v42 }
 0xffc   :  { %8168 = vpow2.f32 %v2452_v44 }
 0xffd   :  { %8170 = vpow2.f32 %v2456_v59 }
0x1000   :  { %v8157_v60 = vpop.eup %8156 }
0x1001   :  { %v8159_v56 = vpop.eup %8158  ;;  %2470 = vperm.xlu0 %8055, %v8157_v60  }
0x1002   :  { %2467 = vperm.xlu1 %8054, %v8159_v56   ;;  %v8161_v34 = vpop.eup %8160 }
0x1003   :  { %v8163_v36 = vpop.eup %8162 }
0x1004   :  { %v8165_v6 = vpop.eup %8164 }
0x1005   :  { %2479 = vperm.xlu0 %8055, %v8161_v34   ;;  %v8167_v21 = vpop.eup %8166 }
0x1006   :  { %2473 = vperm.xlu1 %8054, %v8163_v36   ;;  %v8169_v24 = vpop.eup %8168 }
0x1007   :  { %v8171_v39 = vpop.eup %8170 }
0x1009   :  { %2485 = vperm.xlu0 %8055, %v8165_v6  }
0x100a   :  { %2476 = vperm.xlu1 %8054, %v8167_v21  }
0x100e   :  { %2482 = vperm.xlu1 %8054, %v8169_v24  }
0x1012   :  { %2488 = vperm.xlu1 %8054, %v8171_v39  }
0x1080   :  { %v2471_v40 = vpop.permute.xlu0 %2470 }
0x1081   :  { %v2468_v55 = vpop.permute.xlu1 %2467  ;;  %v2497_v52 = vrot.slane %v2471_v40, %v8781_v0 }
0x1082   :  { %v2493_v51 = vrot.slane %v2468_v55, %v8781_v0 }
0x1084   :  { %v2480_v2 = vpop.permute.xlu0 %2479  ;;  %v2522_v3 = vsel %vm716_vm4, %v2497_v52, %v2493_v51 }
0x1085   :  { %v2474_v10 = vpop.permute.xlu1 %2473  ;;  %v2509_v5 = vrot.slane %v2480_v2, %v8781_v0 }
0x1086   :  { %v2501_v13 = vrot.slane %v2474_v10, %v8781_v0 }
0x1088   :  { %v2523_v33 = vsel %vm718_vm5, %v2501_v13, %v2522_v3  ;;  %v2486_v35 = vpop.permute.xlu0 %2485 }
0x1089   :  { %v2477_v49 = vpop.permute.xlu1 %2476  ;;  %v2517_v61 = vrot.slane %v2486_v35, %v8781_v0 }
0x108a   :  { %v2505_v50 = vrot.slane %v2477_v49, %v8781_v0 }
0x108c   :  { %v2524_v17 = vsel %vm720_vm6, %v2505_v50, %v2523_v33 }
0x108d   :  { %v2483_v9 = vpop.permute.xlu1 %2482  ;;  %v2525_v63 = vsel %vm722_vm7, %v2509_v5, %v2524_v17 }
0x108e   :  { %v2513_v20 = vrot.slane %v2483_v9, %v8781_v0 }
0x1090   :  { %v2526_v42 = vsel %vm724_vm8, %v2513_v20, %v2525_v63 }
0x1091   :  { %v2489_v44 = vpop.permute.xlu1 %2488  ;;  %v2527_v59 = vsel %vm726_vm9, %v2517_v61, %v2526_v42 }
0x1092   :  { %v2521_v31 = vrot.slane %v2489_v44, %v8781_v0 }
0x1094   :  { %v2528_v55 = vsel %vm728_vm10, %v2521_v31, %v2527_v59  ;;  %v10356_v31 = vld [vmem:[#allocation12_spill] sm:$0xff]  ;;  %v10357_v59 = vld [vmem:[#allocation13_spill] sm:$0xff] }
0x1095   :  { %v2530_v40 = vsel %vm731_vm11, %v2528_v55, 0.0 }
0x1096   :  { %2531 = vadd.xlane.f32.xlu0 %v2530_v40 }
0x1123   :  { %v2532_v10 = vpop.xlane.xlu0 %2531 }
0x1124   :  { %8172 = vrcp.f32 %v2532_v10 }
0x112e   :  { %v8173_v52 = vpop.eup %8172 }
0x112f   :  { %v2538_v51 = vrot.slane %v8173_v52, %v8714_v14  ;;  %v2542_v2 = vrot.slane %v8173_v52, %v8808_v27  ;;  %v2546_v3 = vrot.slane %v8173_v52, %v8811_v41  ;;  %v2550_v33 = vrot.slane %v8173_v52, %v8814_v43 }
0x1130   :  { %v2554_v5 = vrot.slane %v8173_v52, %v8820_v62  ;;  %v2558_v35 = vrot.slane %v8173_v52, %v8824_v18  ;;  %v2562_v20 = vrot.slane %v8173_v52, %v8828_v26  ;;  %v2566_v63 = vrot.slane %v8173_v52, %v10347_v45  ;;  %v10358_v52 = vld [vmem:[#allocation14_spill] sm:$0xff] }
0x1131   :  { %v2575_v13 = vmul.f32 %v8159_v56, %v2538_v51  ;;  %v2576_v49 = vmul.f32 %v8157_v60, %v2542_v2  ;;  %v2577_v50 = vmul.f32 %v8163_v36, %v2546_v3  ;;  %v2578_v17 = vmul.f32 %v8167_v21, %v2550_v33 }
0x1132   :  { %v2579_v9 = vmul.f32 %v8161_v34, %v2554_v5  ;;  %v2580_v56 = vmul.f32 %v8169_v24, %v2558_v35  ;;  %v2581_v60 = vmul.f32 %v8165_v6, %v2562_v20  ;;  %v2582_v36 = vmul.f32 %v8171_v39, %v2566_v63  ;;  %v10360_v63 = vld [vmem:[#allocation16_spill] sm:$0xff] }
0x1133   :  { %2585 = vperm.xlu1 %8054, %v2575_v13  }
0x1137   :  { %2590 = vperm.xlu1 %8054, %v2576_v49  }
0x113b   :  { %2595 = vperm.xlu1 %8054, %v2577_v50   ;;  %v10359_v50 = vld [vmem:[#allocation15_spill] sm:$0xff] }
0x113f   :  { %2600 = vperm.xlu1 %8054, %v2578_v17  }
0x1143   :  { %2605 = vperm.xlu1 %8054, %v2579_v9  }
0x1147   :  { %2610 = vperm.xlu1 %8054, %v2580_v56  }
0x114b   :  { %2615 = vperm.xlu1 %8054, %v2581_v60  }
0x114f   :  { %2620 = vperm.xlu1 %8054, %v2582_v36  }
0x11b2   :  { %v2586_v42 = vpop.permute.xlu1 %2585 }
0x11b3   :  { %v2623_v34 = vmul.f32 %v10356_v31, %v2586_v42 }
0x11b5   :  { %v2631_v6 = vsel %vm92_vm1, %v2623_v34, 0.0 }
0x11b6   :  { %v2591_v61 = vpop.permute.xlu1 %2590  ;;  %v2632_v49 = vrot.slane %v2631_v6, 4 }
0x11b7   :  { %v2624_v21 = vmul.f32 %v9071_v47, %v2591_v61 }
0x11b8   :  { %v2633_v35 = vadd.f32 %v2632_v49, %v2631_v6 }
0x11b9   :  { %v2638_v24 = vsel %vm92_vm1, %v2624_v21, 0.0 }
0x11ba   :  { %v2596_v44 = vpop.permute.xlu1 %2595  ;;  %v2639_v39 = vrot.slane %v2638_v24, 4  ;;  %v2634_v31 = vrot.slane %v2633_v35, 2 }
0x11bb   :  { %v2625_v55 = vmul.f32 %v10357_v59, %v2596_v44 }
0x11bc   :  { %v2640_v17 = vadd.f32 %v2639_v39, %v2638_v24  ;;  %v10361_v24 = vld [vmem:[#allocation17_spill] sm:$0xff] }
0x11bd   :  { %v2645_v40 = vsel %vm92_vm1, %v2625_v55, 0.0 }
0x11be   :  { %v2601_v10 = vpop.permute.xlu1 %2600  ;;  %v2646_v13 = vrot.slane %v2645_v40, 4  ;;  %v2641_v42 = vrot.slane %v2640_v17, 2 }
0x11bf   :  { %v2626_v51 = vmul.f32 %v10358_v52, %v2601_v10 }
0x11c0   :  { %v2647_v5 = vadd.f32 %v2646_v13, %v2645_v40  ;;  %v2642_v52 = vadd.f32 %v2641_v42, %v2640_v17  ;;  %v2635_v13 = vadd.f32 %v2634_v31, %v2633_v35 }
0x11c1   :  { %v2652_v2 = vsel %vm92_vm1, %v2626_v51, 0.0 }
0x11c2   :  { %v2653_v47 = vrot.slane %v2652_v2, 4  ;;  %v2606_v3 = vpop.permute.xlu1 %2605  ;;  %v2648_v21 = vrot.slane %v2647_v5, 2 }
0x11c3   :  { %v2627_v33 = vmul.f32 %v10359_v50, %v2606_v3 }
0x11c4   :  { %v2654_v56 = vadd.f32 %v2653_v47, %v2652_v2  ;;  %v2649_v6 = vadd.f32 %v2648_v21, %v2647_v5 }
0x11c5   :  { %v2659_v9 = vsel %vm92_vm1, %v2627_v33, 0.0  ;;  %v10362_v33 = vld [vmem:[#allocation18_spill] sm:$0xff] }
0x11c6   :  { %v2660_v20 = vrot.slane %v2659_v9, 4  ;;  %v2611_v60 = vpop.permute.xlu1 %2610  ;;  %v2655_v34 = vrot.slane %v2654_v56, 2 }
0x11c7   :  { %v2628_v36 = vmul.f32 %v10360_v63, %v2611_v60 }
0x11c8   :  { %v2661_v61 = vadd.f32 %v2660_v20, %v2659_v9  ;;  %v2656_v2 = vadd.f32 %v2655_v34, %v2654_v56  ;;  %v2643_v20 = vrot.slane %v2642_v52, 1 }
0x11c9   :  { %v2666_v44 = vsel %vm92_vm1, %v2628_v36, 0.0  ;;  %v2650_v36 = vrot.slane %v2649_v6, 1 }
0x11ca   :  { %v2667_v59 = vrot.slane %v2666_v44, 4  ;;  %v2616_v55 = vpop.permute.xlu1 %2615  ;;  %v2662_v10 = vrot.slane %v2661_v61, 2  ;;  %v2657_v17 = vrot.slane %v2656_v2, 1 }
0x11cb   :  { %v2629_v40 = vmul.f32 %v10361_v24, %v2616_v55  ;;  %v2636_v55 = vrot.slane %v2635_v13, 1  ;;  %v2651_v34 = vadd.f32 %v2650_v36, %v2649_v6 }
0x11cc   :  { %v2668_v51 = vadd.f32 %v2667_v59, %v2666_v44  ;;  %v2663_v50 = vadd.f32 %v2662_v10, %v2661_v61  ;;  %v2644_v44 = vadd.f32 %v2643_v20, %v2642_v52  ;;  %v2658_v61 = vadd.f32 %v2657_v17, %v2656_v2 }
0x11cd   :  { %v2673_v39 = vsel %vm92_vm1, %v2629_v40, 0.0  ;;  %v2637_v59 = vadd.f32 %v2636_v55, %v2635_v13 }
0x11ce   :  { %v2669_v49 = vrot.slane %v2668_v51, 2  ;;  %v2674_v47 = vrot.slane %v2673_v39, 4  ;;  %v2621_v3 = vpop.permute.xlu1 %2620  ;;  %v2664_v21 = vrot.slane %v2663_v50, 1 }
0x11cf   :  { %v2630_v9 = vmul.f32 %v10362_v33, %v2621_v3 }
0x11d0   :  { %v2670_v60 = vadd.f32 %v2669_v49, %v2668_v51  ;;  %v2675_v63 = vadd.f32 %v2674_v47, %v2673_v39  ;;  %v2665_v40 = vadd.f32 %v2664_v21, %v2663_v50  ;;  %v2695_v51 = vsel %vm716_vm4, %v2644_v44, %v2637_v59  ;;  %v10363_v50 = vld [vmem:[#allocation7_spill] sm:$0xff] }
0x11d1   :  { %v2680_v45 = vsel %vm92_vm1, %v2630_v9, 0.0  ;;  %v2696_v47 = vsel %vm718_vm5, %v2651_v34, %v2695_v51 }
0x11d2   :  { %v2676_v42 = vrot.slane %v2675_v63, 2  ;;  %v2681_v5 = vrot.slane %v2680_v45, 4  ;;  %v2671_v35 = vrot.slane %v2670_v60, 1  ;;  %v2697_v33 = vsel %vm720_vm6, %v2658_v61, %v2696_v47 }
0x11d3   :  { %v2698_v52 = vsel %vm722_vm7, %v2665_v40, %v2697_v33 }
0x11d4   :  { %v2677_v56 = vadd.f32 %v2676_v42, %v2675_v63  ;;  %v2682_v31 = vadd.f32 %v2681_v5, %v2680_v45  ;;  %v2672_v39 = vadd.f32 %v2671_v35, %v2670_v60 }
0x11d6   :  { %v2678_v10 = vrot.slane %v2677_v56, 1  ;;  %v2683_v24 = vrot.slane %v2682_v31, 2  ;;  %v2699_v45 = vsel %vm724_vm8, %v2672_v39, %v2698_v52 }
0x11d8   :  { %v2684_v49 = vadd.f32 %v2683_v24, %v2682_v31  ;;  %v2679_v3 = vadd.f32 %v2678_v10, %v2677_v56 }
0x11da   :  { %v2685_v9 = vrot.slane %v2684_v49, 1  ;;  %v2700_v6 = vsel %vm726_vm9, %v2679_v3, %v2699_v45 }
0x11dc   :  { %v2686_v20 = vadd.f32 %v2685_v9, %v2684_v49 }
0x11de   :  { %v2701_v13 = vsel %vm728_vm10, %v2686_v20, %v2700_v6 }
0x11df   :  { %7579 = vmatmul.mubr.msk.f32.vlgmr.msra.gmra.mrb[18].mxu1 %vm92_vm1, %v2701_v13  ;;  %2876 = vst.msk [vmem:[#allocation3 + $0x10] sm:$0xff] %vm92_vm1, %v2701_v13 }
0x11e0   :  { %7912 = vmatpush3.bf16.msra.mxu1 %v8552_v12  ;;  %7600 = vmatprep.mubr.msk.f32.mxu1 %vm8423_vm3, %v10346_v57 }
0x11e1   :  { %7913 = vmatprep.subr.bf16.mxu1 %v10345_v16 }
0x11e4   :  { %7915 = vmatpush3.bf16.msra.mxu1 %v8587_v23 }
0x11e5   :  { %7922 = vmatprep.subr.bf16.mxu1 %v10345_v16 }
0x12b2   :  { %v2770_v2 = vpop.f32.mrb[18].mxu1 }
0x12b3   :  { %v2774_v60 = vadd.f32 %v2770_v2, %v10363_v50  ;;  %v7580_v63 = vpop.f32.mrb[19].mxu1 }
0x12b5   :  { %v2845_v36 = vadd.f32 %v9179_v46, %v2774_v60 }
0x12b7   :  { %8174 = vtanh.f32 %v2845_v36  ;;  %v7191_v17 = vmul.f32 -1.442695, %v2845_v36 }
0x12b9   :  { %8176 = vpow2.f32 %v7191_v17 }
0x12c1   :  { %v8175_v55 = vpop.eup %8174 }
0x12c2   :  { %2855 = vrot.lane.b32.xlu0 %v8175_v55, %s8427_s10 }
0x12c3   :  { %v8177_v42 = vpop.eup %8176 }
0x12c4   :  { %v2849_v5 = vadd.f32 1.0, %v8177_v42 }
0x12c6   :  { %8178 = vrcp.f32 %v2849_v5 }
0x12d0   :  { %v8179_v21 = vpop.eup %8178 }
0x12d1   :  { %v2853_v56 = vmul.f32 %v8179_v21, %v9144_v29 }
0x1334   :  { %v2856_v44 = vpop.permute.xlu0 %2855 }
0x1335   :  { %v2858_v35 = vmul.f32 %v8179_v21, %v2856_v44 }
0x1337   :  { %2860 = vrot.lane.b32.xlu1 %v2858_v35, %s8428_s12 }
0x13a9   :  { %v2861_v31 = vpop.permute.xlu1 %2860 }
0x13aa   :  { %v9316_v34 = vadd.f32 %v2861_v31, %v2853_v56 }
0x13ac   :  { %8180 = vtanh.f32 %v9316_v34 }
0x13b6   :  { %v8181_v46 = vpop.eup %8180 }
0x13b7   :  { %2866 = vrot.lane.b32.xlu1 %v8181_v46, %s8427_s10 }
0x1429   :  { %v2867_v59 = vpop.permute.xlu1 %2866 }
0x142a   :  { %v2869_v61 = vmul.f32 %v8179_v21, %v2867_v59 }
0x142c   :  { %2871 = vrot.lane.b32.xlu1 %v2869_v61, %s8428_s12 }
0x1430   :  { %2878 = vrot.lane.b32.xlu1 %v9316_v34, %s8429_s5 }
0x149e   :  { %v2872_v10 = vpop.permute.xlu1 %2871 }
0x149f   :  { %2874 = vst.msk [vmem:[#allocation2 + $0x10] sm:$0xff] %vm92_vm1, %v2872_v10  ;;  %7612 = vmatmul.mubr.msk.f32.vlgmr.msra.gmra.mrb[20].mxu0 %vm92_vm1, %v2872_v10 }
0x14a0   :  { %7930 = vmatpush3.bf16.msra.mxu0 %v8877_v58  ;;  %7633 = vmatprep.mubr.msk.f32.mxu0 %vm8423_vm3, %v10346_v57 }
0x14a1   :  { %7931 = vmatprep.subr.bf16.mxu0 %v10345_v16 }
0x14a2   :  { %v2879_v29 = vpop.permute.xlu1 %2878 }
0x14a3   :  { %7601 = vmatmul.mubr.msk.f32.vlgmr.msra.gmra.mrb[20].mxu1 %vm92_vm1, %v2879_v29 }
0x14a4   :  { %7933 = vmatpush3.bf16.msra.mxu0 %v8893_v48  ;;  %7924 = vmatpush3.bf16.msra.mxu1 %v8866_v54 }
0x14a5   :  { %7925 = vmatprep.subr.bf16.mxu1 %v10345_v16  ;;  %7622 = vmatprep.mubr.msk.f32.mxu1 %vm8423_vm3, %v10346_v57 }
0x14a6   :  { %7940 = vmatprep.subr.bf16.mxu0 %v10345_v16 }
0x14a7   :  { %7634 = vmatmul.mubr.msk.f32.vlgmr.msra.gmra.mrb[22].mxu0 %vm92_vm1, %v2872_v10 }
0x14a8   :  { %7927 = vmatpush3.bf16.msra.mxu1 %v8889_v1  ;;  %7942 = vmatpush3.bf16.msra.mxu0 %v8584_v22 }
0x14a9   :  { %7943 = vmatprep.subr.bf16.mxu0 %v10345_v16  ;;  %7934 = vmatprep.subr.bf16.mxu1 %v10345_v16 }
0x14aa   :  { %7655 = vmatprep.mubr.msk.f32.mxu0 %vm8423_vm3, %v10346_v57 }
0x14ac   :  { %7945 = vmatpush3.bf16.msra.mxu0 %v8620_v30 }
0x14ad   :  { %7952 = vmatprep.subr.bf16.mxu0 %v10345_v16 }
0x1572   :  { %v3020_v24 = vpop.f32.mrb[20].mxu0 }
0x1573   :  { %v7613_v40 = vpop.f32.mrb[21].mxu0 }
0x1576   :  { %v2948_v51 = vpop.f32.mrb[20].mxu1 }
0x1577   :  { %v3021_v39 = vadd.f32 %v3020_v24, %v2948_v51  ;;  %v7602_v49 = vpop.f32.mrb[21].mxu1 }
0x1579   :  { %v3024_v47 = vadd.f32 %v9176_v37, %v3021_v39 }
0x157a   :  { %v9346_v3 = vpop.f32.mrb[22].mxu0 }
0x157b   :  { %v3026_v33 = vcombine.high %v3024_v47, %v3024_v47  ;;  %v3033_v9 = vrot.slane %v3024_v47, %v8706_v7  ;;  %v7635_v52 = vpop.f32.mrb[23].mxu0 }
0x157d   :  { %v3040_v20 = vrot.slane %v3026_v33, %v8706_v7  ;;  %v3041_v45 = vcombine.high %v3033_v9, %v3033_v9  ;;  %v3049_v6 = vrot.slane %v3033_v9, %v8706_v7 }
0x157f   :  { %v3042_v13 = vcombine.high %v3040_v20, %v3040_v20  ;;  %v3056_v2 = vrot.slane %v3040_v20, %v8706_v7  ;;  %v3063_v50 = vrot.slane %v3041_v45, %v8706_v7  ;;  %v3071_v60 = vcombine.high %v3049_v6, %v3049_v6 }
0x1580   :  { %v3078_v63 = vrot.slane %v3049_v6, %v8714_v14 }
0x1581   :  { %v3070_v37 = vrot.slane %v3042_v13, %v8706_v7  ;;  %v3073_v36 = vcombine.high %v3063_v50, %v3063_v50  ;;  %v3082_v55 = vrot.slane %v3063_v50, %v8714_v14  ;;  %v3072_v17 = vcombine.high %v3056_v2, %v3056_v2 }
0x1582   :  { %v3086_v42 = vrot.slane %v3071_v60, %v8714_v14  ;;  %v3094_v5 = vrot.slane %v3056_v2, %v8714_v14  ;;  %v3115_v21 = vadd.f32 %v3078_v63, %v8722_v28 }
0x1583   :  { %v3074_v44 = vcombine.high %v3070_v37, %v3070_v37  ;;  %v3090_v35 = vrot.slane %v3073_v36, %v8714_v14  ;;  %v3098_v56 = vrot.slane %v3070_v37, %v8714_v14  ;;  %v3116_v31 = vadd.f32 %v3082_v55, %v8718_v19 }
0x1584   :  { %v3117_v46 = vadd.f32 %v3086_v42, %v8726_v38  ;;  %v3119_v59 = vadd.f32 %v3094_v5, %v8731_v53  ;;  %8182 = vtanh.f32 %v3115_v21  ;;  %v3102_v29 = vrot.slane %v3072_v17, %v8714_v14 }
0x1585   :  { %v3106_v61 = vrot.slane %v3074_v44, %v8714_v14  ;;  %v3118_v10 = vadd.f32 %v3090_v35, %v8724_v32  ;;  %v3120_v24 = vadd.f32 %v3098_v56, %v8742_v4  ;;  %8184 = vtanh.f32 %v3116_v31 }
0x1586   :  { %8186 = vtanh.f32 %v3117_v46  ;;  %v3121_v51 = vadd.f32 %v3102_v29, %v8745_v8 }
0x1587   :  { %8188 = vtanh.f32 %v3119_v59  ;;  %v3122_v40 = vadd.f32 %v3106_v61, %v8750_v15 }
0x1588   :  { %8190 = vtanh.f32 %v3118_v10 }
0x1589   :  { %8192 = vtanh.f32 %v3120_v24 }
0x158a   :  { %8194 = vtanh.f32 %v3122_v40 }
0x158b   :  { %8196 = vtanh.f32 %v3121_v51 }
0x158e   :  { %v8183_v39 = vpop.eup %8182 }
0x158f   :  { %v3131_v49 = vmul.f32 %v9206_v25, %v8183_v39  ;;  %v8185_v47 = vpop.eup %8184 }
0x1590   :  { %v8187_v33 = vpop.eup %8186  ;;  %v3132_v52 = vmul.f32 %v9206_v25, %v8185_v47 }
0x1591   :  { %v3139_v9 = vsel %vm92_vm1, %v3131_v49, 0.0  ;;  %v8189_v20 = vpop.eup %8188  ;;  %v3133_v13 = vmul.f32 %v9206_v25, %v8187_v33 }
0x1592   :  { %3140 = vadd.xlane.f32.xlu1 %v3139_v9  ;;  %v8191_v45 = vpop.eup %8190  ;;  %v3142_v6 = vsel %vm92_vm1, %v3132_v52, 0.0  ;;  %v3135_v55 = vmul.f32 %v9206_v25, %v8189_v20 }
0x1593   :  { %v8193_v2 = vpop.eup %8192  ;;  %3143 = vadd.xlane.f32.xlu0 %v3142_v6  ;;  %v3134_v50 = vmul.f32 %v9206_v25, %v8191_v45  ;;  %v3145_v36 = vsel %vm92_vm1, %v3133_v13, 0.0 }
0x1594   :  { %v3136_v63 = vmul.f32 %v9206_v25, %v8193_v2  ;;  %v8195_v37 = vpop.eup %8194  ;;  %v3151_v21 = vsel %vm92_vm1, %v3135_v55, 0.0 }
0x1595   :  { %v3148_v60 = vsel %vm92_vm1, %v3134_v50, 0.0  ;;  %v8197_v17 = vpop.eup %8196  ;;  %v3138_v5 = vmul.f32 %v9206_v25, %v8195_v37 }
0x1596   :  { %3149 = vadd.xlane.f32.xlu1 %v3148_v60  ;;  %v3154_v42 = vsel %vm92_vm1, %v3136_v63, 0.0  ;;  %v3137_v44 = vmul.f32 %v9206_v25, %v8197_v17 }
0x1597   :  { %3146 = vadd.xlane.f32.xlu0 %v3145_v36  ;;  %v3160_v35 = vsel %vm92_vm1, %v3138_v5, 0.0 }
0x1598   :  { %v3157_v56 = vsel %vm92_vm1, %v3137_v44, 0.0 }
0x159a   :  { %3155 = vadd.xlane.f32.xlu1 %v3154_v42 }
0x159b   :  { %3152 = vadd.xlane.f32.xlu0 %v3151_v21 }
0x159e   :  { %3161 = vadd.xlane.f32.xlu1 %v3160_v35 }
0x159f   :  { %3158 = vadd.xlane.f32.xlu0 %v3157_v56 }
0x161f   :  { %v3141_v31 = vpop.xlane.xlu1 %3140 }
0x1620   :  { %v3144_v46 = vpop.xlane.xlu0 %3143  ;;  %v3163_v61 = vadd.f32 %v3141_v31, %v8778_v11 }
0x1621   :  { %v3164_v59 = vadd.f32 %v3144_v46, %v8778_v11 }
0x1622   :  { %v3182_v25 = vrot.slane %v3163_v61, %v8781_v0 }
0x1623   :  { %v3150_v10 = vpop.xlane.xlu1 %3149  ;;  %v3186_v29 = vrot.slane %v3164_v59, %v8781_v0 }
0x1624   :  { %v3147_v24 = vpop.xlane.xlu0 %3146  ;;  %v3166_v51 = vadd.f32 %v3150_v10, %v8778_v11 }
0x1625   :  { %v3165_v40 = vadd.f32 %v3147_v24, %v8778_v11  ;;  %v3211_v47 = vsel %vm716_vm4, %v3186_v29, %v3182_v25 }
0x1626   :  { %v3194_v20 = vrot.slane %v3166_v51, %v8781_v0 }
0x1627   :  { %v3190_v39 = vrot.slane %v3165_v40, %v8781_v0  ;;  %v3156_v49 = vpop.xlane.xlu1 %3155 }
0x1628   :  { %v3153_v33 = vpop.xlane.xlu0 %3152  ;;  %v3168_v45 = vadd.f32 %v3156_v49, %v8778_v11 }
0x1629   :  { %v3212_v9 = vsel %vm718_vm5, %v3190_v39, %v3211_v47  ;;  %v3167_v52 = vadd.f32 %v3153_v33, %v8778_v11 }
0x162a   :  { %v3213_v60 = vsel %vm720_vm6, %v3194_v20, %v3212_v9  ;;  %v3202_v36 = vrot.slane %v3168_v45, %v8781_v0 }
0x162b   :  { %v3198_v6 = vrot.slane %v3167_v52, %v8781_v0  ;;  %v3162_v13 = vpop.xlane.xlu1 %3161 }
0x162c   :  { %v3170_v2 = vadd.f32 %v3162_v13, %v8778_v11  ;;  %v3159_v50 = vpop.xlane.xlu0 %3158 }
0x162d   :  { %v3169_v63 = vadd.f32 %v3159_v50, %v8778_v11  ;;  %v3214_v37 = vsel %vm722_vm7, %v3198_v6, %v3213_v60  ;;  %v10364_v50 = vld [vmem:[#allocation11_spill] sm:$0xff] }
0x162e   :  { %v3210_v17 = vrot.slane %v3170_v2, %v8781_v0  ;;  %v3215_v42 = vsel %vm724_vm8, %v3202_v36, %v3214_v37 }
0x162f   :  { %v3206_v55 = vrot.slane %v3169_v63, %v8781_v0 }
0x1631   :  { %v3216_v5 = vsel %vm726_vm9, %v3206_v55, %v3215_v42 }
0x1632   :  { %v3217_v21 = vsel %vm728_vm10, %v3210_v17, %v3216_v5 }
0x1633   :  { %v3219_v44 = vsel %vm731_vm11, %v3217_v21, -inf }
0x1634   :  { %3220 = vmax.xlane.f32.xlu0 %v3219_v44 }
0x16c1   :  { %v3221_v35 = vpop.xlane.xlu0 %3220 }
0x16c2   :  { %v3226_v56 = vrot.slane %v3221_v35, %v8714_v14  ;;  %v3230_v31 = vrot.slane %v3221_v35, %v8808_v27  ;;  %v3234_v46 = vrot.slane %v3221_v35, %v8811_v41  ;;  %v3238_v10 = vrot.slane %v3221_v35, %v8814_v43 }
0x16c3   :  { %v3242_v25 = vrot.slane %v3221_v35, %v8820_v62  ;;  %v3246_v47 = vrot.slane %v3221_v35, %v8824_v18  ;;  %v3250_v20 = vrot.slane %v3221_v35, %v8828_v26  ;;  %v3254_v60 = vrot.slane %v3221_v35, %v10364_v50 }
0x16c4   :  { %v3263_v29 = vsub.f32 %v3163_v61, %v3226_v56  ;;  %v3265_v24 = vsub.f32 %v3165_v40, %v3234_v46  ;;  %v3264_v39 = vsub.f32 %v3164_v59, %v3230_v31  ;;  %v3266_v33 = vsub.f32 %v3166_v51, %v3238_v10 }
0x16c5   :  { %v3267_v13 = vsub.f32 %v3167_v52, %v3242_v25  ;;  %v3268_v37 = vsub.f32 %v3168_v45, %v3246_v47  ;;  %v3269_v40 = vsub.f32 %v3169_v63, %v3250_v20  ;;  %v3270_v55 = vsub.f32 %v3170_v2, %v3254_v60 }
0x16c6   :  { %v3271_v49 = vmul.f32 1.442695, %v3263_v29  ;;  %v3275_v9 = vmul.f32 1.442695, %v3265_v24  ;;  %v3273_v6 = vmul.f32 1.442695, %v3264_v39 }
0x16c7   :  { %v3277_v36 = vmul.f32 1.442695, %v3266_v33  ;;  %v3279_v61 = vmul.f32 1.442695, %v3267_v13  ;;  %v3281_v59 = vmul.f32 1.442695, %v3268_v37 }
0x16c8   :  { %8198 = vpow2.f32 %v3271_v49  ;;  %v3283_v17 = vmul.f32 1.442695, %v3269_v40  ;;  %v3285_v42 = vmul.f32 1.442695, %v3270_v55 }
0x16c9   :  { %8200 = vpow2.f32 %v3275_v9 }
0x16ca   :  { %8202 = vpow2.f32 %v3273_v6 }
0x16cb   :  { %8204 = vpow2.f32 %v3277_v36 }
0x16cc   :  { %8206 = vpow2.f32 %v3279_v61 }
0x16cd   :  { %8208 = vpow2.f32 %v3281_v59 }
0x16ce   :  { %8210 = vpow2.f32 %v3283_v17 }
0x16cf   :  { %8212 = vpow2.f32 %v3285_v42 }
0x16d2   :  { %v8199_v51 = vpop.eup %8198 }
0x16d3   :  { %3296 = vperm.xlu1 %8054, %v8199_v51   ;;  %v8201_v5 = vpop.eup %8200 }
0x16d4   :  { %v8203_v52 = vpop.eup %8202 }
0x16d5   :  { %3299 = vperm.xlu0 %8055, %v8203_v52   ;;  %v8205_v45 = vpop.eup %8204 }
0x16d6   :  { %v8207_v21 = vpop.eup %8206 }
0x16d7   :  { %3302 = vperm.xlu1 %8054, %v8201_v5   ;;  %v8209_v63 = vpop.eup %8208 }
0x16d8   :  { %v8211_v2 = vpop.eup %8210 }
0x16d9   :  { %3308 = vperm.xlu0 %8055, %v8207_v21   ;;  %v8213_v44 = vpop.eup %8212 }
0x16db   :  { %3305 = vperm.xlu1 %8054, %v8205_v45  }
0x16dd   :  { %3314 = vperm.xlu0 %8055, %v8211_v2  }
0x16df   :  { %3311 = vperm.xlu1 %8054, %v8209_v63  }
0x16e3   :  { %3317 = vperm.xlu1 %8054, %v8213_v44  }
0x1752   :  { %v3297_v35 = vpop.permute.xlu1 %3296 }
0x1753   :  { %v3322_v46 = vrot.slane %v3297_v35, %v8781_v0 }
0x1754   :  { %v3300_v31 = vpop.permute.xlu0 %3299 }
0x1755   :  { %v3326_v10 = vrot.slane %v3300_v31, %v8781_v0 }
0x1756   :  { %v3303_v56 = vpop.permute.xlu1 %3302 }
0x1757   :  { %v3330_v29 = vrot.slane %v3303_v56, %v8781_v0  ;;  %v3351_v25 = vsel %vm716_vm4, %v3326_v10, %v3322_v46 }
0x1758   :  { %v3309_v39 = vpop.permute.xlu0 %3308 }
0x1759   :  { %v3352_v47 = vsel %vm718_vm5, %v3330_v29, %v3351_v25  ;;  %v3338_v9 = vrot.slane %v3309_v39, %v8781_v0 }
0x175a   :  { %v3306_v24 = vpop.permute.xlu1 %3305 }
0x175b   :  { %v3334_v49 = vrot.slane %v3306_v24, %v8781_v0 }
0x175c   :  { %v3315_v6 = vpop.permute.xlu0 %3314 }
0x175d   :  { %v3353_v33 = vsel %vm720_vm6, %v3334_v49, %v3352_v47  ;;  %v3346_v36 = vrot.slane %v3315_v6, %v8781_v0 }
0x175e   :  { %v3312_v20 = vpop.permute.xlu1 %3311  ;;  %v3354_v60 = vsel %vm722_vm7, %v3338_v9, %v3353_v33 }
0x175f   :  { %v3342_v13 = vrot.slane %v3312_v20, %v8781_v0 }
0x1761   :  { %v3355_v37 = vsel %vm724_vm8, %v3342_v13, %v3354_v60 }
0x1762   :  { %v3318_v61 = vpop.permute.xlu1 %3317  ;;  %v3356_v55 = vsel %vm726_vm9, %v3346_v36, %v3355_v37 }
0x1763   :  { %v3350_v40 = vrot.slane %v3318_v61, %v8781_v0 }
0x1765   :  { %v3357_v59 = vsel %vm728_vm10, %v3350_v40, %v3356_v55 }
0x1766   :  { %v3359_v17 = vsel %vm731_vm11, %v3357_v59, 0.0  ;;  %v9466_v59 = vld [vmem:[%s10291_s0 + $0x18] sm:$0xff] }
0x1767   :  { %3360 = vadd.xlane.f32.xlu0 %v3359_v17  ;;  %10367 = vst [vmem:[#allocation13_spill] sm:$0xff] %v9466_v59 }
0x17f4   :  { %v3361_v42 = vpop.xlane.xlu0 %3360 }
0x17f5   :  { %8214 = vrcp.f32 %v3361_v42 }
0x17ff   :  { %v8215_v35 = vpop.eup %8214 }
0x1800   :  { %v3367_v56 = vrot.slane %v8215_v35, %v8714_v14  ;;  %v3371_v46 = vrot.slane %v8215_v35, %v8808_v27  ;;  %v3375_v29 = vrot.slane %v8215_v35, %v8811_v41  ;;  %v3379_v25 = vrot.slane %v8215_v35, %v8814_v43 }
0x1801   :  { %v3383_v49 = vrot.slane %v8215_v35, %v8820_v62  ;;  %v3387_v33 = vrot.slane %v8215_v35, %v8824_v18  ;;  %v3391_v9 = vrot.slane %v8215_v35, %v8828_v26  ;;  %v3395_v20 = vrot.slane %v8215_v35, %v10364_v50 }
0x1802   :  { %v3404_v31 = vmul.f32 %v8199_v51, %v3367_v56  ;;  %v3405_v10 = vmul.f32 %v8203_v52, %v3371_v46  ;;  %v3406_v24 = vmul.f32 %v8201_v5, %v3375_v29  ;;  %v3407_v39 = vmul.f32 %v8205_v45, %v3379_v25  ;;  %v9445_v45 = vld [vmem:[%s10291_s0 + $0x8] sm:$0xff]  ;;  %v9473_v29 = vld [vmem:[%s10291_s0 + $0x20] sm:$0xff] }
0x1803   :  { %v3408_v47 = vmul.f32 %v8207_v21, %v3383_v49  ;;  %v3409_v51 = vmul.f32 %v8209_v63, %v3387_v33  ;;  %v3410_v52 = vmul.f32 %v8211_v2, %v3391_v9  ;;  %v3411_v5 = vmul.f32 %v8213_v44, %v3395_v20  ;;  %v9451_v63 = vld [vmem:[%s10291_s0] sm:$0xff]  ;;  %v9457_v44 = vld [vmem:[%s10291_s0 + $0x10] sm:$0xff]  ;;  %10368 = vst [vmem:[#allocation14_spill] sm:$0xff] %v9473_v29 }
0x1804   :  { %3414 = vperm.xlu1 %8054, %v3404_v31   ;;  %10365 = vst [vmem:[#allocation5_spill] sm:$0xff] %v9451_v63  ;;  %10366 = vst [vmem:[#allocation12_spill] sm:$0xff] %v9457_v44 }
0x1808   :  { %3419 = vperm.xlu1 %8054, %v3405_v10  }
0x180c   :  { %3424 = vperm.xlu1 %8054, %v3406_v24  }
0x1810   :  { %3429 = vperm.xlu1 %8054, %v3407_v39  }
0x1814   :  { %3434 = vperm.xlu1 %8054, %v3408_v47  }
0x1818   :  { %3439 = vperm.xlu1 %8054, %v3409_v51  }
0x181c   :  { %3444 = vperm.xlu1 %8054, %v3410_v52   ;;  %v9480_v52 = vld [vmem:[%s10291_s0 + $0x28] sm:$0xff] }
0x181d   :  { %10369 = vst [vmem:[#allocation15_spill] sm:$0xff] %v9480_v52 }
0x1820   :  { %3449 = vperm.xlu1 %8054, %v3411_v5  }
0x1883   :  { %v3415_v6 = vpop.permute.xlu1 %3414 }
0x1884   :  { %v3452_v2 = vmul.f32 %v9451_v63, %v3415_v6 }
0x1886   :  { %v3460_v55 = vsel %vm92_vm1, %v3452_v2, 0.0 }
0x1887   :  { %v3420_v13 = vpop.permute.xlu1 %3419  ;;  %v3461_v31 = vrot.slane %v3460_v55, 4 }
0x1888   :  { %v3453_v21 = vmul.f32 %v9445_v45, %v3420_v13 }
0x1889   :  { %v3462_v47 = vadd.f32 %v3461_v31, %v3460_v55 }
0x188a   :  { %v3467_v36 = vsel %vm92_vm1, %v3453_v21, 0.0 }
0x188b   :  { %v3425_v60 = vpop.permute.xlu1 %3424  ;;  %v3468_v42 = vrot.slane %v3467_v36, 4 }
0x188c   :  { %v3454_v37 = vmul.f32 %v9457_v44, %v3425_v60  ;;  %v3463_v60 = vrot.slane %v3462_v47, 2 }
0x188d   :  { %v3469_v25 = vadd.f32 %v3468_v42, %v3467_v36 }
0x188e   :  { %v3474_v61 = vsel %vm92_vm1, %v3454_v37, 0.0  ;;  %v3464_v31 = vadd.f32 %v3463_v60, %v3462_v47 }
0x188f   :  { %v3430_v40 = vpop.permute.xlu1 %3429  ;;  %v3475_v35 = vrot.slane %v3474_v61, 4  ;;  %v3470_v5 = vrot.slane %v3469_v25, 2 }
0x1890   :  { %v3455_v17 = vmul.f32 %v9466_v59, %v3430_v40  ;;  %v9487_v40 = vld [vmem:[%s10291_s0 + $0x30] sm:$0xff] }
0x1891   :  { %v3476_v39 = vadd.f32 %v3475_v35, %v3474_v61  ;;  %10370 = vst [vmem:[#allocation16_spill] sm:$0xff] %v9487_v40 }
0x1892   :  { %v3481_v56 = vsel %vm92_vm1, %v3455_v17, 0.0  ;;  %v3471_v17 = vadd.f32 %v3470_v5, %v3469_v25 }
0x1893   :  { %v3482_v46 = vrot.slane %v3481_v56, 4  ;;  %v3435_v10 = vpop.permute.xlu1 %3434  ;;  %v3477_v13 = vrot.slane %v3476_v39, 2 }
0x1894   :  { %v3456_v24 = vmul.f32 %v9473_v29, %v3435_v10 }
0x1895   :  { %v3483_v33 = vadd.f32 %v3482_v46, %v3481_v56  ;;  %v3478_v35 = vadd.f32 %v3477_v13, %v3476_v39  ;;  %v3465_v13 = vrot.slane %v3464_v31, 1 }
0x1896   :  { %v3488_v49 = vsel %vm92_vm1, %v3456_v24, 0.0 }
0x1897   :  { %v3489_v51 = vrot.slane %v3488_v49, 4  ;;  %v3440_v9 = vpop.permute.xlu1 %3439  ;;  %v3484_v2 = vrot.slane %v3483_v33, 2  ;;  %v3479_v5 = vrot.slane %v3478_v35, 1 }
0x1898   :  { %v3457_v20 = vmul.f32 %v9480_v52, %v3440_v9  ;;  %v9494_v9 = vld [vmem:[%s10291_s0 + $0x38] sm:$0xff]  ;;  %v3472_v52 = vrot.slane %v3471_v17, 1 }
0x1899   :  { %v3490_v6 = vadd.f32 %v3489_v51, %v3488_v49  ;;  %v3485_v46 = vadd.f32 %v3484_v2, %v3483_v33  ;;  %10371 = vst [vmem:[#allocation17_spill] sm:$0xff] %v9494_v9 }
0x189a   :  { %v3495_v21 = vsel %vm92_vm1, %v3457_v20, 0.0  ;;  %v3473_v2 = vadd.f32 %v3472_v52, %v3471_v17 }
0x189b   :  { %v3496_v37 = vrot.slane %v3495_v21, 4  ;;  %v3445_v36 = vpop.permute.xlu1 %3444  ;;  %v3491_v61 = vrot.slane %v3490_v6, 2  ;;  %v3486_v47 = vrot.slane %v3485_v46, 1 }
0x189c   :  { %v3458_v55 = vmul.f32 %v9487_v40, %v3445_v36  ;;  %v3466_v40 = vadd.f32 %v3465_v13, %v3464_v31 }
0x189d   :  { %v3497_v42 = vadd.f32 %v3496_v37, %v3495_v21  ;;  %v3492_v51 = vadd.f32 %v3491_v61, %v3490_v6  ;;  %v3487_v29 = vadd.f32 %v3486_v47, %v3485_v46 }
0x189e   :  { %v3502_v56 = vsel %vm92_vm1, %v3458_v55, 0.0  ;;  %v3480_v55 = vadd.f32 %v3479_v5, %v3478_v35 }
0x189f   :  { %v3498_v10 = vrot.slane %v3497_v42, 2  ;;  %v3503_v24 = vrot.slane %v3502_v56, 4  ;;  %v3450_v49 = vpop.permute.xlu1 %3449  ;;  %v3493_v60 = vrot.slane %v3492_v51, 1 }
0x18a0   :  { %v3459_v20 = vmul.f32 %v9494_v9, %v3450_v49 }
0x18a1   :  { %v3499_v36 = vadd.f32 %v3498_v10, %v3497_v42  ;;  %v3504_v25 = vadd.f32 %v3503_v24, %v3502_v56  ;;  %v3494_v9 = vadd.f32 %v3493_v60, %v3492_v51  ;;  %v3524_v42 = vsel %vm716_vm4, %v3473_v2, %v3466_v40 }
0x18a2   :  { %v3509_v39 = vsel %vm92_vm1, %v3459_v20, 0.0  ;;  %v3525_v24 = vsel %vm718_vm5, %v3480_v55, %v3524_v42 }
0x18a3   :  { %v3505_v33 = vrot.slane %v3504_v25, 2  ;;  %v3510_v21 = vrot.slane %v3509_v39, 4  ;;  %v3500_v6 = vrot.slane %v3499_v36, 1  ;;  %v3526_v44 = vsel %vm720_vm6, %v3487_v29, %v3525_v24 }
0x18a4   :  { %v3527_v52 = vsel %vm722_vm7, %v3494_v9, %v3526_v44  ;;  %v10372_v44 = vld [vmem:[#allocation6_spill] sm:$0xff] }
0x18a5   :  { %v3506_v37 = vadd.f32 %v3505_v33, %v3504_v25  ;;  %v3511_v61 = vadd.f32 %v3510_v21, %v3509_v39  ;;  %v3501_v56 = vadd.f32 %v3500_v6, %v3499_v36 }
0x18a7   :  { %v3507_v59 = vrot.slane %v3506_v37, 1  ;;  %v3512_v49 = vrot.slane %v3511_v61, 2  ;;  %v3528_v35 = vsel %vm724_vm8, %v3501_v56, %v3527_v52  ;;  %v9550_v56 = vld [vmem:[%s10296_s4] ss:$0 sm:$0xff] }
0x18a9   :  { %v3513_v10 = vadd.f32 %v3512_v49, %v3511_v61  ;;  %v3508_v20 = vadd.f32 %v3507_v59, %v3506_v37 }
0x18ab   :  { %v3514_v63 = vrot.slane %v3513_v10, 1  ;;  %v3529_v31 = vsel %vm726_vm9, %v3508_v20, %v3528_v35 }
0x18ad   :  { %v3515_v17 = vadd.f32 %v3514_v63, %v3513_v10 }
0x18af   :  { %v3530_v46 = vsel %vm728_vm10, %v3515_v17, %v3529_v31 }
0x18b0   :  { %7623 = vmatmul.mubr.msk.f32.vlgmr.msra.gmra.mrb[22].mxu1 %vm92_vm1, %v3530_v46  ;;  %3705 = vst.msk [vmem:[#allocation3 + $0x18] sm:$0xff] %vm92_vm1, %v3530_v46 }
0x18b1   :  { %7936 = vmatpush3.bf16.msra.mxu1 %v8552_v12  ;;  %7644 = vmatprep.mubr.msk.f32.mxu1 %vm8423_vm3, %v10346_v57 }
0x18b2   :  { %7937 = vmatprep.subr.bf16.mxu1 %v10345_v16 }
0x18b5   :  { %7939 = vmatpush3.bf16.msra.mxu1 %v8587_v23 }
0x18b6   :  { %7946 = vmatprep.subr.bf16.mxu1 %v10345_v16 }
0x1983   :  { %v3599_v63 = vpop.f32.mrb[22].mxu1 }
0x1984   :  { %v3603_v59 = vadd.f32 %v3599_v63, %v10372_v44  ;;  %v7624_v29 = vpop.f32.mrb[23].mxu1 }
0x1986   :  { %v3674_v40 = vadd.f32 %v9346_v3, %v3603_v59 }
0x1988   :  { %8216 = vtanh.f32 %v3674_v40  ;;  %v7196_v9 = vmul.f32 -1.442695, %v3674_v40 }
0x198a   :  { %8218 = vpow2.f32 %v7196_v9 }
0x1992   :  { %v8217_v51 = vpop.eup %8216 }
0x1993   :  { %3684 = vrot.lane.b32.xlu0 %v8217_v51, %s8427_s10 }
0x1994   :  { %v8219_v36 = vpop.eup %8218 }
0x1995   :  { %v3678_v25 = vadd.f32 1.0, %v8219_v36 }
0x1997   :  { %8220 = vrcp.f32 %v3678_v25 }
0x19a1   :  { %v8221_v5 = vpop.eup %8220 }
0x19a2   :  { %v3682_v47 = vmul.f32 %v8221_v5, %v9316_v34 }
0x1a05   :  { %v3685_v39 = vpop.permute.xlu0 %3684 }
0x1a06   :  { %v3687_v13 = vmul.f32 %v8221_v5, %v3685_v39 }
0x1a08   :  { %3689 = vrot.lane.b32.xlu1 %v3687_v13, %s8428_s12 }
0x1a7a   :  { %v3690_v33 = vpop.permute.xlu1 %3689 }
0x1a7b   :  { %v9518_v21 = vadd.f32 %v3690_v33, %v3682_v47 }
0x1a7d   :  { %8222 = vtanh.f32 %v9518_v21 }
0x1a87   :  { %v8223_v3 = vpop.eup %8222 }
0x1a88   :  { %3695 = vrot.lane.b32.xlu1 %v8223_v3, %s8427_s10 }
0x1afa   :  { %v3696_v60 = vpop.permute.xlu1 %3695 }
0x1afb   :  { %v3698_v2 = vmul.f32 %v8221_v5, %v3696_v60 }
0x1afd   :  { %3700 = vrot.lane.b32.xlu1 %v3698_v2, %s8428_s12 }
0x1b01   :  { %3707 = vrot.lane.b32.xlu1 %v9518_v21, %s8429_s5 }
0x1b6f   :  { %v3701_v6 = vpop.permute.xlu1 %3700 }
0x1b70   :  { %3703 = vst.msk [vmem:[#allocation2 + $0x18] sm:$0xff] %vm92_vm1, %v3701_v6  ;;  %7656 = vmatmul.mubr.msk.f32.vlgmr.msra.gmra.mrb[24].mxu0 %vm92_vm1, %v3701_v6 }
0x1b71   :  { %7954 = vmatpush3.bf16.msra.mxu0 %v8877_v58  ;;  %7677 = vmatprep.mubr.msk.f32.mxu0 %vm8423_vm3, %v10346_v57 }
0x1b72   :  { %7955 = vmatprep.subr.bf16.mxu0 %v10345_v16 }
0x1b73   :  { %v3708_v34 = vpop.permute.xlu1 %3707 }
0x1b74   :  { %7645 = vmatmul.mubr.msk.f32.vlgmr.msra.gmra.mrb[24].mxu1 %vm92_vm1, %v3708_v34 }
0x1b75   :  { %7957 = vmatpush3.bf16.msra.mxu0 %v8893_v48  ;;  %7948 = vmatpush3.bf16.msra.mxu1 %v8866_v54 }
0x1b76   :  { %7949 = vmatprep.subr.bf16.mxu1 %v10345_v16  ;;  %7666 = vmatprep.mubr.msk.f32.mxu1 %vm8423_vm3, %v10346_v57 }
0x1b77   :  { %7964 = vmatprep.subr.bf16.mxu0 %v10345_v16 }
0x1b78   :  { %7678 = vmatmul.mubr.msk.f32.vlgmr.msra.gmra.mrb[26].mxu0 %vm92_vm1, %v3701_v6 }
0x1b79   :  { %7951 = vmatpush3.bf16.msra.mxu1 %v8889_v1  ;;  %7966 = vmatpush3.bf16.msra.mxu0 %v8584_v22 }
0x1b7a   :  { %7967 = vmatprep.subr.bf16.mxu0 %v10345_v16  ;;  %7958 = vmatprep.subr.bf16.mxu1 %v10345_v16 }
0x1b7b   :  { %7699 = vmatprep.mubr.msk.f32.mxu0 %vm8423_vm3, %v10346_v57 }
0x1b7d   :  { %7969 = vmatpush3.bf16.msra.mxu0 %v8620_v30 }
0x1b7e   :  { %7976 = vmatprep.subr.bf16.mxu0 %v10345_v16 }
0x1c43   :  { %v3849_v37 = vpop.f32.mrb[24].mxu0 }
0x1c44   :  { %v7657_v61 = vpop.f32.mrb[25].mxu0 }
0x1c47   :  { %v3777_v55 = vpop.f32.mrb[24].mxu1 }
0x1c48   :  { %v3850_v49 = vadd.f32 %v3849_v37, %v3777_v55  ;;  %v7646_v42 = vpop.f32.mrb[25].mxu1 }
0x1c4a   :  { %v3853_v10 = vadd.f32 %v9550_v56, %v3850_v49 }
0x1c4b   :  { %v9553_v24 = vpop.f32.mrb[26].mxu0 }
0x1c4c   :  { %v3855_v20 = vcombine.high %v3853_v10, %v3853_v10  ;;  %v3862_v52 = vrot.slane %v3853_v10, %v8706_v7  ;;  %v7679_v17 = vpop.f32.mrb[27].mxu0 }
0x1c4e   :  { %v3869_v35 = vrot.slane %v3855_v20, %v8706_v7  ;;  %v3870_v31 = vcombine.high %v3862_v52, %v3862_v52  ;;  %v3878_v46 = vrot.slane %v3862_v52, %v8706_v7  ;;  %v9580_v20 = vld [vmem:[%s10298_s7] ss:$0 sm:$0xff] }
0x1c50   :  { %v3871_v63 = vcombine.high %v3869_v35, %v3869_v35  ;;  %v3885_v44 = vrot.slane %v3869_v35, %v8706_v7  ;;  %v3892_v59 = vrot.slane %v3870_v31, %v8706_v7  ;;  %v3900_v29 = vcombine.high %v3878_v46, %v3878_v46 }
0x1c51   :  { %v3907_v40 = vrot.slane %v3878_v46, %v8714_v14 }
0x1c52   :  { %v3899_v51 = vrot.slane %v3871_v63, %v8706_v7  ;;  %v3902_v9 = vcombine.high %v3892_v59, %v3892_v59  ;;  %v3911_v36 = vrot.slane %v3892_v59, %v8714_v14  ;;  %v3901_v25 = vcombine.high %v3885_v44, %v3885_v44 }
0x1c53   :  { %v3915_v5 = vrot.slane %v3900_v29, %v8714_v14  ;;  %v3923_v39 = vrot.slane %v3885_v44, %v8714_v14  ;;  %v3944_v13 = vadd.f32 %v3907_v40, %v8722_v28 }
0x1c54   :  { %v3903_v47 = vcombine.high %v3899_v51, %v3899_v51  ;;  %v3919_v33 = vrot.slane %v3902_v9, %v8714_v14  ;;  %v3927_v3 = vrot.slane %v3899_v51, %v8714_v14  ;;  %v3945_v60 = vadd.f32 %v3911_v36, %v8718_v19 }
0x1c55   :  { %v3946_v2 = vadd.f32 %v3915_v5, %v8726_v38  ;;  %v3948_v6 = vadd.f32 %v3923_v39, %v8731_v53  ;;  %8224 = vtanh.f32 %v3944_v13  ;;  %v3931_v61 = vrot.slane %v3901_v25, %v8714_v14 }
0x1c56   :  { %v3935_v34 = vrot.slane %v3903_v47, %v8714_v14  ;;  %v3947_v37 = vadd.f32 %v3919_v33, %v8724_v32  ;;  %v3949_v55 = vadd.f32 %v3927_v3, %v8742_v4  ;;  %8226 = vtanh.f32 %v3945_v60 }
0x1c57   :  { %8228 = vtanh.f32 %v3946_v2  ;;  %v3950_v42 = vadd.f32 %v3931_v61, %v8745_v8 }
0x1c58   :  { %8230 = vtanh.f32 %v3948_v6  ;;  %v3951_v49 = vadd.f32 %v3935_v34, %v8750_v15 }
0x1c59   :  { %8232 = vtanh.f32 %v3947_v37 }
0x1c5a   :  { %8234 = vtanh.f32 %v3949_v55 }
0x1c5b   :  { %8236 = vtanh.f32 %v3951_v49 }
0x1c5c   :  { %8238 = vtanh.f32 %v3950_v42 }
0x1c5f   :  { %v8225_v10 = vpop.eup %8224 }
0x1c60   :  { %v3960_v52 = vmul.f32 %v9580_v20, %v8225_v10  ;;  %v8227_v17 = vpop.eup %8226 }
0x1c61   :  { %v8229_v35 = vpop.eup %8228  ;;  %v3961_v46 = vmul.f32 %v9580_v20, %v8227_v17 }
0x1c62   :  { %v3968_v31 = vsel %vm92_vm1, %v3960_v52, 0.0  ;;  %v8231_v63 = vpop.eup %8230  ;;  %v3962_v29 = vmul.f32 %v9580_v20, %v8229_v35 }
0x1c63   :  { %3969 = vadd.xlane.f32.xlu1 %v3968_v31  ;;  %v8233_v44 = vpop.eup %8232  ;;  %v3971_v59 = vsel %vm92_vm1, %v3961_v46, 0.0  ;;  %v3964_v39 = vmul.f32 %v9580_v20, %v8231_v63 }
0x1c64   :  { %v8235_v40 = vpop.eup %8234  ;;  %3972 = vadd.xlane.f32.xlu0 %v3971_v59  ;;  %v3963_v51 = vmul.f32 %v9580_v20, %v8233_v44  ;;  %v3974_v5 = vsel %vm92_vm1, %v3962_v29, 0.0 }
0x1c65   :  { %v3965_v36 = vmul.f32 %v9580_v20, %v8235_v40  ;;  %v8237_v25 = vpop.eup %8236  ;;  %v3980_v3 = vsel %vm92_vm1, %v3964_v39, 0.0 }
0x1c66   :  { %v3977_v9 = vsel %vm92_vm1, %v3963_v51, 0.0  ;;  %v8239_v13 = vpop.eup %8238  ;;  %v3967_v33 = vmul.f32 %v9580_v20, %v8237_v25 }
0x1c67   :  { %3978 = vadd.xlane.f32.xlu1 %v3977_v9  ;;  %v3983_v47 = vsel %vm92_vm1, %v3965_v36, 0.0  ;;  %v3966_v60 = vmul.f32 %v9580_v20, %v8239_v13 }
0x1c68   :  { %3975 = vadd.xlane.f32.xlu0 %v3974_v5  ;;  %v3989_v2 = vsel %vm92_vm1, %v3967_v33, 0.0 }
0x1c69   :  { %v3986_v6 = vsel %vm92_vm1, %v3966_v60, 0.0 }
0x1c6b   :  { %3984 = vadd.xlane.f32.xlu1 %v3983_v47 }
0x1c6c   :  { %3981 = vadd.xlane.f32.xlu0 %v3980_v3 }
0x1c6f   :  { %3990 = vadd.xlane.f32.xlu1 %v3989_v2 }
0x1c70   :  { %3987 = vadd.xlane.f32.xlu0 %v3986_v6 }
0x1cf0   :  { %v3970_v34 = vpop.xlane.xlu1 %3969 }
0x1cf1   :  { %v3973_v37 = vpop.xlane.xlu0 %3972  ;;  %v3992_v55 = vadd.f32 %v3970_v34, %v8778_v11 }
0x1cf2   :  { %v3993_v61 = vadd.f32 %v3973_v37, %v8778_v11 }
0x1cf3   :  { %v4011_v17 = vrot.slane %v3992_v55, %v8781_v0 }
0x1cf4   :  { %v3979_v49 = vpop.xlane.xlu1 %3978  ;;  %v4015_v42 = vrot.slane %v3993_v61, %v8781_v0 }
0x1cf5   :  { %v3976_v10 = vpop.xlane.xlu0 %3975  ;;  %v3995_v35 = vadd.f32 %v3979_v49, %v8778_v11 }
0x1cf6   :  { %v3994_v52 = vadd.f32 %v3976_v10, %v8778_v11  ;;  %v4040_v63 = vsel %vm716_vm4, %v4015_v42, %v4011_v17 }
0x1cf7   :  { %v4023_v40 = vrot.slane %v3995_v35, %v8781_v0 }
0x1cf8   :  { %v4019_v31 = vrot.slane %v3994_v52, %v8781_v0  ;;  %v3985_v46 = vpop.xlane.xlu1 %3984 }
0x1cf9   :  { %v3982_v44 = vpop.xlane.xlu0 %3981  ;;  %v3997_v51 = vadd.f32 %v3985_v46, %v8778_v11 }
0x1cfa   :  { %v4041_v59 = vsel %vm718_vm5, %v4019_v31, %v4040_v63  ;;  %v3996_v29 = vadd.f32 %v3982_v44, %v8778_v11 }
0x1cfb   :  { %v4042_v25 = vsel %vm720_vm6, %v4023_v40, %v4041_v59  ;;  %v4031_v33 = vrot.slane %v3997_v51, %v8781_v0 }
0x1cfc   :  { %v4027_v9 = vrot.slane %v3996_v29, %v8781_v0  ;;  %v3991_v36 = vpop.xlane.xlu1 %3990 }
0x1cfd   :  { %v3999_v5 = vadd.f32 %v3991_v36, %v8778_v11  ;;  %v3988_v39 = vpop.xlane.xlu0 %3987 }
0x1cfe   :  { %v4043_v13 = vsel %vm722_vm7, %v4027_v9, %v4042_v25  ;;  %v3998_v47 = vadd.f32 %v3988_v39, %v8778_v11 }
0x1cff   :  { %v4039_v60 = vrot.slane %v3999_v5, %v8781_v0  ;;  %v4044_v2 = vsel %vm724_vm8, %v4031_v33, %v4043_v13 }
0x1d00   :  { %v4035_v3 = vrot.slane %v3998_v47, %v8781_v0 }
0x1d02   :  { %v4045_v6 = vsel %vm726_vm9, %v4035_v3, %v4044_v2 }
0x1d03   :  { %v4046_v34 = vsel %vm728_vm10, %v4039_v60, %v4045_v6 }
0x1d04   :  { %v4048_v37 = vsel %vm731_vm11, %v4046_v34, -inf }
0x1d05   :  { %4049 = vmax.xlane.f32.xlu0 %v4048_v37 }
0x1d92   :  { %v4050_v49 = vpop.xlane.xlu0 %4049 }
0x1d93   :  { %v4055_v42 = vrot.slane %v4050_v49, %v8714_v14  ;;  %v4059_v10 = vrot.slane %v4050_v49, %v8808_v27  ;;  %v4063_v17 = vrot.slane %v4050_v49, %v8811_v41  ;;  %v4075_v31 = vrot.slane %v4050_v49, %v8824_v18 }
0x1d94   :  { %v4067_v46 = vrot.slane %v4050_v49, %v8814_v43  ;;  %v4083_v40 = vrot.slane %v4050_v49, %v10364_v50  ;;  %v4071_v39 = vrot.slane %v4050_v49, %v8820_v62  ;;  %v4079_v2 = vrot.slane %v4050_v49, %v8828_v26 }
0x1d95   :  { %v4092_v63 = vsub.f32 %v3992_v55, %v4055_v42  ;;  %v4093_v44 = vsub.f32 %v3993_v61, %v4059_v10  ;;  %v4094_v59 = vsub.f32 %v3994_v52, %v4063_v17  ;;  %v4097_v9 = vsub.f32 %v3997_v51, %v4075_v31 }
0x1d96   :  { %v4095_v13 = vsub.f32 %v3995_v35, %v4067_v46  ;;  %v4099_v3 = vsub.f32 %v3999_v5, %v4083_v40  ;;  %v4096_v6 = vsub.f32 %v3996_v29, %v4071_v39  ;;  %v4098_v52 = vsub.f32 %v3998_v47, %v4079_v2 }
0x1d97   :  { %v4100_v36 = vmul.f32 1.442695, %v4092_v63  ;;  %v4102_v25 = vmul.f32 1.442695, %v4093_v44  ;;  %v4104_v33 = vmul.f32 1.442695, %v4094_v59 }
0x1d98   :  { %v4110_v60 = vmul.f32 1.442695, %v4097_v9  ;;  %v4106_v55 = vmul.f32 1.442695, %v4095_v13  ;;  %v4114_v61 = vmul.f32 1.442695, %v4099_v3 }
0x1d99   :  { %8240 = vpow2.f32 %v4100_v36  ;;  %v4108_v51 = vmul.f32 1.442695, %v4096_v6  ;;  %v4112_v35 = vmul.f32 1.442695, %v4098_v52 }
0x1d9a   :  { %8242 = vpow2.f32 %v4102_v25 }
0x1d9b   :  { %8244 = vpow2.f32 %v4104_v33 }
0x1d9c   :  { %8246 = vpow2.f32 %v4110_v60 }
0x1d9d   :  { %8248 = vpow2.f32 %v4106_v55 }
0x1d9e   :  { %8250 = vpow2.f32 %v4114_v61 }
0x1d9f   :  { %8252 = vpow2.f32 %v4108_v51 }
0x1da0   :  { %8254 = vpow2.f32 %v4112_v35 }
0x1da3   :  { %v8241_v34 = vpop.eup %8240 }
0x1da4   :  { %v8243_v37 = vpop.eup %8242  ;;  %4125 = vperm.xlu1 %8054, %v8241_v34  }
0x1da5   :  { %4128 = vperm.xlu0 %8055, %v8243_v37   ;;  %v8245_v5 = vpop.eup %8244 }
0x1da6   :  { %v8247_v42 = vpop.eup %8246 }
0x1da7   :  { %v8249_v29 = vpop.eup %8248 }
0x1da8   :  { %4131 = vperm.xlu1 %8054, %v8245_v5   ;;  %v8251_v49 = vpop.eup %8250 }
0x1da9   :  { %4140 = vperm.xlu0 %8055, %v8247_v42   ;;  %v8253_v10 = vpop.eup %8252 }
0x1daa   :  { %v8255_v47 = vpop.eup %8254 }
0x1dac   :  { %4134 = vperm.xlu1 %8054, %v8249_v29  }
0x1dad   :  { %4146 = vperm.xlu0 %8055, %v8251_v49  }
0x1db0   :  { %4137 = vperm.xlu1 %8054, %v8253_v10  }
0x1db4   :  { %4143 = vperm.xlu1 %8054, %v8255_v47  }
0x1e23   :  { %v4126_v17 = vpop.permute.xlu1 %4125 }
0x1e24   :  { %v4129_v31 = vpop.permute.xlu0 %4128  ;;  %v4151_v44 = vrot.slane %v4126_v17, %v8781_v0 }
0x1e25   :  { %v4155_v63 = vrot.slane %v4129_v31, %v8781_v0 }
0x1e27   :  { %v4132_v46 = vpop.permute.xlu1 %4131  ;;  %v4180_v25 = vsel %vm716_vm4, %v4155_v63, %v4151_v44 }
0x1e28   :  { %v4141_v40 = vpop.permute.xlu0 %4140  ;;  %v4159_v9 = vrot.slane %v4132_v46, %v8781_v0 }
0x1e29   :  { %v4171_v6 = vrot.slane %v4141_v40, %v8781_v0 }
0x1e2a   :  { %v4181_v13 = vsel %vm718_vm5, %v4159_v9, %v4180_v25 }
0x1e2b   :  { %v4135_v59 = vpop.permute.xlu1 %4134 }
0x1e2c   :  { %v4163_v36 = vrot.slane %v4135_v59, %v8781_v0  ;;  %v4147_v60 = vpop.permute.xlu0 %4146 }
0x1e2d   :  { %v4179_v52 = vrot.slane %v4147_v60, %v8781_v0 }
0x1e2e   :  { %v4182_v3 = vsel %vm720_vm6, %v4163_v36, %v4181_v13 }
0x1e2f   :  { %v4138_v39 = vpop.permute.xlu1 %4137 }
0x1e30   :  { %v4167_v33 = vrot.slane %v4138_v39, %v8781_v0 }
0x1e32   :  { %v4183_v2 = vsel %vm722_vm7, %v4167_v33, %v4182_v3 }
0x1e33   :  { %v4144_v55 = vpop.permute.xlu1 %4143  ;;  %v4184_v51 = vsel %vm724_vm8, %v4171_v6, %v4183_v2 }
0x1e34   :  { %v4175_v61 = vrot.slane %v4144_v55, %v8781_v0 }
0x1e36   :  { %v4185_v35 = vsel %vm726_vm9, %v4175_v61, %v4184_v51  ;;  %v10373_v51 = vld [vmem:[#allocation5_spill] sm:$0xff] }
0x1e37   :  { %v4186_v17 = vsel %vm728_vm10, %v4179_v52, %v4185_v35  ;;  %v10374_v35 = vld [vmem:[#allocation12_spill] sm:$0xff] }
0x1e38   :  { %v4188_v31 = vsel %vm731_vm11, %v4186_v17, 0.0 }
0x1e39   :  { %4189 = vadd.xlane.f32.xlu1 %v4188_v31 }
0x1ec6   :  { %v4190_v46 = vpop.xlane.xlu1 %4189 }
0x1ec7   :  { %8256 = vrcp.f32 %v4190_v46 }
0x1ed1   :  { %v8257_v63 = vpop.eup %8256 }
0x1ed2   :  { %v4196_v44 = vrot.slane %v8257_v63, %v8714_v14  ;;  %v4200_v40 = vrot.slane %v8257_v63, %v8808_v27  ;;  %v4204_v36 = vrot.slane %v8257_v63, %v8811_v41  ;;  %v4208_v39 = vrot.slane %v8257_v63, %v8814_v43 }
0x1ed3   :  { %v4212_v33 = vrot.slane %v8257_v63, %v8820_v62  ;;  %v4216_v60 = vrot.slane %v8257_v63, %v8824_v18  ;;  %v4220_v2 = vrot.slane %v8257_v63, %v8828_v26  ;;  %v4224_v6 = vrot.slane %v8257_v63, %v10364_v50  ;;  %v10375_v63 = vld [vmem:[#allocation13_spill] sm:$0xff] }
0x1ed4   :  { %v4233_v59 = vmul.f32 %v8241_v34, %v4196_v44  ;;  %v4234_v9 = vmul.f32 %v8243_v37, %v4200_v40  ;;  %v4235_v25 = vmul.f32 %v8245_v5, %v4204_v36  ;;  %v4236_v13 = vmul.f32 %v8249_v29, %v4208_v39 }
0x1ed5   :  { %v4237_v3 = vmul.f32 %v8253_v10, %v4212_v33  ;;  %v4238_v34 = vmul.f32 %v8247_v42, %v4216_v60  ;;  %v4239_v37 = vmul.f32 %v8255_v47, %v4220_v2  ;;  %v4240_v5 = vmul.f32 %v8251_v49, %v4224_v6  ;;  %v10377_v6 = vld [vmem:[#allocation15_spill] sm:$0xff] }
0x1ed6   :  { %4243 = vperm.xlu0 %8055, %v4233_v59  }
0x1eda   :  { %4248 = vperm.xlu0 %8055, %v4234_v9  }
0x1ede   :  { %4253 = vperm.xlu0 %8055, %v4235_v25   ;;  %v10376_v25 = vld [vmem:[#allocation14_spill] sm:$0xff] }
0x1ee2   :  { %4258 = vperm.xlu0 %8055, %v4236_v13  }
0x1ee6   :  { %4263 = vperm.xlu0 %8055, %v4237_v3  }
0x1eea   :  { %4268 = vperm.xlu0 %8055, %v4238_v34  }
0x1eee   :  { %4273 = vperm.xlu0 %8055, %v4239_v37  }
0x1ef2   :  { %4278 = vperm.xlu0 %8055, %v4240_v5  }
0x1f55   :  { %v4244_v55 = vpop.permute.xlu0 %4243 }
0x1f56   :  { %v4281_v10 = vmul.f32 %v10373_v51, %v4244_v55 }
0x1f58   :  { %v4289_v47 = vsel %vm92_vm1, %v4281_v10, 0.0 }
0x1f59   :  { %v4249_v61 = vpop.permute.xlu0 %4248  ;;  %v4290_v9 = vrot.slane %v4289_v47, 4 }
0x1f5a   :  { %v4282_v29 = vmul.f32 %v9445_v45, %v4249_v61 }
0x1f5b   :  { %v4291_v60 = vadd.f32 %v4290_v9, %v4289_v47 }
0x1f5c   :  { %v4296_v42 = vsel %vm92_vm1, %v4282_v29, 0.0 }
0x1f5d   :  { %v4254_v52 = vpop.permute.xlu0 %4253  ;;  %v4297_v49 = vrot.slane %v4296_v42, 4  ;;  %v4292_v51 = vrot.slane %v4291_v60, 2 }
0x1f5e   :  { %v4283_v17 = vmul.f32 %v10374_v35, %v4254_v52 }
0x1f5f   :  { %v4298_v13 = vadd.f32 %v4297_v49, %v4296_v42  ;;  %v10378_v42 = vld [vmem:[#allocation16_spill] sm:$0xff] }
0x1f60   :  { %v4303_v31 = vsel %vm92_vm1, %v4283_v17, 0.0 }
0x1f61   :  { %v4259_v46 = vpop.permute.xlu0 %4258  ;;  %v4304_v59 = vrot.slane %v4303_v31, 4  ;;  %v4299_v55 = vrot.slane %v4298_v13, 2 }
0x1f62   :  { %v4284_v44 = vmul.f32 %v10375_v63, %v4259_v46 }
0x1f63   :  { %v4305_v33 = vadd.f32 %v4304_v59, %v4303_v31  ;;  %v4300_v63 = vadd.f32 %v4299_v55, %v4298_v13  ;;  %v4293_v59 = vadd.f32 %v4292_v51, %v4291_v60 }
0x1f64   :  { %v4310_v40 = vsel %vm92_vm1, %v4284_v44, 0.0 }
0x1f65   :  { %v4311_v45 = vrot.slane %v4310_v40, 4  ;;  %v4264_v36 = vpop.permute.xlu0 %4263  ;;  %v4306_v29 = vrot.slane %v4305_v33, 2 }
0x1f66   :  { %v4285_v39 = vmul.f32 %v10376_v25, %v4264_v36 }
0x1f67   :  { %v4312_v34 = vadd.f32 %v4311_v45, %v4310_v40  ;;  %v4307_v47 = vadd.f32 %v4306_v29, %v4305_v33 }
0x1f68   :  { %v4317_v3 = vsel %vm92_vm1, %v4285_v39, 0.0  ;;  %v10379_v39 = vld [vmem:[#allocation17_spill] sm:$0xff] }
0x1f69   :  { %v4318_v2 = vrot.slane %v4317_v3, 4  ;;  %v4269_v37 = vpop.permute.xlu0 %4268  ;;  %v4313_v10 = vrot.slane %v4312_v34, 2 }
0x1f6a   :  { %v4286_v5 = vmul.f32 %v10377_v6, %v4269_v37 }
0x1f6b   :  { %v4319_v61 = vadd.f32 %v4318_v2, %v4317_v3  ;;  %v4314_v40 = vadd.f32 %v4313_v10, %v4312_v34  ;;  %v4301_v2 = vrot.slane %v4300_v63, 1 }
0x1f6c   :  { %v4324_v52 = vsel %vm92_vm1, %v4286_v5, 0.0  ;;  %v4308_v5 = vrot.slane %v4307_v47, 1 }
0x1f6d   :  { %v4325_v35 = vrot.slane %v4324_v52, 4  ;;  %v4274_v17 = vpop.permute.xlu0 %4273  ;;  %v4320_v46 = vrot.slane %v4319_v61, 2  ;;  %v4315_v13 = vrot.slane %v4314_v40, 1 }
0x1f6e   :  { %v4287_v31 = vmul.f32 %v10378_v42, %v4274_v17  ;;  %v4294_v17 = vrot.slane %v4293_v59, 1  ;;  %v4309_v10 = vadd.f32 %v4308_v5, %v4307_v47 }
0x1f6f   :  { %v4326_v44 = vadd.f32 %v4325_v35, %v4324_v52  ;;  %v4321_v25 = vadd.f32 %v4320_v46, %v4319_v61  ;;  %v4302_v52 = vadd.f32 %v4301_v2, %v4300_v63  ;;  %v4316_v61 = vadd.f32 %v4315_v13, %v4314_v40 }
0x1f70   :  { %v4331_v49 = vsel %vm92_vm1, %v4287_v31, 0.0  ;;  %v4295_v35 = vadd.f32 %v4294_v17, %v4293_v59 }
0x1f71   :  { %v4327_v9 = vrot.slane %v4326_v44, 2  ;;  %v4332_v45 = vrot.slane %v4331_v49, 4  ;;  %v4279_v36 = vpop.permute.xlu0 %4278  ;;  %v4322_v29 = vrot.slane %v4321_v25, 1 }
0x1f72   :  { %v4288_v3 = vmul.f32 %v10379_v39, %v4279_v36 }
0x1f73   :  { %v4328_v37 = vadd.f32 %v4327_v9, %v4326_v44  ;;  %v4333_v6 = vadd.f32 %v4332_v45, %v4331_v49  ;;  %v4323_v31 = vadd.f32 %v4322_v29, %v4321_v25  ;;  %v4353_v44 = vsel %vm716_vm4, %v4302_v52, %v4295_v35  ;;  %v10380_v25 = vld [vmem:[#allocation9_spill] sm:$0xff] }
0x1f74   :  { %v4338_v50 = vsel %vm92_vm1, %v4288_v3, 0.0  ;;  %v4354_v45 = vsel %vm718_vm5, %v4309_v10, %v4353_v44 }
0x1f75   :  { %v4334_v55 = vrot.slane %v4333_v6, 2  ;;  %v4339_v33 = vrot.slane %v4338_v50, 4  ;;  %v4329_v60 = vrot.slane %v4328_v37, 1  ;;  %v4355_v39 = vsel %vm720_vm6, %v4316_v61, %v4354_v45 }
0x1f76   :  { %v4356_v63 = vsel %vm722_vm7, %v4323_v31, %v4355_v39 }
0x1f77   :  { %v4335_v34 = vadd.f32 %v4334_v55, %v4333_v6  ;;  %v4340_v51 = vadd.f32 %v4339_v33, %v4338_v50  ;;  %v4330_v49 = vadd.f32 %v4329_v60, %v4328_v37 }
0x1f79   :  { %v4336_v46 = vrot.slane %v4335_v34, 1  ;;  %v4341_v42 = vrot.slane %v4340_v51, 2  ;;  %v4357_v50 = vsel %vm724_vm8, %v4330_v49, %v4356_v63 }
0x1f7b   :  { %v4342_v9 = vadd.f32 %v4341_v42, %v4340_v51  ;;  %v4337_v36 = vadd.f32 %v4336_v46, %v4335_v34 }
0x1f7d   :  { %v4343_v3 = vrot.slane %v4342_v9, 1  ;;  %v4358_v47 = vsel %vm726_vm9, %v4337_v36, %v4357_v50 }
0x1f7f   :  { %v4344_v2 = vadd.f32 %v4343_v3, %v4342_v9 }
0x1f81   :  { %v4359_v59 = vsel %vm728_vm10, %v4344_v2, %v4358_v47 }
0x1f82   :  { %7667 = vmatmul.mubr.msk.f32.vlgmr.msra.gmra.mrb[26].mxu1 %vm92_vm1, %v4359_v59  ;;  %4534 = vst.msk [vmem:[#allocation3 + $0x20] sm:$0xff] %vm92_vm1, %v4359_v59 }
0x1f83   :  { %7960 = vmatpush3.bf16.msra.mxu1 %v8552_v12  ;;  %7688 = vmatprep.mubr.msk.f32.mxu1 %vm8423_vm3, %v10346_v57 }
0x1f84   :  { %7961 = vmatprep.subr.bf16.mxu1 %v10345_v16 }
0x1f87   :  { %7963 = vmatpush3.bf16.msra.mxu1 %v8587_v23 }
0x1f88   :  { %7970 = vmatprep.subr.bf16.mxu1 %v10345_v16 }
0x2055   :  { %v4428_v40 = vpop.f32.mrb[26].mxu1 }
0x2056   :  { %v4432_v37 = vadd.f32 %v4428_v40, %v10380_v25  ;;  %v7668_v6 = vpop.f32.mrb[27].mxu1 }
0x2058   :  { %v4503_v5 = vadd.f32 %v9553_v24, %v4432_v37 }
0x205a   :  { %8258 = vtanh.f32 %v4503_v5  ;;  %v7201_v13 = vmul.f32 -1.442695, %v4503_v5 }
0x205c   :  { %8260 = vpow2.f32 %v7201_v13 }
0x2064   :  { %v8259_v17 = vpop.eup %8258 }
0x2065   :  { %4513 = vrot.lane.b32.xlu0 %v8259_v17, %s8427_s10 }
0x2066   :  { %v8261_v55 = vpop.eup %8260 }
0x2067   :  { %v4507_v33 = vadd.f32 1.0, %v8261_v55 }
0x2069   :  { %8262 = vrcp.f32 %v4507_v33 }
0x2073   :  { %v8263_v29 = vpop.eup %8262 }
0x2074   :  { %v4511_v34 = vmul.f32 %v8263_v29, %v9518_v21 }
0x20d7   :  { %v4514_v52 = vpop.permute.xlu0 %4513 }
0x20d8   :  { %v4516_v60 = vmul.f32 %v8263_v29, %v4514_v52 }
0x20da   :  { %4518 = vrot.lane.b32.xlu1 %v4516_v60, %s8428_s12 }
0x214c   :  { %v4519_v51 = vpop.permute.xlu1 %4518 }
0x214d   :  { %v9690_v10 = vadd.f32 %v4519_v51, %v4511_v34 }
0x214f   :  { %8264 = vtanh.f32 %v9690_v10 }
0x2159   :  { %v8265_v24 = vpop.eup %8264 }
0x215a   :  { %4524 = vrot.lane.b32.xlu0 %v8265_v24, %s8427_s10 }
0x21cc   :  { %v4525_v35 = vpop.permute.xlu0 %4524 }
0x21cd   :  { %v4527_v61 = vmul.f32 %v8263_v29, %v4525_v35 }
0x21cf   :  { %4529 = vrot.lane.b32.xlu0 %v4527_v61, %s8428_s12 }
0x21d3   :  { %4536 = vrot.lane.b32.xlu0 %v9690_v10, %s8429_s5 }
0x2241   :  { %v4530_v46 = vpop.permute.xlu0 %4529 }
0x2242   :  { %4532 = vst.msk [vmem:[#allocation2 + $0x20] sm:$0xff] %vm92_vm1, %v4530_v46  ;;  %7700 = vmatmul.mubr.msk.f32.vlgmr.msra.gmra.mrb[28].mxu0 %vm92_vm1, %v4530_v46 }
0x2243   :  { %7978 = vmatpush3.bf16.msra.mxu0 %v8877_v58  ;;  %7721 = vmatprep.mubr.msk.f32.mxu0 %vm8423_vm3, %v10346_v57 }
0x2244   :  { %7979 = vmatprep.subr.bf16.mxu0 %v10345_v16 }
0x2245   :  { %v4537_v21 = vpop.permute.xlu0 %4536 }
0x2246   :  { %7689 = vmatmul.mubr.msk.f32.vlgmr.msra.gmra.mrb[28].mxu1 %vm92_vm1, %v4537_v21 }
0x2247   :  { %7981 = vmatpush3.bf16.msra.mxu0 %v8893_v48  ;;  %7972 = vmatpush3.bf16.msra.mxu1 %v8866_v54 }
0x2248   :  { %7973 = vmatprep.subr.bf16.mxu1 %v10345_v16  ;;  %7710 = vmatprep.mubr.msk.f32.mxu1 %vm8423_vm3, %v10346_v57 }
0x2249   :  { %7988 = vmatprep.subr.bf16.mxu0 %v10345_v16 }
0x224a   :  { %7722 = vmatmul.mubr.msk.f32.vlgmr.msra.gmra.mrb[30].mxu0 %vm92_vm1, %v4530_v46 }
0x224b   :  { %7975 = vmatpush3.bf16.msra.mxu1 %v8889_v1  ;;  %7990 = vmatpush3.bf16.msra.mxu0 %v8584_v22 }
0x224c   :  { %7991 = vmatprep.subr.bf16.mxu0 %v10345_v16  ;;  %7982 = vmatprep.subr.bf16.mxu1 %v10345_v16 }
0x224d   :  { %7743 = vmatprep.mubr.msk.f32.mxu0 %vm8423_vm3, %v10346_v57 }
0x224f   :  { %7993 = vmatpush3.bf16.msra.mxu0 %v8620_v30 }
0x2250   :  { %8000 = vmatprep.subr.bf16.mxu0 %v10345_v16 }
0x2315   :  { %v4678_v42 = vpop.f32.mrb[28].mxu0 }
0x2316   :  { %v7701_v31 = vpop.f32.mrb[29].mxu0 }
0x2319   :  { %v4606_v44 = vpop.f32.mrb[28].mxu1 }
0x231a   :  { %v4679_v49 = vadd.f32 %v4678_v42, %v4606_v44  ;;  %v7690_v9 = vpop.f32.mrb[29].mxu1 }
0x231c   :  { %v4682_v45 = vadd.f32 %v9550_v56, %v4679_v49 }
0x231d   :  { %v9720_v36 = vpop.f32.mrb[30].mxu0 }
0x231e   :  { %v4684_v39 = vcombine.high %v4682_v45, %v4682_v45  ;;  %v4691_v3 = vrot.slane %v4682_v45, %v8706_v7  ;;  %v7723_v63 = vpop.f32.mrb[31].mxu0 }
0x2320   :  { %v4698_v2 = vrot.slane %v4684_v39, %v8706_v7  ;;  %v4699_v50 = vcombine.high %v4691_v3, %v4691_v3  ;;  %v4707_v47 = vrot.slane %v4691_v3, %v8706_v7 }
0x2322   :  { %v4700_v59 = vcombine.high %v4698_v2, %v4698_v2  ;;  %v4714_v40 = vrot.slane %v4698_v2, %v8706_v7  ;;  %v4721_v25 = vrot.slane %v4699_v50, %v8706_v7  ;;  %v4729_v37 = vcombine.high %v4707_v47, %v4707_v47 }
0x2323   :  { %v4736_v6 = vrot.slane %v4707_v47, %v8714_v14 }
0x2324   :  { %v4728_v56 = vrot.slane %v4700_v59, %v8706_v7  ;;  %v4731_v5 = vcombine.high %v4721_v25, %v4721_v25  ;;  %v4740_v17 = vrot.slane %v4721_v25, %v8714_v14  ;;  %v4744_v13 = vrot.slane %v4729_v37, %v8714_v14 }
0x2325   :  { %v4752_v55 = vrot.slane %v4714_v40, %v8714_v14  ;;  %v4773_v33 = vadd.f32 %v4736_v6, %v8722_v28  ;;  %v4730_v29 = vcombine.high %v4714_v40, %v4714_v40 }
0x2326   :  { %v4732_v52 = vcombine.high %v4728_v56, %v4728_v56  ;;  %v4748_v60 = vrot.slane %v4731_v5, %v8714_v14  ;;  %v4756_v34 = vrot.slane %v4728_v56, %v8714_v14  ;;  %v4774_v51 = vadd.f32 %v4740_v17, %v8718_v19 }
0x2327   :  { %v4775_v24 = vadd.f32 %v4744_v13, %v8726_v38  ;;  %v4777_v35 = vadd.f32 %v4752_v55, %v8731_v53  ;;  %8266 = vtanh.f32 %v4773_v33  ;;  %v4760_v42 = vrot.slane %v4730_v29, %v8714_v14 }
0x2328   :  { %v4764_v61 = vrot.slane %v4732_v52, %v8714_v14  ;;  %v4778_v46 = vadd.f32 %v4756_v34, %v8742_v4  ;;  %8268 = vtanh.f32 %v4774_v51  ;;  %v4776_v31 = vadd.f32 %v4748_v60, %v8724_v32 }
0x2329   :  { %8270 = vtanh.f32 %v4775_v24  ;;  %v4779_v44 = vadd.f32 %v4760_v42, %v8745_v8 }
0x232a   :  { %v4780_v21 = vadd.f32 %v4764_v61, %v8750_v15  ;;  %8272 = vtanh.f32 %v4777_v35 }
0x232b   :  { %8274 = vtanh.f32 %v4778_v46 }
0x232c   :  { %8276 = vtanh.f32 %v4780_v21 }
0x232d   :  { %8278 = vtanh.f32 %v4776_v31 }
0x232e   :  { %8280 = vtanh.f32 %v4779_v44 }
0x2331   :  { %v8267_v49 = vpop.eup %8266 }
0x2332   :  { %v4789_v9 = vmul.f32 %v9580_v20, %v8267_v49  ;;  %v8269_v45 = vpop.eup %8268 }
0x2333   :  { %v8271_v39 = vpop.eup %8270  ;;  %v4790_v63 = vmul.f32 %v9580_v20, %v8269_v45 }
0x2334   :  { %v4797_v3 = vsel %vm92_vm1, %v4789_v9, 0.0  ;;  %v8273_v2 = vpop.eup %8272  ;;  %v4791_v50 = vmul.f32 %v9580_v20, %v8271_v39 }
0x2335   :  { %4798 = vadd.xlane.f32.xlu0 %v4797_v3  ;;  %v8275_v47 = vpop.eup %8274  ;;  %v4800_v59 = vsel %vm92_vm1, %v4790_v63, 0.0  ;;  %v4793_v6 = vmul.f32 %v9580_v20, %v8273_v2 }
0x2336   :  { %v8277_v40 = vpop.eup %8276  ;;  %4801 = vadd.xlane.f32.xlu1 %v4800_v59  ;;  %v4794_v25 = vmul.f32 %v9580_v20, %v8275_v47  ;;  %v4803_v37 = vsel %vm92_vm1, %v4791_v50, 0.0 }
0x2337   :  { %v8279_v56 = vpop.eup %8278  ;;  %v4796_v17 = vmul.f32 %v9580_v20, %v8277_v40  ;;  %v4809_v13 = vsel %vm92_vm1, %v4793_v6, 0.0 }
0x2338   :  { %v4812_v5 = vsel %vm92_vm1, %v4794_v25, 0.0  ;;  %v4792_v55 = vmul.f32 %v9580_v20, %v8279_v56  ;;  %v8281_v33 = vpop.eup %8280 }
0x2339   :  { %4804 = vadd.xlane.f32.xlu0 %v4803_v37  ;;  %v4818_v29 = vsel %vm92_vm1, %v4796_v17, 0.0  ;;  %v4795_v60 = vmul.f32 %v9580_v20, %v8281_v33 }
0x233a   :  { %4813 = vadd.xlane.f32.xlu1 %v4812_v5  ;;  %v4806_v52 = vsel %vm92_vm1, %v4792_v55, 0.0 }
0x233b   :  { %v4815_v34 = vsel %vm92_vm1, %v4795_v60, 0.0 }
0x233d   :  { %4810 = vadd.xlane.f32.xlu0 %v4809_v13 }
0x233e   :  { %4819 = vadd.xlane.f32.xlu1 %v4818_v29 }
0x2341   :  { %4807 = vadd.xlane.f32.xlu0 %v4806_v52 }
0x2345   :  { %4816 = vadd.xlane.f32.xlu0 %v4815_v34 }
0x23c2   :  { %v4799_v51 = vpop.xlane.xlu0 %4798 }
0x23c3   :  { %v4802_v24 = vpop.xlane.xlu1 %4801  ;;  %v4821_v46 = vadd.f32 %v4799_v51, %v8778_v11 }
0x23c4   :  { %v4822_v61 = vadd.f32 %v4802_v24, %v8778_v11 }
0x23c5   :  { %v4840_v49 = vrot.slane %v4821_v46, %v8781_v0 }
0x23c6   :  { %v4805_v35 = vpop.xlane.xlu0 %4804  ;;  %v4844_v44 = vrot.slane %v4822_v61, %v8781_v0 }
0x23c7   :  { %v4814_v21 = vpop.xlane.xlu1 %4813  ;;  %v4823_v42 = vadd.f32 %v4805_v35, %v8778_v11 }
0x23c8   :  { %v4869_v39 = vsel %vm716_vm4, %v4844_v44, %v4840_v49  ;;  %v4826_v3 = vadd.f32 %v4814_v21, %v8778_v11 }
0x23c9   :  { %v4848_v20 = vrot.slane %v4823_v42, %v8781_v0 }
0x23ca   :  { %v4811_v31 = vpop.xlane.xlu0 %4810  ;;  %v4860_v37 = vrot.slane %v4826_v3, %v8781_v0 }
0x23cb   :  { %v4825_v9 = vadd.f32 %v4811_v31, %v8778_v11  ;;  %v4820_v63 = vpop.xlane.xlu1 %4819  ;;  %v4870_v47 = vsel %vm718_vm5, %v4848_v20, %v4869_v39 }
0x23cc   :  { %v4828_v40 = vadd.f32 %v4820_v63, %v8778_v11 }
0x23cd   :  { %v4856_v59 = vrot.slane %v4825_v9, %v8781_v0 }
0x23ce   :  { %v4808_v45 = vpop.xlane.xlu0 %4807  ;;  %v4868_v55 = vrot.slane %v4828_v40, %v8781_v0 }
0x23cf   :  { %v4824_v2 = vadd.f32 %v4808_v45, %v8778_v11 }
0x23d1   :  { %v4852_v50 = vrot.slane %v4824_v2, %v8781_v0 }
0x23d2   :  { %v4817_v25 = vpop.xlane.xlu0 %4816 }
0x23d3   :  { %v4871_v6 = vsel %vm720_vm6, %v4852_v50, %v4870_v47  ;;  %v4827_v56 = vadd.f32 %v4817_v25, %v8778_v11 }
0x23d4   :  { %v4872_v5 = vsel %vm722_vm7, %v4856_v59, %v4871_v6  ;;  %v10381_v6 = vld [vmem:[#allocation11_spill] sm:$0xff] }
0x23d5   :  { %v4864_v17 = vrot.slane %v4827_v56, %v8781_v0  ;;  %v4873_v13 = vsel %vm724_vm8, %v4860_v37, %v4872_v5 }
0x23d7   :  { %v4874_v33 = vsel %vm726_vm9, %v4864_v17, %v4873_v13 }
0x23d8   :  { %v4875_v29 = vsel %vm728_vm10, %v4868_v55, %v4874_v33 }
0x23d9   :  { %v4877_v52 = vsel %vm731_vm11, %v4875_v29, -inf }
0x23da   :  { %4878 = vmax.xlane.f32.xlu0 %v4877_v52 }
0x2467   :  { %v4879_v60 = vpop.xlane.xlu0 %4878 }
0x2468   :  { %v4884_v34 = vrot.slane %v4879_v60, %v8714_v14  ;;  %v4888_v51 = vrot.slane %v4879_v60, %v8808_v27  ;;  %v4892_v24 = vrot.slane %v4879_v60, %v8811_v41  ;;  %v4900_v35 = vrot.slane %v4879_v60, %v8820_v62 }
0x2469   :  { %v4896_v21 = vrot.slane %v4879_v60, %v8814_v43  ;;  %v4908_v20 = vrot.slane %v4879_v60, %v8828_v26  ;;  %v4904_v50 = vrot.slane %v4879_v60, %v8824_v18  ;;  %v4912_v5 = vrot.slane %v4879_v60, %v10381_v6 }
0x246a   :  { %v4921_v31 = vsub.f32 %v4821_v46, %v4884_v34  ;;  %v4922_v44 = vsub.f32 %v4822_v61, %v4888_v51  ;;  %v4923_v49 = vsub.f32 %v4823_v42, %v4892_v24  ;;  %v4925_v45 = vsub.f32 %v4825_v9, %v4900_v35 }
0x246b   :  { %v4924_v47 = vsub.f32 %v4824_v2, %v4896_v21  ;;  %v4927_v25 = vsub.f32 %v4827_v56, %v4908_v20  ;;  %v4926_v17 = vsub.f32 %v4826_v3, %v4904_v50  ;;  %v4928_v42 = vsub.f32 %v4828_v40, %v4912_v5 }
0x246c   :  { %v4929_v39 = vmul.f32 1.442695, %v4921_v31  ;;  %v4931_v63 = vmul.f32 1.442695, %v4922_v44  ;;  %v4933_v59 = vmul.f32 1.442695, %v4923_v49 }
0x246d   :  { %v4937_v37 = vmul.f32 1.442695, %v4925_v45  ;;  %v4935_v46 = vmul.f32 1.442695, %v4924_v47  ;;  %v4941_v61 = vmul.f32 1.442695, %v4927_v25 }
0x246e   :  { %8282 = vpow2.f32 %v4929_v39  ;;  %v4939_v9 = vmul.f32 1.442695, %v4926_v17  ;;  %v4943_v2 = vmul.f32 1.442695, %v4928_v42 }
0x246f   :  { %8284 = vpow2.f32 %v4931_v63 }
0x2470   :  { %8286 = vpow2.f32 %v4933_v59 }
0x2471   :  { %8288 = vpow2.f32 %v4937_v37 }
0x2472   :  { %8290 = vpow2.f32 %v4935_v46 }
0x2473   :  { %8292 = vpow2.f32 %v4941_v61 }
0x2474   :  { %8294 = vpow2.f32 %v4939_v9 }
0x2475   :  { %8296 = vpow2.f32 %v4943_v2 }
0x2478   :  { %v8283_v13 = vpop.eup %8282 }
0x2479   :  { %v8285_v55 = vpop.eup %8284  ;;  %4954 = vperm.xlu1 %8054, %v8283_v13  }
0x247a   :  { %4957 = vperm.xlu0 %8055, %v8285_v55   ;;  %v8287_v56 = vpop.eup %8286 }
0x247b   :  { %v8289_v33 = vpop.eup %8288 }
0x247c   :  { %v8291_v3 = vpop.eup %8290 }
0x247d   :  { %4960 = vperm.xlu1 %8054, %v8287_v56   ;;  %v8293_v29 = vpop.eup %8292 }
0x247e   :  { %4966 = vperm.xlu0 %8055, %v8289_v33   ;;  %v8295_v52 = vpop.eup %8294 }
0x247f   :  { %v8297_v40 = vpop.eup %8296 }
0x2481   :  { %4963 = vperm.xlu1 %8054, %v8291_v3  }
0x2482   :  { %4972 = vperm.xlu0 %8055, %v8293_v29  }
0x2485   :  { %4969 = vperm.xlu1 %8054, %v8295_v52  }
0x2489   :  { %4975 = vperm.xlu1 %8054, %v8297_v40  }
0x24f8   :  { %v4955_v60 = vpop.permute.xlu1 %4954 }
0x24f9   :  { %v4958_v34 = vpop.permute.xlu0 %4957  ;;  %v4980_v35 = vrot.slane %v4955_v60, %v8781_v0 }
0x24fa   :  { %v4984_v24 = vrot.slane %v4958_v34, %v8781_v0 }
0x24fc   :  { %v4961_v51 = vpop.permute.xlu1 %4960  ;;  %v5009_v49 = vsel %vm716_vm4, %v4984_v24, %v4980_v35 }
0x24fd   :  { %v4988_v21 = vrot.slane %v4961_v51, %v8781_v0  ;;  %v4967_v31 = vpop.permute.xlu0 %4966 }
0x24fe   :  { %v4996_v63 = vrot.slane %v4967_v31, %v8781_v0 }
0x24ff   :  { %v5010_v45 = vsel %vm718_vm5, %v4988_v21, %v5009_v49 }
0x2500   :  { %v4964_v44 = vpop.permute.xlu1 %4963 }
0x2501   :  { %v4992_v20 = vrot.slane %v4964_v44, %v8781_v0  ;;  %v4973_v47 = vpop.permute.xlu0 %4972 }
0x2502   :  { %v5004_v5 = vrot.slane %v4973_v47, %v8781_v0 }
0x2503   :  { %v5011_v39 = vsel %vm720_vm6, %v4992_v20, %v5010_v45 }
0x2504   :  { %v4970_v50 = vpop.permute.xlu1 %4969  ;;  %v5012_v25 = vsel %vm722_vm7, %v4996_v63, %v5011_v39 }
0x2505   :  { %v5000_v59 = vrot.slane %v4970_v50, %v8781_v0 }
0x2507   :  { %v5013_v37 = vsel %vm724_vm8, %v5000_v59, %v5012_v25 }
0x2508   :  { %v4976_v17 = vpop.permute.xlu1 %4975  ;;  %v5014_v61 = vsel %vm726_vm9, %v5004_v5, %v5013_v37 }
0x2509   :  { %v5008_v46 = vrot.slane %v4976_v17, %v8781_v0 }
0x250b   :  { %v5015_v42 = vsel %vm728_vm10, %v5008_v46, %v5014_v61 }
0x250c   :  { %v5017_v9 = vsel %vm731_vm11, %v5015_v42, 0.0  ;;  %v9840_v42 = vld [vmem:[%s10291_s0 + $0x18] sm:$0xff] }
0x250d   :  { %5018 = vadd.xlane.f32.xlu0 %v5017_v9  ;;  %10384 = vst [vmem:[#allocation6_spill] sm:$0xff] %v9840_v42 }
0x259a   :  { %v5019_v2 = vpop.xlane.xlu0 %5018 }
0x259b   :  { %8298 = vrcp.f32 %v5019_v2 }
0x25a5   :  { %v8299_v60 = vpop.eup %8298 }
0x25a6   :  { %v5025_v34 = vrot.slane %v8299_v60, %v8714_v14  ;;  %v5029_v24 = vrot.slane %v8299_v60, %v8808_v27  ;;  %v5033_v21 = vrot.slane %v8299_v60, %v8811_v41  ;;  %v5037_v44 = vrot.slane %v8299_v60, %v8814_v43 }
0x25a7   :  { %v5041_v20 = vrot.slane %v8299_v60, %v8820_v62  ;;  %v5045_v39 = vrot.slane %v8299_v60, %v8824_v18  ;;  %v5049_v63 = vrot.slane %v8299_v60, %v8828_v26  ;;  %v5053_v50 = vrot.slane %v8299_v60, %v10381_v6 }
0x25a8   :  { %v5062_v51 = vmul.f32 %v8283_v13, %v5025_v34  ;;  %v5063_v35 = vmul.f32 %v8285_v55, %v5029_v24  ;;  %v5064_v31 = vmul.f32 %v8287_v56, %v5033_v21  ;;  %v5065_v49 = vmul.f32 %v8291_v3, %v5037_v44  ;;  %v9819_v3 = vld [vmem:[%s10291_s0 + $0x8] sm:$0xff]  ;;  %v9847_v21 = vld [vmem:[%s10291_s0 + $0x20] sm:$0xff] }
0x25a9   :  { %v5066_v45 = vmul.f32 %v8289_v33, %v5041_v20  ;;  %v5067_v13 = vmul.f32 %v8295_v52, %v5045_v39  ;;  %v5068_v55 = vmul.f32 %v8293_v29, %v5049_v63  ;;  %v5069_v56 = vmul.f32 %v8297_v40, %v5053_v50  ;;  %v9825_v52 = vld [vmem:[%s10291_s0] sm:$0xff]  ;;  %v9831_v40 = vld [vmem:[%s10291_s0 + $0x10] sm:$0xff]  ;;  %10385 = vst [vmem:[#allocation5_spill] sm:$0xff] %v9847_v21 }
0x25aa   :  { %5072 = vperm.xlu1 %8054, %v5062_v51   ;;  %10382 = vst [vmem:[#allocation18_spill] sm:$0xff] %v9825_v52  ;;  %10383 = vst [vmem:[#allocation7_spill] sm:$0xff] %v9831_v40 }
0x25ae   :  { %5077 = vperm.xlu1 %8054, %v5063_v35  }
0x25b2   :  { %5082 = vperm.xlu1 %8054, %v5064_v31  }
0x25b6   :  { %5087 = vperm.xlu1 %8054, %v5065_v49  }
0x25ba   :  { %5092 = vperm.xlu1 %8054, %v5066_v45  }
0x25be   :  { %5097 = vperm.xlu1 %8054, %v5067_v13  }
0x25c2   :  { %5102 = vperm.xlu1 %8054, %v5068_v55   ;;  %v9854_v55 = vld [vmem:[%s10291_s0 + $0x28] sm:$0xff] }
0x25c3   :  { %10386 = vst [vmem:[#allocation12_spill] sm:$0xff] %v9854_v55 }
0x25c6   :  { %5107 = vperm.xlu1 %8054, %v5069_v56  }
0x2629   :  { %v5073_v47 = vpop.permute.xlu1 %5072 }
0x262a   :  { %v5110_v29 = vmul.f32 %v9825_v52, %v5073_v47 }
0x262c   :  { %v5118_v61 = vsel %vm92_vm1, %v5110_v29, 0.0 }
0x262d   :  { %v5078_v59 = vpop.permute.xlu1 %5077  ;;  %v5119_v51 = vrot.slane %v5118_v61, 4 }
0x262e   :  { %v5111_v33 = vmul.f32 %v9819_v3, %v5078_v59 }
0x262f   :  { %v5120_v45 = vadd.f32 %v5119_v51, %v5118_v61 }
0x2630   :  { %v5125_v5 = vsel %vm92_vm1, %v5111_v33, 0.0 }
0x2631   :  { %v5083_v25 = vpop.permute.xlu1 %5082  ;;  %v5126_v2 = vrot.slane %v5125_v5, 4 }
0x2632   :  { %v5112_v37 = vmul.f32 %v9831_v40, %v5083_v25  ;;  %v5121_v25 = vrot.slane %v5120_v45, 2 }
0x2633   :  { %v5127_v44 = vadd.f32 %v5126_v2, %v5125_v5 }
0x2634   :  { %v5132_v17 = vsel %vm92_vm1, %v5112_v37, 0.0  ;;  %v5122_v51 = vadd.f32 %v5121_v25, %v5120_v45 }
0x2635   :  { %v5088_v46 = vpop.permute.xlu1 %5087  ;;  %v5133_v60 = vrot.slane %v5132_v17, 4  ;;  %v5128_v56 = vrot.slane %v5127_v44, 2 }
0x2636   :  { %v5113_v9 = vmul.f32 %v9840_v42, %v5088_v46  ;;  %v9861_v46 = vld [vmem:[%s10291_s0 + $0x30] sm:$0xff] }
0x2637   :  { %v5134_v49 = vadd.f32 %v5133_v60, %v5132_v17  ;;  %10387 = vst [vmem:[#allocation13_spill] sm:$0xff] %v9861_v46 }
0x2638   :  { %v5139_v34 = vsel %vm92_vm1, %v5113_v9, 0.0  ;;  %v5129_v9 = vadd.f32 %v5128_v56, %v5127_v44 }
0x2639   :  { %v5140_v24 = vrot.slane %v5139_v34, 4  ;;  %v5093_v35 = vpop.permute.xlu1 %5092  ;;  %v5135_v59 = vrot.slane %v5134_v49, 2 }
0x263a   :  { %v5114_v31 = vmul.f32 %v9847_v21, %v5093_v35 }
0x263b   :  { %v5141_v39 = vadd.f32 %v5140_v24, %v5139_v34  ;;  %v5136_v60 = vadd.f32 %v5135_v59, %v5134_v49  ;;  %v5123_v59 = vrot.slane %v5122_v51, 1 }
0x263c   :  { %v5146_v20 = vsel %vm92_vm1, %v5114_v31, 0.0 }
0x263d   :  { %v5147_v13 = vrot.slane %v5146_v20, 4  ;;  %v5098_v63 = vpop.permute.xlu1 %5097  ;;  %v5142_v29 = vrot.slane %v5141_v39, 2  ;;  %v5137_v56 = vrot.slane %v5136_v60, 1 }
0x263e   :  { %v5115_v50 = vmul.f32 %v9854_v55, %v5098_v63  ;;  %v9868_v63 = vld [vmem:[%s10291_s0 + $0x38] sm:$0xff]  ;;  %v5130_v55 = vrot.slane %v5129_v9, 1 }
0x263f   :  { %v5148_v47 = vadd.f32 %v5147_v13, %v5146_v20  ;;  %v5143_v24 = vadd.f32 %v5142_v29, %v5141_v39  ;;  %10388 = vst [vmem:[#allocation14_spill] sm:$0xff] %v9868_v63 }
0x2640   :  { %v5153_v33 = vsel %vm92_vm1, %v5115_v50, 0.0  ;;  %v5131_v29 = vadd.f32 %v5130_v55, %v5129_v9 }
0x2641   :  { %v5154_v37 = vrot.slane %v5153_v33, 4  ;;  %v5103_v5 = vpop.permute.xlu1 %5102  ;;  %v5149_v17 = vrot.slane %v5148_v47, 2  ;;  %v5144_v45 = vrot.slane %v5143_v24, 1 }
0x2642   :  { %v5116_v61 = vmul.f32 %v9861_v46, %v5103_v5  ;;  %v5124_v46 = vadd.f32 %v5123_v59, %v5122_v51 }
0x2643   :  { %v5155_v2 = vadd.f32 %v5154_v37, %v5153_v33  ;;  %v5150_v13 = vadd.f32 %v5149_v17, %v5148_v47  ;;  %v5145_v21 = vadd.f32 %v5144_v45, %v5143_v24 }
0x2644   :  { %v5160_v34 = vsel %vm92_vm1, %v5116_v61, 0.0  ;;  %v5138_v61 = vadd.f32 %v5137_v56, %v5136_v60 }
0x2645   :  { %v5156_v35 = vrot.slane %v5155_v2, 2  ;;  %v5161_v31 = vrot.slane %v5160_v34, 4  ;;  %v5108_v20 = vpop.permute.xlu1 %5107  ;;  %v5151_v25 = vrot.slane %v5150_v13, 1 }
0x2646   :  { %v5117_v50 = vmul.f32 %v9868_v63, %v5108_v20 }
0x2647   :  { %v5157_v5 = vadd.f32 %v5156_v35, %v5155_v2  ;;  %v5162_v44 = vadd.f32 %v5161_v31, %v5160_v34  ;;  %v5152_v63 = vadd.f32 %v5151_v25, %v5150_v13  ;;  %v5182_v2 = vsel %vm716_vm4, %v5131_v29, %v5124_v46 }
0x2648   :  { %v5167_v49 = vsel %vm92_vm1, %v5117_v50, 0.0  ;;  %v5183_v31 = vsel %vm718_vm5, %v5138_v61, %v5182_v2 }
0x2649   :  { %v5163_v39 = vrot.slane %v5162_v44, 2  ;;  %v5168_v33 = vrot.slane %v5167_v49, 4  ;;  %v5158_v47 = vrot.slane %v5157_v5, 1  ;;  %v5184_v40 = vsel %vm720_vm6, %v5145_v21, %v5183_v31 }
0x264a   :  { %v5185_v55 = vsel %vm722_vm7, %v5152_v63, %v5184_v40  ;;  %v10389_v40 = vld [vmem:[#allocation8_spill] sm:$0xff] }
0x264b   :  { %v5164_v37 = vadd.f32 %v5163_v39, %v5162_v44  ;;  %v5169_v17 = vadd.f32 %v5168_v33, %v5167_v49  ;;  %v5159_v34 = vadd.f32 %v5158_v47, %v5157_v5 }
0x264d   :  { %v5165_v42 = vrot.slane %v5164_v37, 1  ;;  %v5170_v20 = vrot.slane %v5169_v17, 2  ;;  %v5186_v60 = vsel %vm724_vm8, %v5159_v34, %v5185_v55 }
0x264f   :  { %v5171_v35 = vadd.f32 %v5170_v20, %v5169_v17  ;;  %v5166_v50 = vadd.f32 %v5165_v42, %v5164_v37 }
0x2651   :  { %v5172_v52 = vrot.slane %v5171_v35, 1  ;;  %v5187_v51 = vsel %vm726_vm9, %v5166_v50, %v5186_v60 }
0x2653   :  { %v5173_v9 = vadd.f32 %v5172_v52, %v5171_v35 }
0x2655   :  { %v5188_v24 = vsel %vm728_vm10, %v5173_v9, %v5187_v51 }
0x2656   :  { %7711 = vmatmul.mubr.msk.f32.vlgmr.msra.gmra.mrb[30].mxu1 %vm92_vm1, %v5188_v24  ;;  %5363 = vst.msk [vmem:[#allocation3 + $0x28] sm:$0xff] %vm92_vm1, %v5188_v24 }
0x2657   :  { %7984 = vmatpush3.bf16.msra.mxu1 %v8552_v12  ;;  %7732 = vmatprep.mubr.msk.f32.mxu1 %vm8423_vm3, %v10346_v57 }
0x2658   :  { %7985 = vmatprep.subr.bf16.mxu1 %v10345_v16 }
0x265b   :  { %7987 = vmatpush3.bf16.msra.mxu1 %v8587_v23 }
0x265c   :  { %7994 = vmatprep.subr.bf16.mxu1 %v10345_v16 }
0x2729   :  { %v5257_v52 = vpop.f32.mrb[30].mxu1 }
0x272a   :  { %v5261_v42 = vadd.f32 %v5257_v52, %v10389_v40  ;;  %v7712_v21 = vpop.f32.mrb[31].mxu1 }
0x272c   :  { %v5332_v46 = vadd.f32 %v9720_v36, %v5261_v42 }
0x272e   :  { %8300 = vtanh.f32 %v5332_v46  ;;  %v7206_v63 = vmul.f32 -1.442695, %v5332_v46 }
0x2730   :  { %8302 = vpow2.f32 %v7206_v63 }
0x2738   :  { %v8301_v13 = vpop.eup %8300 }
0x2739   :  { %5342 = vrot.lane.b32.xlu0 %v8301_v13, %s8427_s10 }
0x273a   :  { %v8303_v5 = vpop.eup %8302 }
0x273b   :  { %v5336_v44 = vadd.f32 1.0, %v8303_v5 }
0x273d   :  { %8304 = vrcp.f32 %v5336_v44 }
0x2747   :  { %v8305_v56 = vpop.eup %8304 }
0x2748   :  { %v5340_v45 = vmul.f32 %v8305_v56, %v9690_v10 }
0x27ab   :  { %v5343_v49 = vpop.permute.xlu0 %5342 }
0x27ac   :  { %v5345_v59 = vmul.f32 %v8305_v56, %v5343_v49 }
0x27ae   :  { %5347 = vrot.lane.b32.xlu1 %v5345_v59, %s8428_s12 }
0x2820   :  { %v5348_v39 = vpop.permute.xlu1 %5347 }
0x2821   :  { %v9892_v33 = vadd.f32 %v5348_v39, %v5340_v45 }
0x2823   :  { %8306 = vtanh.f32 %v9892_v33 }
0x282d   :  { %v8307_v36 = vpop.eup %8306 }
0x282e   :  { %5353 = vrot.lane.b32.xlu1 %v8307_v36, %s8427_s10 }
0x28a0   :  { %v5354_v25 = vpop.permute.xlu1 %5353 }
0x28a1   :  { %v5356_v29 = vmul.f32 %v8305_v56, %v5354_v25 }
0x28a3   :  { %5358 = vrot.lane.b32.xlu1 %v5356_v29, %s8428_s12 }
0x28a7   :  { %5365 = vrot.lane.b32.xlu1 %v9892_v33, %s8429_s5 }
0x2915   :  { %v5359_v47 = vpop.permute.xlu1 %5358 }
0x2916   :  { %5361 = vst.msk [vmem:[#allocation2 + $0x28] sm:$0xff] %vm92_vm1, %v5359_v47  ;;  %7744 = vmatmul.mubr.msk.f32.vlgmr.msra.gmra.mrb[32].mxu0 %vm92_vm1, %v5359_v47 }
0x2917   :  { %8002 = vmatpush3.bf16.msra.mxu0 %v8877_v58  ;;  %7765 = vmatprep.mubr.msk.f32.mxu0 %vm8423_vm3, %v10346_v57 }
0x2918   :  { %8003 = vmatprep.subr.bf16.mxu0 %v10345_v16 }
0x2919   :  { %v5366_v10 = vpop.permute.xlu1 %5365 }
0x291a   :  { %7733 = vmatmul.mubr.msk.f32.vlgmr.msra.gmra.mrb[32].mxu1 %vm92_vm1, %v5366_v10 }
0x291b   :  { %8005 = vmatpush3.bf16.msra.mxu0 %v8893_v48  ;;  %7996 = vmatpush3.bf16.msra.mxu1 %v8866_v54 }
0x291c   :  { %7997 = vmatprep.subr.bf16.mxu1 %v10345_v16  ;;  %7754 = vmatprep.mubr.msk.f32.mxu1 %vm8423_vm3, %v10346_v57 }
0x291d   :  { %8012 = vmatprep.subr.bf16.mxu0 %v10345_v16 }
0x291e   :  { %7766 = vmatmul.mubr.msk.f32.vlgmr.msra.gmra.mrb[34].mxu0 %vm92_vm1, %v5359_v47 }
0x291f   :  { %7999 = vmatpush3.bf16.msra.mxu1 %v8889_v1  ;;  %8014 = vmatpush3.bf16.msra.mxu0 %v8584_v22  ;;  %v9923_v1 = vld [vmem:[%s10296_s4] ss:$0 sm:$0xff] }
0x2920   :  { %8006 = vmatprep.subr.bf16.mxu1 %v10345_v16  ;;  %8015 = vmatprep.subr.bf16.mxu0 %v10345_v16 }
0x2921   :  { %7787 = vmatprep.mubr.msk.f32.mxu0 %vm8423_vm3, %v10346_v57 }
0x2923   :  { %8017 = vmatpush3.bf16.msra.mxu0 %v8620_v30 }
0x29e9   :  { %v5507_v54 = vpop.f32.mrb[32].mxu0 }
0x29ea   :  { %v7745_v58 = vpop.f32.mrb[33].mxu0 }
0x29ed   :  { %v5435_v48 = vpop.f32.mrb[32].mxu1 }
0x29ee   :  { %v5508_v37 = vadd.f32 %v5507_v54, %v5435_v48  ;;  %v7734_v17 = vpop.f32.mrb[33].mxu1  ;;  %v9953_v54 = vld [vmem:[%s10298_s7] ss:$0 sm:$0xff] }
0x29f0   :  { %v5511_v22 = vadd.f32 %v9923_v1, %v5508_v37 }
0x29f1   :  { %v9926_v61 = vpop.f32.mrb[34].mxu0 }
0x29f2   :  { %v5513_v20 = vcombine.high %v5511_v22, %v5511_v22  ;;  %v5520_v2 = vrot.slane %v5511_v22, %v8706_v7  ;;  %v7767_v34 = vpop.f32.mrb[35].mxu0 }
0x29f4   :  { %v5527_v30 = vrot.slane %v5513_v20, %v8706_v7  ;;  %v5528_v35 = vcombine.high %v5520_v2, %v5520_v2  ;;  %v5536_v31 = vrot.slane %v5520_v2, %v8706_v7 }
0x29f6   :  { %v5529_v50 = vcombine.high %v5527_v30, %v5527_v30  ;;  %v5543_v55 = vrot.slane %v5527_v30, %v8706_v7  ;;  %v5550_v9 = vrot.slane %v5528_v35, %v8706_v7  ;;  %v5558_v60 = vcombine.high %v5536_v31, %v5536_v31 }
0x29f7   :  { %v5565_v51 = vrot.slane %v5536_v31, %v8714_v14 }
0x29f8   :  { %v5557_v24 = vrot.slane %v5529_v50, %v8706_v7  ;;  %v5560_v52 = vcombine.high %v5550_v9, %v5550_v9  ;;  %v5569_v40 = vrot.slane %v5550_v9, %v8714_v14  ;;  %v5559_v42 = vcombine.high %v5543_v55, %v5543_v55 }
0x29f9   :  { %v5573_v21 = vrot.slane %v5558_v60, %v8714_v14  ;;  %v5581_v46 = vrot.slane %v5543_v55, %v8714_v14  ;;  %v5602_v13 = vadd.f32 %v5565_v51, %v8722_v28 }
0x29fa   :  { %v5561_v63 = vcombine.high %v5557_v24, %v5557_v24  ;;  %v5577_v5 = vrot.slane %v5560_v52, %v8714_v14  ;;  %v5585_v44 = vrot.slane %v5557_v24, %v8714_v14  ;;  %v5603_v56 = vadd.f32 %v5569_v40, %v8718_v19 }
0x29fb   :  { %v5604_v49 = vadd.f32 %v5573_v21, %v8726_v38  ;;  %v5606_v59 = vadd.f32 %v5581_v46, %v8731_v53  ;;  %8308 = vtanh.f32 %v5602_v13  ;;  %v5589_v36 = vrot.slane %v5559_v42, %v8714_v14 }
0x29fc   :  { %v5593_v45 = vrot.slane %v5561_v63, %v8714_v14  ;;  %v5605_v39 = vadd.f32 %v5577_v5, %v8724_v32  ;;  %v5607_v25 = vadd.f32 %v5585_v44, %v8742_v4  ;;  %8310 = vtanh.f32 %v5603_v56 }
0x29fd   :  { %8312 = vtanh.f32 %v5604_v49  ;;  %v5608_v47 = vadd.f32 %v5589_v36, %v8745_v8 }
0x29fe   :  { %8314 = vtanh.f32 %v5606_v59  ;;  %v5609_v29 = vadd.f32 %v5593_v45, %v8750_v15 }
0x29ff   :  { %8316 = vtanh.f32 %v5605_v39 }
0x2a00   :  { %8318 = vtanh.f32 %v5607_v25 }
0x2a01   :  { %8320 = vtanh.f32 %v5609_v29 }
0x2a02   :  { %8322 = vtanh.f32 %v5608_v47 }
0x2a05   :  { %v8309_v10 = vpop.eup %8308 }
0x2a06   :  { %v5618_v58 = vmul.f32 %v9953_v54, %v8309_v10  ;;  %v8311_v48 = vpop.eup %8310 }
0x2a07   :  { %v8313_v37 = vpop.eup %8312  ;;  %v5619_v22 = vmul.f32 %v9953_v54, %v8311_v48 }
0x2a08   :  { %v5626_v17 = vsel %vm92_vm1, %v5618_v58, 0.0  ;;  %v8315_v20 = vpop.eup %8314  ;;  %v5620_v30 = vmul.f32 %v9953_v54, %v8313_v37 }
0x2a09   :  { %5627 = vadd.xlane.f32.xlu1 %v5626_v17  ;;  %v8317_v2 = vpop.eup %8316  ;;  %v5629_v34 = vsel %vm92_vm1, %v5619_v22, 0.0  ;;  %v5622_v51 = vmul.f32 %v9953_v54, %v8315_v20 }
0x2a0a   :  { %v8319_v35 = vpop.eup %8318  ;;  %5630 = vadd.xlane.f32.xlu0 %v5629_v34  ;;  %v5621_v31 = vmul.f32 %v9953_v54, %v8317_v2  ;;  %v5632_v60 = vsel %vm92_vm1, %v5620_v30, 0.0 }
0x2a0b   :  { %v5623_v55 = vmul.f32 %v9953_v54, %v8319_v35  ;;  %v8321_v9 = vpop.eup %8320  ;;  %v5638_v42 = vsel %vm92_vm1, %v5622_v51, 0.0 }
0x2a0c   :  { %v5635_v50 = vsel %vm92_vm1, %v5621_v31, 0.0  ;;  %v8323_v24 = vpop.eup %8322  ;;  %v5625_v40 = vmul.f32 %v9953_v54, %v8321_v9 }
0x2a0d   :  { %5636 = vadd.xlane.f32.xlu1 %v5635_v50  ;;  %v5641_v52 = vsel %vm92_vm1, %v5623_v55, 0.0  ;;  %v5624_v21 = vmul.f32 %v9953_v54, %v8323_v24 }
0x2a0e   :  { %5633 = vadd.xlane.f32.xlu0 %v5632_v60  ;;  %v5647_v46 = vsel %vm92_vm1, %v5625_v40, 0.0 }
0x2a0f   :  { %v5644_v13 = vsel %vm92_vm1, %v5624_v21, 0.0 }
0x2a11   :  { %5642 = vadd.xlane.f32.xlu1 %v5641_v52 }
0x2a12   :  { %5639 = vadd.xlane.f32.xlu0 %v5638_v42 }
0x2a15   :  { %5648 = vadd.xlane.f32.xlu1 %v5647_v46 }
0x2a16   :  { %5645 = vadd.xlane.f32.xlu0 %v5644_v13 }
0x2a96   :  { %v5628_v63 = vpop.xlane.xlu1 %5627 }
0x2a97   :  { %v5631_v5 = vpop.xlane.xlu0 %5630  ;;  %v5650_v56 = vadd.f32 %v5628_v63, %v8778_v11 }
0x2a98   :  { %v5651_v44 = vadd.f32 %v5631_v5, %v8778_v11 }
0x2a99   :  { %v5669_v36 = vrot.slane %v5650_v56, %v8781_v0 }
0x2a9a   :  { %v5637_v49 = vpop.xlane.xlu1 %5636  ;;  %v5673_v59 = vrot.slane %v5651_v44, %v8781_v0 }
0x2a9b   :  { %v5634_v45 = vpop.xlane.xlu0 %5633  ;;  %v5653_v25 = vadd.f32 %v5637_v49, %v8778_v11 }
0x2a9c   :  { %v5652_v39 = vadd.f32 %v5634_v45, %v8778_v11  ;;  %v5698_v10 = vsel %vm716_vm4, %v5673_v59, %v5669_v36 }
0x2a9d   :  { %v5681_v17 = vrot.slane %v5653_v25, %v8781_v0 }
0x2a9e   :  { %v5677_v29 = vrot.slane %v5652_v39, %v8781_v0  ;;  %v5643_v47 = vpop.xlane.xlu1 %5642 }
0x2a9f   :  { %v5640_v58 = vpop.xlane.xlu0 %5639  ;;  %v5655_v22 = vadd.f32 %v5643_v47, %v8778_v11 }
0x2aa0   :  { %v5699_v48 = vsel %vm718_vm5, %v5677_v29, %v5698_v10  ;;  %v5654_v37 = vadd.f32 %v5640_v58, %v8778_v11 }
0x2aa1   :  { %v5700_v34 = vsel %vm720_vm6, %v5681_v17, %v5699_v48  ;;  %v5689_v55 = vrot.slane %v5655_v22, %v8781_v0 }
0x2aa2   :  { %v5685_v20 = vrot.slane %v5654_v37, %v8781_v0  ;;  %v5649_v2 = vpop.xlane.xlu1 %5648 }
0x2aa3   :  { %v5657_v30 = vadd.f32 %v5649_v2, %v8778_v11  ;;  %v5646_v35 = vpop.xlane.xlu0 %5645 }
0x2aa4   :  { %v5701_v31 = vsel %vm722_vm7, %v5685_v20, %v5700_v34  ;;  %v5656_v50 = vadd.f32 %v5646_v35, %v8778_v11 }
0x2aa5   :  { %v5697_v60 = vrot.slane %v5657_v30, %v8781_v0  ;;  %v5702_v51 = vsel %vm724_vm8, %v5689_v55, %v5701_v31 }
0x2aa6   :  { %v5693_v9 = vrot.slane %v5656_v50, %v8781_v0 }
0x2aa8   :  { %v5703_v24 = vsel %vm726_vm9, %v5693_v9, %v5702_v51 }
0x2aa9   :  { %v5704_v52 = vsel %vm728_vm10, %v5697_v60, %v5703_v24 }
0x2aaa   :  { %v5706_v40 = vsel %vm731_vm11, %v5704_v52, -inf }
0x2aab   :  { %5707 = vmax.xlane.f32.xlu0 %v5706_v40 }
0x2b38   :  { %v5708_v42 = vpop.xlane.xlu0 %5707 }
0x2b39   :  { %v5713_v21 = vrot.slane %v5708_v42, %v8714_v14  ;;  %v5717_v46 = vrot.slane %v5708_v42, %v8808_v27  ;;  %v5721_v13 = vrot.slane %v5708_v42, %v8811_v41  ;;  %v5733_v63 = vrot.slane %v5708_v42, %v8824_v18 }
0x2b3a   :  { %v5725_v5 = vrot.slane %v5708_v42, %v8814_v43  ;;  %v5741_v36 = vrot.slane %v5708_v42, %v10381_v6  ;;  %v5729_v58 = vrot.slane %v5708_v42, %v8820_v62  ;;  %v5737_v34 = vrot.slane %v5708_v42, %v8828_v26 }
0x2b3b   :  { %v5750_v49 = vsub.f32 %v5650_v56, %v5713_v21  ;;  %v5751_v59 = vsub.f32 %v5651_v44, %v5717_v46  ;;  %v5752_v45 = vsub.f32 %v5652_v39, %v5721_v13  ;;  %v5755_v29 = vsub.f32 %v5655_v22, %v5733_v63 }
0x2b3c   :  { %v5753_v48 = vsub.f32 %v5653_v25, %v5725_v5  ;;  %v5757_v20 = vsub.f32 %v5657_v30, %v5741_v36  ;;  %v5754_v35 = vsub.f32 %v5654_v37, %v5729_v58  ;;  %v5756_v39 = vsub.f32 %v5656_v50, %v5737_v34 }
0x2b3d   :  { %v5758_v47 = vmul.f32 1.442695, %v5750_v49  ;;  %v5760_v10 = vmul.f32 1.442695, %v5751_v59  ;;  %v5762_v17 = vmul.f32 1.442695, %v5752_v45 }
0x2b3e   :  { %v5768_v2 = vmul.f32 1.442695, %v5755_v29  ;;  %v5764_v56 = vmul.f32 1.442695, %v5753_v48  ;;  %v5772_v44 = vmul.f32 1.442695, %v5757_v20 }
0x2b3f   :  { %8324 = vpow2.f32 %v5758_v47  ;;  %v5766_v22 = vmul.f32 1.442695, %v5754_v35  ;;  %v5770_v25 = vmul.f32 1.442695, %v5756_v39 }
0x2b40   :  { %8326 = vpow2.f32 %v5760_v10 }
0x2b41   :  { %8328 = vpow2.f32 %v5762_v17 }
0x2b42   :  { %8330 = vpow2.f32 %v5768_v2 }
0x2b43   :  { %8332 = vpow2.f32 %v5764_v56 }
0x2b44   :  { %8334 = vpow2.f32 %v5772_v44 }
0x2b45   :  { %8336 = vpow2.f32 %v5766_v22 }
0x2b46   :  { %8338 = vpow2.f32 %v5770_v25 }
0x2b49   :  { %v8325_v31 = vpop.eup %8324 }
0x2b4a   :  { %v8327_v55 = vpop.eup %8326  ;;  %5783 = vperm.xlu1 %8054, %v8325_v31  }
0x2b4b   :  { %5786 = vperm.xlu0 %8055, %v8327_v55   ;;  %v8329_v30 = vpop.eup %8328 }
0x2b4c   :  { %v8331_v9 = vpop.eup %8330 }
0x2b4d   :  { %v8333_v37 = vpop.eup %8332 }
0x2b4e   :  { %5789 = vperm.xlu1 %8054, %v8329_v30   ;;  %v8335_v60 = vpop.eup %8334 }
0x2b4f   :  { %5798 = vperm.xlu0 %8055, %v8331_v9   ;;  %v8337_v51 = vpop.eup %8336 }
0x2b50   :  { %v8339_v50 = vpop.eup %8338 }
0x2b52   :  { %5792 = vperm.xlu1 %8054, %v8333_v37  }
0x2b53   :  { %5804 = vperm.xlu0 %8055, %v8335_v60  }
0x2b56   :  { %5795 = vperm.xlu1 %8054, %v8337_v51  }
0x2b5a   :  { %5801 = vperm.xlu1 %8054, %v8339_v50  }
0x2bc9   :  { %v5784_v24 = vpop.permute.xlu1 %5783 }
0x2bca   :  { %v5787_v52 = vpop.permute.xlu0 %5786  ;;  %v5809_v21 = vrot.slane %v5784_v24, %v8781_v0 }
0x2bcb   :  { %v5813_v42 = vrot.slane %v5787_v52, %v8781_v0 }
0x2bcd   :  { %v5790_v40 = vpop.permute.xlu1 %5789  ;;  %v5838_v49 = vsel %vm716_vm4, %v5813_v42, %v5809_v21 }
0x2bce   :  { %v5799_v13 = vpop.permute.xlu0 %5798  ;;  %v5817_v63 = vrot.slane %v5790_v40, %v8781_v0 }
0x2bcf   :  { %v5829_v58 = vrot.slane %v5799_v13, %v8781_v0 }
0x2bd0   :  { %v5839_v45 = vsel %vm718_vm5, %v5817_v63, %v5838_v49 }
0x2bd1   :  { %v5793_v46 = vpop.permute.xlu1 %5792 }
0x2bd2   :  { %v5821_v5 = vrot.slane %v5793_v46, %v8781_v0  ;;  %v5805_v47 = vpop.permute.xlu0 %5804 }
0x2bd3   :  { %v5837_v20 = vrot.slane %v5805_v47, %v8781_v0  ;;  %v10390_v47 = vld [vmem:[#allocation18_spill] sm:$0xff] }
0x2bd4   :  { %v5840_v29 = vsel %vm720_vm6, %v5821_v5, %v5839_v45 }
0x2bd5   :  { %v5796_v59 = vpop.permute.xlu1 %5795 }
0x2bd6   :  { %v5825_v36 = vrot.slane %v5796_v59, %v8781_v0 }
0x2bd8   :  { %v5841_v10 = vsel %vm722_vm7, %v5825_v36, %v5840_v29 }
0x2bd9   :  { %v5802_v48 = vpop.permute.xlu1 %5801  ;;  %v5842_v2 = vsel %vm724_vm8, %v5829_v58, %v5841_v10  ;;  %v10391_v10 = vld [vmem:[#allocation7_spill] sm:$0xff] }
0x2bda   :  { %v5833_v17 = vrot.slane %v5802_v48, %v8781_v0 }
0x2bdc   :  { %v5843_v34 = vsel %vm726_vm9, %v5833_v17, %v5842_v2 }
0x2bdd   :  { %v5844_v35 = vsel %vm728_vm10, %v5837_v20, %v5843_v34  ;;  %v10392_v20 = vld [vmem:[#allocation6_spill] sm:$0xff] }
0x2bde   :  { %v5846_v56 = vsel %vm731_vm11, %v5844_v35, 0.0 }
0x2bdf   :  { %5847 = vadd.xlane.f32.xlu1 %v5846_v56 }
0x2c6c   :  { %v5848_v44 = vpop.xlane.xlu1 %5847 }
0x2c6d   :  { %8340 = vrcp.f32 %v5848_v44 }
0x2c77   :  { %v8341_v39 = vpop.eup %8340 }
0x2c78   :  { %v5854_v22 = vrot.slane %v8341_v39, %v8714_v14  ;;  %v5858_v24 = vrot.slane %v8341_v39, %v8808_v27  ;;  %v5862_v40 = vrot.slane %v8341_v39, %v8811_v41  ;;  %v5866_v21 = vrot.slane %v8341_v39, %v8814_v43 }
0x2c79   :  { %v5870_v13 = vrot.slane %v8341_v39, %v8820_v62  ;;  %v5874_v5 = vrot.slane %v8341_v39, %v8824_v18  ;;  %v5878_v49 = vrot.slane %v8341_v39, %v8828_v26  ;;  %v5882_v59 = vrot.slane %v8341_v39, %v10381_v6  ;;  %v10393_v39 = vld [vmem:[#allocation5_spill] sm:$0xff] }
0x2c7a   :  { %v5891_v25 = vmul.f32 %v8325_v31, %v5854_v22  ;;  %v5892_v52 = vmul.f32 %v8327_v55, %v5858_v24  ;;  %v5893_v42 = vmul.f32 %v8329_v30, %v5862_v40  ;;  %v5894_v46 = vmul.f32 %v8333_v37, %v5866_v21 }
0x2c7b   :  { %v5895_v63 = vmul.f32 %v8337_v51, %v5870_v13  ;;  %v5896_v31 = vmul.f32 %v8331_v9, %v5874_v5  ;;  %v5897_v55 = vmul.f32 %v8339_v50, %v5878_v49  ;;  %v5898_v30 = vmul.f32 %v8335_v60, %v5882_v59  ;;  %v10394_v13 = vld [vmem:[#allocation12_spill] sm:$0xff] }
0x2c7c   :  { %5901 = vperm.xlu0 %8055, %v5891_v25  }
0x2c80   :  { %5906 = vperm.xlu0 %8055, %v5892_v52  }
0x2c84   :  { %5911 = vperm.xlu0 %8055, %v5893_v42  }
0x2c88   :  { %5916 = vperm.xlu0 %8055, %v5894_v46  }
0x2c8c   :  { %5921 = vperm.xlu0 %8055, %v5895_v63  }
0x2c90   :  { %5926 = vperm.xlu0 %8055, %v5896_v31  }
0x2c94   :  { %5931 = vperm.xlu0 %8055, %v5897_v55  }
0x2c98   :  { %5936 = vperm.xlu0 %8055, %v5898_v30  }
0x2cfb   :  { %v5902_v45 = vpop.permute.xlu0 %5901 }
0x2cfc   :  { %v5939_v51 = vmul.f32 %v10390_v47, %v5902_v45 }
0x2cfe   :  { %v5947_v50 = vsel %vm92_vm1, %v5939_v51, 0.0 }
0x2cff   :  { %v5907_v36 = vpop.permute.xlu0 %5906  ;;  %v5948_v56 = vrot.slane %v5947_v50, 4 }
0x2d00   :  { %v5940_v37 = vmul.f32 %v9819_v3, %v5907_v36 }
0x2d01   :  { %v5949_v40 = vadd.f32 %v5948_v56, %v5947_v50 }
0x2d02   :  { %v5954_v9 = vsel %vm92_vm1, %v5940_v37, 0.0 }
0x2d03   :  { %v5912_v29 = vpop.permute.xlu0 %5911  ;;  %v5955_v60 = vrot.slane %v5954_v9, 4  ;;  %v5950_v59 = vrot.slane %v5949_v40, 2 }
0x2d04   :  { %v5941_v58 = vmul.f32 %v10391_v10, %v5912_v29  ;;  %v10395_v29 = vld [vmem:[#allocation13_spill] sm:$0xff] }
0x2d05   :  { %v5956_v25 = vadd.f32 %v5955_v60, %v5954_v9 }
0x2d06   :  { %v5961_v48 = vsel %vm92_vm1, %v5941_v58, 0.0 }
0x2d07   :  { %v5917_v17 = vpop.permute.xlu0 %5916  ;;  %v5962_v34 = vrot.slane %v5961_v48, 4  ;;  %v5957_v5 = vrot.slane %v5956_v25, 2 }
0x2d08   :  { %v5942_v2 = vmul.f32 %v10392_v20, %v5917_v17 }
0x2d09   :  { %v5963_v24 = vadd.f32 %v5962_v34, %v5961_v48  ;;  %v5958_v51 = vadd.f32 %v5957_v5, %v5956_v25  ;;  %v5951_v48 = vadd.f32 %v5950_v59, %v5949_v40  ;;  %v10396_v34 = vld [vmem:[#allocation14_spill] sm:$0xff] }
0x2d0a   :  { %v5968_v35 = vsel %vm92_vm1, %v5942_v2, 0.0 }
0x2d0b   :  { %v5969_v3 = vrot.slane %v5968_v35, 4  ;;  %v5922_v44 = vpop.permute.xlu0 %5921  ;;  %v5964_v49 = vrot.slane %v5963_v24, 2  ;;  %v5959_v56 = vrot.slane %v5958_v51, 1 }
0x2d0c   :  { %v5943_v22 = vmul.f32 %v10393_v39, %v5922_v44 }
0x2d0d   :  { %v5970_v42 = vadd.f32 %v5969_v3, %v5968_v35  ;;  %v5965_v58 = vadd.f32 %v5964_v49, %v5963_v24 }
0x2d0e   :  { %v5975_v52 = vsel %vm92_vm1, %v5943_v22, 0.0 }
0x2d0f   :  { %v5976_v21 = vrot.slane %v5975_v52, 4  ;;  %v5927_v46 = vpop.permute.xlu0 %5926  ;;  %v5971_v30 = vrot.slane %v5970_v42, 2  ;;  %v5966_v39 = vrot.slane %v5965_v58, 1 }
0x2d10   :  { %v5944_v63 = vmul.f32 %v10394_v13, %v5927_v46  ;;  %v5960_v13 = vadd.f32 %v5959_v56, %v5958_v51 }
0x2d11   :  { %v5977_v31 = vadd.f32 %v5976_v21, %v5975_v52  ;;  %v5972_v17 = vadd.f32 %v5971_v30, %v5970_v42  ;;  %v5952_v52 = vrot.slane %v5951_v48, 1  ;;  %v5967_v5 = vadd.f32 %v5966_v39, %v5965_v58 }
0x2d12   :  { %v5982_v55 = vsel %vm92_vm1, %v5944_v63, 0.0 }
0x2d13   :  { %v5983_v45 = vrot.slane %v5982_v55, 4  ;;  %v5932_v36 = vpop.permute.xlu0 %5931  ;;  %v5978_v37 = vrot.slane %v5977_v31, 2  ;;  %v5973_v25 = vrot.slane %v5972_v17, 1  ;;  %v5953_v49 = vadd.f32 %v5952_v52, %v5951_v48 }
0x2d14   :  { %v5945_v47 = vmul.f32 %v10395_v29, %v5932_v36 }
0x2d15   :  { %v5984_v10 = vadd.f32 %v5983_v45, %v5982_v55  ;;  %v5979_v60 = vadd.f32 %v5978_v37, %v5977_v31  ;;  %v5974_v31 = vadd.f32 %v5973_v25, %v5972_v17  ;;  %v6011_v45 = vsel %vm716_vm4, %v5960_v13, %v5953_v49  ;;  %v6859_v25 = vld [vmem:[%s10302_s13 + $0x8] sm:$0xff] }
0x2d16   :  { %v5989_v9 = vsel %vm92_vm1, %v5945_v47, 0.0  ;;  %v6012_v29 = vsel %vm718_vm5, %v5967_v5, %v6011_v45  ;;  %v6861_v5 = vld [vmem:[%s10302_s13 + $0x18] sm:$0xff] }
0x2d17   :  { %v5985_v50 = vrot.slane %v5984_v10, 2  ;;  %v5990_v20 = vrot.slane %v5989_v9, 4  ;;  %v5937_v2 = vpop.permute.xlu0 %5936  ;;  %v5980_v46 = vrot.slane %v5979_v60, 1 }
0x2d18   :  { %v5946_v35 = vmul.f32 %v10396_v34, %v5937_v2  ;;  %v10397_v2 = vld [vmem:[#allocation10_spill] sm:$0xff] }
0x2d19   :  { %v5986_v3 = vadd.f32 %v5985_v50, %v5984_v10  ;;  %v5991_v44 = vadd.f32 %v5990_v20, %v5989_v9  ;;  %v5981_v30 = vadd.f32 %v5980_v46, %v5979_v60  ;;  %v6013_v10 = vsel %vm720_vm6, %v5974_v31, %v6012_v29  ;;  %v6871_v46 = vld [vmem:[%s10303_s14 + $0x8] sm:$0xff] }
0x2d1a   :  { %v5996_v22 = vsel %vm92_vm1, %v5946_v35, 0.0  ;;  %v6851_v29 = vld [vmem:[#allocation2 + $0x8] sm:$0xff] }
0x2d1b   :  { %v5992_v21 = vrot.slane %v5991_v44, 2  ;;  %v5997_v24 = vrot.slane %v5996_v22, 4  ;;  %v5987_v40 = vrot.slane %v5986_v3, 1  ;;  %v6014_v51 = vsel %vm722_vm7, %v5981_v30, %v6013_v10  ;;  %v6850_v30 = vld [vmem:[#allocation2] sm:$0xff]  ;;  %v6863_v10 = vld [vmem:[#allocation3 + $0x8] sm:$0xff] }
0x2d1d   :  { %v5993_v42 = vadd.f32 %v5992_v21, %v5991_v44  ;;  %v5998_v63 = vadd.f32 %v5997_v24, %v5996_v22  ;;  %v5988_v36 = vadd.f32 %v5987_v40, %v5986_v3 }
0x2d1f   :  { %v5994_v55 = vrot.slane %v5993_v42, 1  ;;  %v5999_v59 = vrot.slane %v5998_v63, 2  ;;  %v6015_v58 = vsel %vm724_vm8, %v5988_v36, %v6014_v51  ;;  %v6864_v51 = vld [vmem:[#allocation3 + $0x10] sm:$0xff] }
0x2d21   :  { %v6000_v37 = vadd.f32 %v5999_v59, %v5998_v63  ;;  %v5995_v47 = vadd.f32 %v5994_v55, %v5993_v42  ;;  %v6860_v63 = vld [vmem:[%s10302_s13 + $0x10] sm:$0xff]  ;;  %v6873_v59 = vld [vmem:[%s10303_s14 + $0x18] sm:$0xff] }
0x2d22   :  { %v8030_v49 = vpack.c.bf16 %v6861_v5, %v6860_v63  ;;  %v6872_v55 = vld [vmem:[%s10303_s14 + $0x10] sm:$0xff] }
0x2d23   :  { %v6001_v9 = vrot.slane %v6000_v37, 1  ;;  %v6016_v48 = vsel %vm726_vm9, %v5995_v47, %v6015_v58  ;;  %v8022_v45 = vpack.c.bf16 %v6873_v59, %v6872_v55  ;;  %v6852_v47 = vld [vmem:[#allocation2 + $0x10] sm:$0xff]  ;;  %v6865_v58 = vld [vmem:[#allocation3 + $0x18] sm:$0xff] }
0x2d25   :  { %v6002_v50 = vadd.f32 %v6001_v9, %v6000_v37  ;;  %v6862_v37 = vld [vmem:[#allocation3] sm:$0xff]  ;;  %v6853_v9 = vld [vmem:[#allocation2 + $0x18] sm:$0xff] }
0x2d27   :  { %v6017_v17 = vsel %vm728_vm10, %v6002_v50, %v6016_v48  ;;  %v6854_v50 = vld [vmem:[#allocation2 + $0x20] sm:$0xff]  ;;  %v6855_v48 = vld [vmem:[#allocation2 + $0x28] sm:$0xff] }
0x2d28   :  { %7755 = vmatmul.mubr.msk.f32.vlgmr.msra.gmra.mrb[34].mxu1 %vm92_vm1, %v6017_v17  ;;  %6192 = vst.msk [vmem:[#allocation3 + $0x30] sm:$0xff] %vm92_vm1, %v6017_v17  ;;  %v6866_v17 = vld [vmem:[#allocation3 + $0x20] sm:$0xff] }
0x2d29   :  { %8008 = vmatpush3.bf16.msra.mxu1 %v8552_v12  ;;  %7776 = vmatprep.mubr.msk.f32.mxu1 %vm8423_vm3, %v10346_v57 }
0x2d2a   :  { %8009 = vmatprep.subr.bf16.mxu1 %v10345_v16 }
0x2d2d   :  { %8011 = vmatpush3.bf16.msra.mxu1 %v8587_v23 }
0x2dfb   :  { %v6086_v20 = vpop.f32.mrb[34].mxu1 }
0x2dfc   :  { %v6090_v60 = vadd.f32 %v6086_v20, %v10397_v2  ;;  %v7756_v34 = vpop.f32.mrb[35].mxu1  ;;  %v6867_v20 = vld [vmem:[#allocation3 + $0x28] sm:$0xff]  ;;  %v6868_v2 = vld [vmem:[#allocation3 + $0x30] sm:$0xff] }
0x2dfe   :  { %v6161_v35 = vadd.f32 %v9926_v61, %v6090_v60  ;;  %v6858_v61 = vld [vmem:[%s10302_s13] sm:$0xff] }
0x2dff   :  { %v8026_v21 = vpack.c.bf16 %v6859_v25, %v6858_v61 }
0x2e00   :  { %8342 = vtanh.f32 %v6161_v35  ;;  %v7211_v3 = vmul.f32 -1.442695, %v6161_v35 }
0x2e01   :  { %8027 = vmatprep.subr.bf16.mxu0 %v8026_v21 }
0x2e02   :  { %8344 = vpow2.f32 %v7211_v3 }
0x2e0a   :  { %v8343_v56 = vpop.eup %8342 }
0x2e0b   :  { %6171 = vrot.lane.b32.xlu0 %v8343_v56, %s8427_s10 }
0x2e0c   :  { %v8345_v12 = vpop.eup %8344 }
0x2e0d   :  { %v6165_v44 = vadd.f32 1.0, %v8345_v12 }
0x2e0f   :  { %8346 = vrcp.f32 %v6165_v44 }
0x2e19   :  { %v8347_v57 = vpop.eup %8346 }
0x2e1a   :  { %v6169_v23 = vmul.f32 %v8347_v57, %v9892_v33  ;;  %v6870_v33 = vld [vmem:[%s10303_s14] sm:$0xff] }
0x2e1b   :  { %v8018_v13 = vpack.c.bf16 %v6871_v46, %v6870_v33 }
0x2e1d   :  { %8019 = vmatprep.subr.bf16.mxu1 %v8018_v13 }
0x2e7d   :  { %v6172_v39 = vpop.permute.xlu0 %6171 }
0x2e7e   :  { %v6174_v16 = vmul.f32 %v8347_v57, %v6172_v39 }
0x2e80   :  { %6176 = vrot.lane.b32.xlu1 %v6174_v16, %s8428_s12 }
0x2ef2   :  { %v6177_v22 = vpop.permute.xlu1 %6176 }
0x2ef3   :  { %v6179_v52 = vadd.f32 %v6177_v22, %v6169_v23 }
0x2ef5   :  { %8348 = vtanh.f32 %v6179_v52 }
0x2eff   :  { %v8349_v24 = vpop.eup %8348 }
0x2f00   :  { %6182 = vrot.lane.b32.xlu0 %v8349_v24, %s8427_s10 }
0x2f72   :  { %v6183_v40 = vpop.permute.xlu0 %6182 }
0x2f73   :  { %v6185_v42 = vmul.f32 %v8347_v57, %v6183_v40 }
0x2f75   :  { %6187 = vrot.lane.b32.xlu0 %v6185_v42, %s8428_s12 }
0x2f79   :  { %6194 = vrot.lane.b32.xlu0 %v6179_v52, %s8429_s5 }
0x2fe7   :  { %v6188_v31 = vpop.permute.xlu0 %6187 }
0x2fe8   :  { %6190 = vst.msk [vmem:[#allocation2 + $0x30] sm:$0xff] %vm92_vm1, %v6188_v31  ;;  %6832 = vst.msk [vmem:[#allocation2 + $0x38] sm:$0xff] %vm92_vm1, %v6188_v31  ;;  %7788 = vmatmul.mubr.msk.f32.vlgmr.msra.gmra.mrb[36].mxu0 %vm92_vm1, %v6188_v31 }
0x2fe9   :  { %8029 = vmatpush3.bf16.msra.mxu0 %v8026_v21  ;;  %7818 = vmatprep.mubr.msk.f32.mxu0 %vm92_vm1, %v6850_v30 }
0x2fea   :  { %8031 = vmatprep.subr.bf16.mxu0 %v8030_v49 }
0x2feb   :  { %v6195_v36 = vpop.permute.xlu0 %6194 }
0x2fec   :  { %7777 = vmatmul.mubr.msk.f32.vlgmr.msra.gmra.mrb[36].mxu1 %vm92_vm1, %v6195_v36 }
0x2fed   :  { %8021 = vmatpush3.bf16.msra.mxu1 %v8018_v13  ;;  %8033 = vmatpush3.bf16.msra.mxu0 %v8030_v49 }
0x2fee   :  { %7798 = vmatprep.mubr.msk.f32.mxu1 %vm92_vm1, %v6862_v37  ;;  %8023 = vmatprep.subr.bf16.mxu1 %v8022_v45 }
0x2ff0   :  { %7819 = vmatmul.mubr.msk.f32.vlgmr.msra.gmra.mrb[38].mxu0 %vm92_vm1, %v6851_v29 }
0x2ff1   :  { %8025 = vmatpush3.bf16.msra.mxu1 %v8022_v45  ;;  %7821 = vmatprep.mubr.msk.f32.mxu0 %vm92_vm1, %v6852_v47 }
0x2ff2   :  { %8034 = vmatprep.subr.bf16.mxu1 %v8026_v21 }
0x2ff4   :  { %7799 = vmatmul.mubr.msk.f32.vlgmr.msra.gmra.mrb[38].mxu1 %vm92_vm1, %v6863_v10  ;;  %7822 = vmatmul.mubr.msk.f32.gmra.mrb[40].mxu0 %vm92_vm1, %v6853_v9 }
0x2ff5   :  { %7801 = vmatprep.mubr.msk.f32.mxu1 %vm92_vm1, %v6864_v51  ;;  %7824 = vmatprep.mubr.msk.f32.mxu0 %vm92_vm1, %v6854_v50 }
0x2ff6   :  { %8036 = vmatpush3.bf16.msra.mxu1 %v8026_v21 }
0x2ff7   :  { %8035 = vmatprep.subr.bf16.mxu1 %v8030_v49 }
0x2ff8   :  { %7802 = vmatmul.mubr.msk.f32.gmra.mrb[40].mxu1 %vm92_vm1, %v6865_v58  ;;  %7825 = vmatmul.mubr.msk.f32.gmra.mrb[42].mxu0 %vm92_vm1, %v6855_v48 }
0x2ff9   :  { %7804 = vmatprep.mubr.msk.f32.mxu1 %vm92_vm1, %v6866_v17 }
0x2ffa   :  { %8037 = vmatpush3.bf16.msra.mxu1 %v8030_v49 }
0x2ffc   :  { %7805 = vmatmul.mubr.msk.f32.gmra.mrb[42].mxu1 %vm92_vm1, %v6867_v20 }
0x2ffd   :  { %7807 = vmatprep.mubr.msk.f32.mxu1 %vm92_vm1, %v6868_v2 }
0x30bb   :  { %v6336_v60 = vpop.f32.mrb[36].mxu0 }
0x30bc   :  { %v7789_v34 = vpop.f32.mrb[37].mxu0 }
0x30bf   :  { %v6264_v35 = vpop.f32.mrb[36].mxu1 }
0x30c0   :  { %v6337_v56 = vadd.f32 %v6336_v60, %v6264_v35  ;;  %v7778_v3 = vpop.f32.mrb[37].mxu1 }
0x30c2   :  { %v6340_v12 = vadd.f32 %v9923_v1, %v6337_v56  ;;  %v10115_v1 = vld [vmem:[%s10304_s15] ss:$0 sm:$0xff] }
0x30c3   :  { %v7820_v44 = vpop.f32.mrb[38].mxu0 }
0x30c4   :  { %v6342_v57 = vcombine.high %v6340_v12, %v6340_v12  ;;  %v6349_v39 = vrot.slane %v6340_v12, %v8706_v7  ;;  %v7093_v16 = vpop.f32.mrb[39].mxu0 }
0x30c6   :  { %v6356_v23 = vrot.slane %v6342_v57, %v8706_v7  ;;  %v6357_v22 = vcombine.high %v6349_v39, %v6349_v39  ;;  %v6365_v52 = vrot.slane %v6349_v39, %v8706_v7 }
0x30c7   :  { %v7800_v61 = vpop.f32.mrb[38].mxu1  ;;  %v7823_v25 = vpop.f32.mrb[40].mxu0 }
0x30c8   :  { %v6358_v21 = vcombine.high %v6356_v23, %v6356_v23  ;;  %v6372_v24 = vrot.slane %v6356_v23, %v8706_v7  ;;  %v6379_v33 = vrot.slane %v6357_v22, %v8706_v7  ;;  %v6387_v46 = vcombine.high %v6365_v52, %v6365_v52  ;;  %v6964_v13 = vpop.f32.mrb[39].mxu1  ;;  %v7103_v40 = vpop.f32.mrb[41].mxu0 }
0x30c9   :  { %v6394_v42 = vrot.slane %v6365_v52, %v8714_v14  ;;  %v7099_v63 = vadd.f32 %v7820_v44, %v7800_v61  ;;  %v7094_v5 = vadd.f32 %v7093_v16, %v6964_v13 }
0x30ca   :  { %v6386_v49 = vrot.slane %v6358_v21, %v8706_v7  ;;  %v6388_v31 = vcombine.high %v6372_v24, %v6372_v24  ;;  %v6389_v55 = vcombine.high %v6379_v33, %v6379_v33  ;;  %v6398_v59 = vrot.slane %v6379_v33, %v8714_v14 }
0x30cb   :  { %v6402_v30 = vrot.slane %v6387_v46, %v8714_v14  ;;  %v6410_v45 = vrot.slane %v6372_v24, %v8714_v14  ;;  %v6431_v36 = vadd.f32 %v6394_v42, %v8722_v28  ;;  %v7140_v37 = vadd.f32 %v10115_v1, %v7099_v63  ;;  %v7803_v29 = vpop.f32.mrb[40].mxu1  ;;  %v7826_v47 = vpop.f32.mrb[42].mxu0 }
0x30cc   :  { %v6390_v10 = vcombine.high %v6386_v49, %v6386_v49  ;;  %v6406_v9 = vrot.slane %v6389_v55, %v8714_v14  ;;  %v6414_v51 = vrot.slane %v6386_v49, %v8714_v14  ;;  %v6974_v7 = vpop.f32.mrb[41].mxu1  ;;  %v7113_v50 = vpop.f32.mrb[43].mxu0  ;;  %v6432_v58 = vadd.f32 %v6398_v59, %v8718_v19 }
0x30cd   :  { %v6433_v48 = vadd.f32 %v6402_v30, %v8726_v38  ;;  %v6435_v17 = vadd.f32 %v6410_v45, %v8731_v53  ;;  %8350 = vtanh.f32 %v6431_v36  ;;  %7148 = vst.msk [vmem:[%s10305_s16 + $0x8] sm:$0xff] %vm238_vm2, %v7140_v37  ;;  %v6418_v28 = vrot.slane %v6388_v31, %v8714_v14 }
0x30ce   :  { %v6422_v20 = vrot.slane %v6390_v10, %v8714_v14  ;;  %v6436_v2 = vadd.f32 %v6414_v51, %v8742_v4  ;;  %8352 = vtanh.f32 %v6432_v58  ;;  %v7139_v60 = vadd.f32 %v10115_v1, %v7094_v5 }
0x30cf   :  { %v7109_v19 = vadd.f32 %v7823_v25, %v7803_v29  ;;  %v7104_v34 = vadd.f32 %v7103_v40, %v6974_v7  ;;  %v7806_v38 = vpop.f32.mrb[42].mxu1  ;;  %v6434_v53 = vadd.f32 %v6406_v9, %v8724_v32  ;;  %8354 = vtanh.f32 %v6433_v48 }
0x30d0   :  { %v7119_v35 = vadd.f32 %v7826_v47, %v7806_v38  ;;  %v6984_v56 = vpop.f32.mrb[43].mxu1  ;;  %v6438_v3 = vadd.f32 %v6422_v20, %v8750_v15  ;;  %8356 = vtanh.f32 %v6435_v17  ;;  %7147 = vst.msk [vmem:[%s10305_s16] sm:$0xff] %vm238_vm2, %v7139_v60  ;;  %v6437_v15 = vadd.f32 %v6418_v28, %v8745_v8 }
0x30d1   :  { %v7142_v4 = vadd.f32 %v10115_v1, %v7109_v19  ;;  %v7141_v12 = vadd.f32 %v10115_v1, %v7104_v34  ;;  %v7114_v44 = vadd.f32 %v7113_v50, %v6984_v56  ;;  %8358 = vtanh.f32 %v6436_v2 }
0x30d2   :  { %v7144_v57 = vadd.f32 %v10115_v1, %v7119_v35  ;;  %8360 = vtanh.f32 %v6438_v3 }
0x30d3   :  { %7150 = vst.msk [vmem:[%s10305_s16 + $0x18] sm:$0xff] %vm238_vm2, %v7142_v4  ;;  %7149 = vst.msk [vmem:[%s10305_s16 + $0x10] sm:$0xff] %vm238_vm2, %v7141_v12  ;;  %v7143_v32 = vadd.f32 %v10115_v1, %v7114_v44  ;;  %8362 = vtanh.f32 %v6434_v53 }
0x30d4   :  { %7152 = vst.msk [vmem:[%s10305_s16 + $0x28] sm:$0xff] %vm238_vm2, %v7144_v57  ;;  %8364 = vtanh.f32 %v6437_v15 }
0x30d5   :  { %7151 = vst.msk [vmem:[%s10305_s16 + $0x20] sm:$0xff] %vm238_vm2, %v7143_v32 }
0x30d7   :  { %v8351_v39 = vpop.eup %8350 }
0x30d8   :  { %v6447_v16 = vmul.f32 %v9953_v54, %v8351_v39  ;;  %v8353_v23 = vpop.eup %8352 }
0x30d9   :  { %v8355_v22 = vpop.eup %8354  ;;  %v6448_v61 = vmul.f32 %v9953_v54, %v8353_v23 }
0x30da   :  { %v6455_v52 = vsel %vm92_vm1, %v6447_v16, 0.0  ;;  %v8357_v25 = vpop.eup %8356  ;;  %v6449_v8 = vmul.f32 %v9953_v54, %v8355_v22 }
0x30db   :  { %6456 = vadd.xlane.f32.xlu0 %v6455_v52  ;;  %v8359_v21 = vpop.eup %8358  ;;  %v6458_v24 = vsel %vm92_vm1, %v6448_v61, 0.0  ;;  %v6451_v40 = vmul.f32 %v9953_v54, %v8357_v25 }
0x30dc   :  { %v8361_v33 = vpop.eup %8360  ;;  %6459 = vadd.xlane.f32.xlu1 %v6458_v24  ;;  %v6452_v46 = vmul.f32 %v9953_v54, %v8359_v21  ;;  %v6461_v13 = vsel %vm92_vm1, %v6449_v8, 0.0 }
0x30dd   :  { %v8363_v42 = vpop.eup %8362  ;;  %v6454_v5 = vmul.f32 %v9953_v54, %v8361_v33  ;;  %v6467_v49 = vsel %vm92_vm1, %v6451_v40, 0.0 }
0x30de   :  { %v6470_v63 = vsel %vm92_vm1, %v6452_v46, 0.0  ;;  %v6450_v31 = vmul.f32 %v9953_v54, %v8363_v42  ;;  %v8365_v55 = vpop.eup %8364 }
0x30df   :  { %6462 = vadd.xlane.f32.xlu0 %v6461_v13  ;;  %v6476_v59 = vsel %vm92_vm1, %v6454_v5, 0.0  ;;  %v6453_v45 = vmul.f32 %v9953_v54, %v8365_v55 }
0x30e0   :  { %6471 = vadd.xlane.f32.xlu1 %v6470_v63  ;;  %v6464_v30 = vsel %vm92_vm1, %v6450_v31, 0.0 }
0x30e1   :  { %v6473_v36 = vsel %vm92_vm1, %v6453_v45, 0.0 }
0x30e3   :  { %6468 = vadd.xlane.f32.xlu0 %v6467_v49 }
0x30e4   :  { %6477 = vadd.xlane.f32.xlu1 %v6476_v59 }
0x30e7   :  { %6465 = vadd.xlane.f32.xlu0 %v6464_v30 }
0x30eb   :  { %6474 = vadd.xlane.f32.xlu0 %v6473_v36 }
0x3168   :  { %v6457_v37 = vpop.xlane.xlu0 %6456 }
0x3169   :  { %v6460_v29 = vpop.xlane.xlu1 %6459  ;;  %v6479_v9 = vadd.f32 %v6457_v37, %v8778_v11 }
0x316a   :  { %v6480_v10 = vadd.f32 %v6460_v29, %v8778_v11 }
0x316b   :  { %v6498_v48 = vrot.slane %v6479_v9, %v8781_v0 }
0x316c   :  { %v6463_v47 = vpop.xlane.xlu0 %6462  ;;  %v6502_v58 = vrot.slane %v6480_v10, %v8781_v0 }
0x316d   :  { %v6472_v51 = vpop.xlane.xlu1 %6471  ;;  %v6481_v7 = vadd.f32 %v6463_v47, %v8778_v11 }
0x316e   :  { %v6527_v20 = vsel %vm716_vm4, %v6502_v58, %v6498_v48  ;;  %v6484_v2 = vadd.f32 %v6472_v51, %v8778_v11 }
0x316f   :  { %v6506_v54 = vrot.slane %v6481_v7, %v8781_v0 }
0x3170   :  { %v6469_v50 = vpop.xlane.xlu0 %6468  ;;  %v6518_v3 = vrot.slane %v6484_v2, %v8781_v0 }
0x3171   :  { %v6483_v17 = vadd.f32 %v6469_v50, %v8778_v11  ;;  %v6478_v60 = vpop.xlane.xlu1 %6477  ;;  %v6528_v38 = vsel %vm718_vm5, %v6506_v54, %v6527_v20 }
0x3172   :  { %v6486_v35 = vadd.f32 %v6478_v60, %v8778_v11 }
0x3173   :  { %v6514_v53 = vrot.slane %v6483_v17, %v8781_v0 }
0x3174   :  { %v6466_v28 = vpop.xlane.xlu0 %6465  ;;  %v6526_v15 = vrot.slane %v6486_v35, %v8781_v0 }
0x3175   :  { %v6482_v19 = vadd.f32 %v6466_v28, %v8778_v11 }
0x3177   :  { %v6510_v34 = vrot.slane %v6482_v19, %v8781_v0 }
0x3178   :  { %v6475_v56 = vpop.xlane.xlu0 %6474 }
0x3179   :  { %v6529_v4 = vsel %vm720_vm6, %v6510_v34, %v6528_v38  ;;  %v6485_v12 = vadd.f32 %v6475_v56, %v8778_v11 }
0x317a   :  { %v6530_v44 = vsel %vm722_vm7, %v6514_v53, %v6529_v4 }
0x317b   :  { %v6522_v57 = vrot.slane %v6485_v12, %v8781_v0  ;;  %v6531_v32 = vsel %vm724_vm8, %v6518_v3, %v6530_v44 }
0x317d   :  { %v6532_v39 = vsel %vm726_vm9, %v6522_v57, %v6531_v32 }
0x317e   :  { %v6533_v16 = vsel %vm728_vm10, %v6526_v15, %v6532_v39 }
0x317f   :  { %v6535_v23 = vsel %vm731_vm11, %v6533_v16, -inf }
0x3180   :  { %6536 = vmax.xlane.f32.xlu0 %v6535_v23 }
0x320d   :  { %v6537_v22 = vpop.xlane.xlu0 %6536 }
0x320e   :  { %v6542_v52 = vrot.slane %v6537_v22, %v8714_v14  ;;  %v6546_v11 = vrot.slane %v6537_v22, %v8808_v27  ;;  %v6550_v61 = vrot.slane %v6537_v22, %v8811_v41  ;;  %v6558_v25 = vrot.slane %v6537_v22, %v8820_v62 }
0x320f   :  { %v6554_v8 = vrot.slane %v6537_v22, %v8814_v43  ;;  %v6566_v46 = vrot.slane %v6537_v22, %v8828_v26  ;;  %v6562_v63 = vrot.slane %v6537_v22, %v8824_v18  ;;  %v6570_v59 = vrot.slane %v6537_v22, %v10381_v6 }
0x3210   :  { %v6579_v21 = vsub.f32 %v6479_v9, %v6542_v52  ;;  %v6580_v24 = vsub.f32 %v6480_v10, %v6546_v11  ;;  %v6581_v33 = vsub.f32 %v6481_v7, %v6550_v61  ;;  %v6583_v13 = vsub.f32 %v6483_v17, %v6558_v25 }
0x3211   :  { %v6582_v5 = vsub.f32 %v6482_v19, %v6554_v8  ;;  %v6585_v31 = vsub.f32 %v6485_v12, %v6566_v46  ;;  %v6584_v30 = vsub.f32 %v6484_v2, %v6562_v63  ;;  %v6586_v37 = vsub.f32 %v6486_v35, %v6570_v59 }
0x3212   :  { %v6587_v40 = vmul.f32 1.442695, %v6579_v21  ;;  %v6589_v42 = vmul.f32 1.442695, %v6580_v24  ;;  %v6591_v49 = vmul.f32 1.442695, %v6581_v33 }
0x3213   :  { %v6595_v55 = vmul.f32 1.442695, %v6583_v13  ;;  %v6593_v45 = vmul.f32 1.442695, %v6582_v5  ;;  %v6599_v36 = vmul.f32 1.442695, %v6585_v31 }
0x3214   :  { %8366 = vpow2.f32 %v6587_v40  ;;  %v6597_v29 = vmul.f32 1.442695, %v6584_v30  ;;  %v6601_v9 = vmul.f32 1.442695, %v6586_v37 }
0x3215   :  { %8368 = vpow2.f32 %v6589_v42 }
0x3216   :  { %8370 = vpow2.f32 %v6591_v49 }
0x3217   :  { %8372 = vpow2.f32 %v6595_v55 }
0x3218   :  { %8374 = vpow2.f32 %v6593_v45 }
0x3219   :  { %8376 = vpow2.f32 %v6599_v36 }
0x321a   :  { %8378 = vpow2.f32 %v6597_v29 }
0x321b   :  { %8380 = vpow2.f32 %v6601_v9 }
0x321e   :  { %v8367_v47 = vpop.eup %8366 }
0x321f   :  { %v8369_v10 = vpop.eup %8368  ;;  %6612 = vperm.xlu1 %8054, %v8367_v47  }
0x3220   :  { %6615 = vperm.xlu0 %8055, %v8369_v10   ;;  %v8371_v51 = vpop.eup %8370 }
0x3221   :  { %v8373_v7 = vpop.eup %8372 }
0x3222   :  { %v8375_v50 = vpop.eup %8374 }
0x3223   :  { %6618 = vperm.xlu1 %8054, %v8371_v51   ;;  %v8377_v58 = vpop.eup %8376 }
0x3224   :  { %6624 = vperm.xlu0 %8055, %v8373_v7   ;;  %v8379_v48 = vpop.eup %8378 }
0x3225   :  { %v8381_v54 = vpop.eup %8380 }
0x3227   :  { %6621 = vperm.xlu1 %8054, %v8375_v50  }
0x3228   :  { %6630 = vperm.xlu0 %8055, %v8377_v58  }
0x322b   :  { %6627 = vperm.xlu1 %8054, %v8379_v48  }
0x322f   :  { %6633 = vperm.xlu1 %8054, %v8381_v54  }
0x329e   :  { %v6613_v17 = vpop.permute.xlu1 %6612 }
0x329f   :  { %v6616_v28 = vpop.permute.xlu0 %6615  ;;  %v6638_v60 = vrot.slane %v6613_v17, %v8781_v0  ;;  %v8418_v17 = vld [vmem:[%s10291_s0 + $0x20] sm:$0xff] }
0x32a0   :  { %v6642_v2 = vrot.slane %v6616_v28, %v8781_v0 }
0x32a2   :  { %v6619_v20 = vpop.permute.xlu1 %6618  ;;  %v6667_v53 = vsel %vm716_vm4, %v6642_v2, %v6638_v60 }
0x32a3   :  { %v6646_v19 = vrot.slane %v6619_v20, %v8781_v0  ;;  %v6625_v34 = vpop.permute.xlu0 %6624 }
0x32a4   :  { %v6654_v4 = vrot.slane %v6625_v34, %v8781_v0 }
0x32a5   :  { %v6668_v56 = vsel %vm718_vm5, %v6646_v19, %v6667_v53 }
0x32a6   :  { %v6622_v38 = vpop.permute.xlu1 %6621 }
0x32a7   :  { %v6650_v35 = vrot.slane %v6622_v38, %v8781_v0  ;;  %v6631_v44 = vpop.permute.xlu0 %6630 }
0x32a8   :  { %v6662_v39 = vrot.slane %v6631_v44, %v8781_v0 }
0x32a9   :  { %v6669_v3 = vsel %vm720_vm6, %v6650_v35, %v6668_v56  ;;  %v8419_v35 = vld [vmem:[%s10291_s0 + $0x28] sm:$0xff] }
0x32aa   :  { %v6628_v12 = vpop.permute.xlu1 %6627  ;;  %v6670_v32 = vsel %vm722_vm7, %v6654_v4, %v6669_v3 }
0x32ab   :  { %v6658_v57 = vrot.slane %v6628_v12, %v8781_v0 }
0x32ad   :  { %v6671_v15 = vsel %vm724_vm8, %v6658_v57, %v6670_v32 }
0x32ae   :  { %v6634_v16 = vpop.permute.xlu1 %6633  ;;  %v6672_v22 = vsel %vm726_vm9, %v6662_v39, %v6671_v15 }
0x32af   :  { %v6666_v23 = vrot.slane %v6634_v16, %v8781_v0 }
0x32b1   :  { %v6673_v52 = vsel %vm728_vm10, %v6666_v23, %v6672_v22  ;;  %v8420_v23 = vld [vmem:[%s10291_s0 + $0x30] sm:$0xff] }
0x32b2   :  { %v6675_v11 = vsel %vm731_vm11, %v6673_v52, 0.0 }
0x32b3   :  { %6676 = vadd.xlane.f32.xlu0 %v6675_v11 }
0x3340   :  { %v6677_v61 = vpop.xlane.xlu0 %6676 }
0x3341   :  { %8382 = vrcp.f32 %v6677_v61 }
0x334b   :  { %v8383_v25 = vpop.eup %8382 }
0x334c   :  { %v6683_v8 = vrot.slane %v8383_v25, %v8714_v14  ;;  %v6687_v24 = vrot.slane %v8383_v25, %v8808_v27  ;;  %v6691_v46 = vrot.slane %v8383_v25, %v8811_v41  ;;  %v6695_v13 = vrot.slane %v8383_v25, %v8814_v43 }
0x334d   :  { %v6699_v42 = vrot.slane %v8383_v25, %v8820_v62  ;;  %v6703_v5 = vrot.slane %v8383_v25, %v8824_v18  ;;  %v6707_v27 = vrot.slane %v8383_v25, %v8828_v26  ;;  %v6711_v41 = vrot.slane %v8383_v25, %v10381_v6  ;;  %v8414_v62 = vld [vmem:[%s10291_s0 + $0x8] sm:$0xff]  ;;  %v8415_v18 = vld [vmem:[%s10291_s0] sm:$0xff]  ;;  %v8416_v6 = vld [vmem:[%s10291_s0 + $0x10] sm:$0xff] }
0x334e   :  { %v6720_v21 = vmul.f32 %v8367_v47, %v6683_v8  ;;  %v6721_v33 = vmul.f32 %v8369_v10, %v6687_v24  ;;  %v6722_v0 = vmul.f32 %v8371_v51, %v6691_v46  ;;  %v6723_v40 = vmul.f32 %v8375_v50, %v6695_v13  ;;  %v8417_v10 = vld [vmem:[%s10291_s0 + $0x18] sm:$0xff] }
0x334f   :  { %v6724_v63 = vmul.f32 %v8373_v7, %v6699_v42  ;;  %v6725_v14 = vmul.f32 %v8379_v48, %v6703_v5  ;;  %v6726_v49 = vmul.f32 %v8377_v58, %v6707_v27  ;;  %v6727_v31 = vmul.f32 %v8381_v54, %v6711_v41  ;;  %v8421_v13 = vld [vmem:[%s10291_s0 + $0x38] sm:$0xff] }
0x3350   :  { %6730 = vperm.xlu1 %8054, %v6720_v21  }
0x3354   :  { %6735 = vperm.xlu1 %8054, %v6721_v33  }
0x3358   :  { %6740 = vperm.xlu1 %8054, %v6722_v0  }
0x335c   :  { %6745 = vperm.xlu1 %8054, %v6723_v40  }
0x3360   :  { %6750 = vperm.xlu1 %8054, %v6724_v63  }
0x3364   :  { %6755 = vperm.xlu1 %8054, %v6725_v14  }
0x3368   :  { %6760 = vperm.xlu1 %8054, %v6726_v49  }
0x336c   :  { %6765 = vperm.xlu1 %8054, %v6727_v31  }
0x33cf   :  { %v6731_v43 = vpop.permute.xlu1 %6730 }
0x33d0   :  { %v6768_v26 = vmul.f32 %v8415_v18, %v6731_v43 }
0x33d2   :  { %v6776_v47 = vsel %vm92_vm1, %v6768_v26, 0.0 }
0x33d3   :  { %v6736_v55 = vpop.permute.xlu1 %6735  ;;  %v6777_v58 = vrot.slane %v6776_v47, 4 }
0x33d4   :  { %v6769_v59 = vmul.f32 %v8414_v62, %v6736_v55 }
0x33d5   :  { %v6778_v19 = vadd.f32 %v6777_v58, %v6776_v47 }
0x33d6   :  { %v6783_v36 = vsel %vm92_vm1, %v6769_v59, 0.0 }
0x33d7   :  { %v6741_v30 = vpop.permute.xlu1 %6740  ;;  %v6784_v51 = vrot.slane %v6783_v36, 4  ;;  %v6779_v57 = vrot.slane %v6778_v19, 2 }
0x33d8   :  { %v6770_v45 = vmul.f32 %v8416_v6, %v6741_v30 }
0x33d9   :  { %v6785_v20 = vadd.f32 %v6784_v51, %v6783_v36  ;;  %v6780_v8 = vadd.f32 %v6779_v57, %v6778_v19  ;;  %v6857_v19 = vld [vmem:[#allocation2 + $0x38] sm:$0xff] }
0x33da   :  { %v6790_v37 = vsel %vm92_vm1, %v6770_v45, 0.0 }
0x33db   :  { %v6746_v29 = vpop.permute.xlu1 %6745  ;;  %v6791_v7 = vrot.slane %v6790_v37, 4  ;;  %v6786_v3 = vrot.slane %v6785_v20, 2  ;;  %v6781_v49 = vrot.slane %v6780_v8, 1 }
0x33dc   :  { %v6771_v9 = vmul.f32 %v8417_v10, %v6746_v29 }
0x33dd   :  { %v6792_v2 = vadd.f32 %v6791_v7, %v6790_v37  ;;  %v6787_v52 = vadd.f32 %v6786_v3, %v6785_v20  ;;  %v6782_v6 = vadd.f32 %v6781_v49, %v6780_v8 }
0x33de   :  { %v6797_v50 = vsel %vm92_vm1, %v6771_v9, 0.0 }
0x33df   :  { %v6798_v48 = vrot.slane %v6797_v50, 4  ;;  %v6751_v54 = vpop.permute.xlu1 %6750  ;;  %v6793_v12 = vrot.slane %v6792_v2, 2  ;;  %v6788_v42 = vrot.slane %v6787_v52, 1 }
0x33e0   :  { %v6772_v28 = vmul.f32 %v8418_v17, %v6751_v54 }
0x33e1   :  { %v6799_v34 = vadd.f32 %v6798_v48, %v6797_v50  ;;  %v6794_v61 = vadd.f32 %v6793_v12, %v6792_v2  ;;  %v6789_v62 = vadd.f32 %v6788_v42, %v6787_v52 }
0x33e2   :  { %v6804_v60 = vsel %vm92_vm1, %v6772_v28, 0.0 }
0x33e3   :  { %v6805_v38 = vrot.slane %v6804_v60, 4  ;;  %v6756_v53 = vpop.permute.xlu1 %6755  ;;  %v6800_v32 = vrot.slane %v6799_v34, 2  ;;  %v6795_v14 = vrot.slane %v6794_v61, 1  ;;  %v6841_v47 = vsel %vm716_vm4, %v6789_v62, %v6782_v6 }
0x33e4   :  { %v6773_v56 = vmul.f32 %v8419_v35, %v6756_v53 }
0x33e5   :  { %v6806_v4 = vadd.f32 %v6805_v38, %v6804_v60  ;;  %v6801_v21 = vadd.f32 %v6800_v32, %v6799_v34  ;;  %v6796_v26 = vadd.f32 %v6795_v14, %v6794_v61  ;;  %v6856_v60 = vld [vmem:[#allocation2 + $0x30] sm:$0xff] }
0x33e6   :  { %v6811_v44 = vsel %vm92_vm1, %v6773_v56, 0.0 }
0x33e7   :  { %v6812_v15 = vrot.slane %v6811_v44, 4  ;;  %v6761_v39 = vpop.permute.xlu1 %6760  ;;  %v6807_v16 = vrot.slane %v6806_v4, 2  ;;  %v6802_v41 = vrot.slane %v6801_v21, 1  ;;  %v6842_v51 = vsel %vm718_vm5, %v6796_v26, %v6841_v47 }
0x33e8   :  { %v6774_v22 = vmul.f32 %v8420_v23, %v6761_v39 }
0x33e9   :  { %v6813_v11 = vadd.f32 %v6812_v15, %v6811_v44  ;;  %v6808_v0 = vadd.f32 %v6807_v16, %v6806_v4  ;;  %v6803_v45 = vadd.f32 %v6802_v41, %v6801_v21 }
0x33ea   :  { %v6818_v25 = vsel %vm92_vm1, %v6774_v22, 0.0 }
0x33eb   :  { %v6814_v24 = vrot.slane %v6813_v11, 2  ;;  %v6819_v33 = vrot.slane %v6818_v25, 4  ;;  %v6766_v46 = vpop.permute.xlu1 %6765  ;;  %v6809_v55 = vrot.slane %v6808_v0, 1  ;;  %v6843_v50 = vsel %vm720_vm6, %v6803_v45, %v6842_v51 }
0x33ec   :  { %v6775_v40 = vmul.f32 %v8421_v13, %v6766_v46 }
0x33ed   :  { %v6815_v63 = vadd.f32 %v6814_v24, %v6813_v11  ;;  %v6820_v5 = vadd.f32 %v6819_v33, %v6818_v25  ;;  %v6810_v29 = vadd.f32 %v6809_v55, %v6808_v0 }
0x33ee   :  { %v6825_v27 = vsel %vm92_vm1, %v6775_v40, 0.0 }
0x33ef   :  { %v6821_v31 = vrot.slane %v6820_v5, 2  ;;  %v6826_v43 = vrot.slane %v6825_v27, 4  ;;  %v6816_v59 = vrot.slane %v6815_v63, 1  ;;  %v6844_v48 = vsel %vm722_vm7, %v6810_v29, %v6843_v50 }
0x33f1   :  { %v6822_v30 = vadd.f32 %v6821_v31, %v6820_v5  ;;  %v6827_v18 = vadd.f32 %v6826_v43, %v6825_v27  ;;  %v6817_v10 = vadd.f32 %v6816_v59, %v6815_v63 }
0x33f3   :  { %v6823_v36 = vrot.slane %v6822_v30, 1  ;;  %v6828_v37 = vrot.slane %v6827_v18, 2  ;;  %v6845_v54 = vsel %vm724_vm8, %v6817_v10, %v6844_v48 }
0x33f5   :  { %v6829_v9 = vadd.f32 %v6828_v37, %v6827_v18  ;;  %v6824_v7 = vadd.f32 %v6823_v36, %v6822_v30 }
0x33f7   :  { %v6830_v58 = vrot.slane %v6829_v9, 1  ;;  %v6846_v28 = vsel %vm726_vm9, %v6824_v7, %v6845_v54 }
0x33f9   :  { %v6831_v17 = vadd.f32 %v6830_v58, %v6829_v9 }
0x33fb   :  { %v6847_v20 = vsel %vm728_vm10, %v6831_v17, %v6846_v28 }
0x33fc   :  { %6849 = vst.msk [vmem:[#allocation3 + $0x38] sm:$0xff] %vm92_vm1, %v6847_v20 }
0x3403   :  { %v6869_v2 = vld [vmem:[#allocation3 + $0x38] sm:$0xff] }
0x3404   :  { %7808 = vmatmul.mubr.msk.f32.gmra.mrb[44].mxu1 %vm92_vm1, %v6869_v2 }
0x3405   :  { %7827 = vmatprep.mubr.msk.f32.mxu1 %vm92_vm1, %v6856_v60 }
0x340c   :  { %7828 = vmatmul.mubr.msk.f32.vlgmr.msra.gmra.mrb[44].mxu1 %vm92_vm1, %v6857_v19 }
0x34df   :  { %v7829_v34 = vpop.f32.mrb[44].mxu1 }
0x34e0   :  { %v7146_v38 = vadd.f32 %v7829_v34, %v10115_v1  ;;  %v7123_v53 = vpop.f32.mrb[45].mxu1 }
0x34e1   :  { %v7145_v35 = vadd.f32 %v10115_v1, %v7123_v53 }
0x34e2   :  { %7154 = vst.msk [vmem:[%s10305_s16 + $0x38] sm:$0xff] %vm238_vm2, %v7146_v38 }
0x34e3   :  { %7153 = vst.msk [vmem:[%s10305_s16 + $0x30] sm:$0xff] %vm238_vm2, %v7145_v35 }

</bundles_post_ra>
